<compile_context>
chip_gen: v7x
topology: tpu7x:2x2x1
jax: 0.10.0
libtpu: 0.0.40
codegen_flags: <defaults>
</compile_context>

<pallas_src>
import functools

import numpy as np
import jax
import jax.numpy as jnp
from jax.experimental import pallas as pl
from jax.experimental.pallas import tpu as pltpu


# ----------------------------------------------------------------------------
# Kernel
# ----------------------------------------------------------------------------
def _nce_seq_kernel(n_cand, ctx_ref, idx_ref, wt_ref, out_ref):
    """One row-tile of the NCE forward.

    ctx_ref: (TN, Dp)  bf16  context rows augmented with a ones column, 0-padded
    idx_ref: (TN, Kp)  int32 candidate word ids (true + noise), lane-padded
    wt_ref : (Dp, Vp)  bf16  [W | b - log(n_noise*Pn)]^T, 0-padded, VMEM resident
    out_ref: (TN, Kp)  f32   sigmoid scores (first n_cand lanes are valid)
    """
    ctx = ctx_ref[...]
    wt = wt_ref[...]
    idx = idx_ref[...]
    tn, k_pad = idx.shape
    v_pad = wt.shape[1]

    # One MXU matmul per tile (bf16 in, f32 accumulate):
    #   logits[n, w] = ctx[n] . W[w] + b[w] - log(n_noise * Pn[w])
    logits = jnp.dot(ctx, wt, preferred_element_type=jnp.float32)     # (TN, Vp)

    # Gather the K candidate logits per row, one (TN, Vp) mask at a time (no
    # (TN, K, Vp) intermediate).  Compare/select on the VPU, lane reduce on the
    # XLU, column placement with a cheap (TN, Kp) select.
    # NOTE: an out-of-range id (>= vocab) silently selects 0 -> sigmoid 0.5.
    vocab_iota = jax.lax.broadcasted_iota(jnp.int32, (tn, v_pad), 1)
    col_iota = jax.lax.broadcasted_iota(jnp.int32, (tn, k_pad), 1)
    acc = jnp.zeros((tn, k_pad), jnp.float32)
    for j in range(n_cand):                 # small static K, unrolled at trace
        sel = vocab_iota == idx[:, j:j + 1]                            # (TN, Vp)
        val = jnp.sum(jnp.where(sel, logits, 0.0), axis=-1, keepdims=True)
        acc = jnp.where(col_iota == j, val, acc)

    # Sigmoid only on the gathered candidates; lane-dense full-block store.
    out_ref[...] = jax.nn.sigmoid(acc)


# ----------------------------------------------------------------------------
# Wrapper / tiling
# ----------------------------------------------------------------------------
def _round_up(x, m):
    return ((x + m - 1) // m) * m


def _vmem_capacity_bytes():
    try:
        return int(pltpu.get_tpu_info().vmem_capacity_bytes)
    except Exception:
        return 64 * 1024 * 1024  # conservative default: v7x per-TensorCore VMEM


def _pick_tile_n(d_pad, v_pad, k_pad, in_elt_bytes, want):
    """Largest row tile (multiple of 16) whose working set fits the VMEM budget."""
    cap = _vmem_capacity_bytes()
    budget = int(cap * 0.7)                         # headroom for compiler scratch
    table = d_pad * v_pad * in_elt_bytes            # single-buffered resident table

    def need(tn):
        ctx = 2 * tn * d_pad * in_elt_bytes         # double-buffered input tile
        idxb = 2 * tn * k_pad * 4
        outb = 2 * tn * k_pad * 4
        logits = 2 * tn * v_pad * 4                 # f32 matmul result + mask temp
        accb = 2 * tn * k_pad * 4
        return table + ctx + idxb + outb + logits + accb

    tn = max(16, (want // 16) * 16)
    while tn > 16 and need(tn) > budget:
        tn = max(16, ((tn // 2) // 16) * 16)
    return tn, need(tn), cap


def nce_seq_pallas(ctx_aug, idx, w_aug_t, *, n_cand, tile_n=512):
    """ctx_aug (N, Dp) bf16, idx (N, Kp) int32, w_aug_t (Dp, Vp) bf16 -> (N, Kp) f32."""
    N, d_pad = ctx_aug.shape
    k_pad = idx.shape[1]
    d_pad2, v_pad = w_aug_t.shape
    assert d_pad2 == d_pad

    in_elt = jnp.dtype(ctx_aug.dtype).itemsize
    tn, vmem_need, cap = _pick_tile_n(d_pad, v_pad, k_pad, in_elt, tile_n)

    n16 = _round_up(max(N, 1), 16)
    tn = min(tn, n16)
    # Keep >= 2 grid steps whenever there is enough work so v7x megacore can
    # shard the "parallel" axis across its two TensorCores.
    if n16 >= 32:
        tn = min(tn, _round_up(pl.cdiv(n16, 2), 16))

    N_pad = _round_up(N, tn)
    if N_pad != N:
        ctx_aug = jnp.pad(ctx_aug, ((0, N_pad - N), (0, 0)))
        idx = jnp.pad(idx, ((0, N_pad - N), (0, 0)))   # pad ids = 0 (a valid word)

    grid = (N_pad // tn,)
    vmem_limit = int(min(cap * 0.9, max(32 * 1024 * 1024, 2 * vmem_need)))

    kernel = functools.partial(_nce_seq_kernel, n_cand)
    out_shape = jax.ShapeDtypeStruct((N_pad, k_pad), jnp.float32)

    # Resident table: single-buffered first (halves its VMEM footprint; the
    # constant index_map already means it is DMA'd from HBM only once); plain
    # double-buffered spec as a fallback for jax versions without pipeline_mode.
    table_spec_candidates = []
    try:
        table_spec_candidates.append(
            pl.BlockSpec((d_pad, v_pad), lambda i: (0, 0),
                         pipeline_mode=pl.Buffered(1)))
    except Exception:
        pass
    table_spec_candidates.append(pl.BlockSpec((d_pad, v_pad), lambda i: (0, 0)))

    out = None
    last_err = None
    for t_spec in table_spec_candidates:
        try:
            out = pl.pallas_call(
                kernel,
                out_shape=out_shape,
                grid_spec=pltpu.PrefetchScalarGridSpec(
                    num_scalar_prefetch=0,
                    grid=grid,
                    in_specs=[
                        pl.BlockSpec((tn, d_pad), lambda i: (i, 0)),
                        pl.BlockSpec((tn, k_pad), lambda i: (i, 0)),
                        t_spec,
                    ],
                    out_specs=pl.BlockSpec((tn, k_pad), lambda i: (i, 0)),
                ),
                compiler_params=pltpu.CompilerParams(
                    dimension_semantics=("parallel",),
                    vmem_limit_bytes=vmem_limit,
                ),
            )(ctx_aug, idx, w_aug_t)
            break
        except Exception as e:  # pragma: no cover - version-dependent fallback
            last_err = e
    if out is None:
        raise last_err
    return out[:N]


def nce_seq_forward(context, next_inp, W, b, Pn, n_noise, noise_key, *,
                    tile_n=512, matmul_dtype=jnp.bfloat16):
    """Reproduces NCE_seq.forward.

    context : (n_samples, n_steps, input_dim) float32
    next_inp: (n_samples, n_steps) int32 word indices (< len(Pn))
    W       : (vocab_size, input_dim) float32
    b       : (vocab_size,) float32
    Pn      : (vocab_size,) float32 noise distribution
    returns : (n_samples, n_steps, n_noise + 1) float32
    """
    n_samples, n_steps, input_dim = context.shape
    vocab_size = Pn.shape[0]
    n_next = n_noise + 1

    # Noise-word sampling (np.random.choice in the original; PRNG key here).
    noise_w = jax.random.choice(
        noise_key, vocab_size, shape=(n_samples, n_steps, n_noise), p=Pn
    ).astype(jnp.int32)
    next_w = jnp.concatenate([next_inp[..., None].astype(jnp.int32), noise_w], axis=-1)

    N = n_samples * n_steps
    idx = next_w.reshape(N, n_next)

    # Fold bias + noise score into one augmented table:
    #   W_aug = [ W | b - log(n_noise * Pn) ]   (V, D+1)
    # (Pn entries of 0 give +inf here, matching the reference semantics; bf16
    #  keeps the f32 exponent range so no overflow on the cast.)
    adj = b.astype(jnp.float32) - jnp.log(jnp.float32(n_noise) * Pn.astype(jnp.float32))
    w_aug = jnp.concatenate([W.astype(jnp.float32), adj[:, None]], axis=1)   # (V, D+1)

    ctx = context.reshape(N, input_dim).astype(jnp.float32)
    ctx_aug = jnp.concatenate([ctx, jnp.ones((N, 1), jnp.float32)], axis=1)  # (N, D+1)

    # Zero-pad contraction dim (D+1), vocab dim and candidate dim to multiples
    # of 128 (full MXU tiles, unmasked vregs, lane-dense output), then cast the
    # matmul operands to bf16.
    d_aug = input_dim + 1
    d_pad = _round_up(d_aug, 128)
    v_pad = _round_up(vocab_size, 128)
    k_pad = _round_up(n_next, 128)

    ctx_aug = jnp.pad(ctx_aug, ((0, 0), (0, d_pad - d_aug))).astype(matmul_dtype)
    w_aug_t = jnp.pad(
        w_aug, ((0, v_pad - vocab_size), (0, d_pad - d_aug))
    ).T.astype(matmul_dtype)                                                  # (Dp, Vp)
    idx = jnp.pad(idx, ((0, 0), (0, k_pad - n_next)))

    out = nce_seq_pallas(ctx_aug, idx, w_aug_t, n_cand=n_next, tile_n=tile_n)
    return out[:, :n_next].reshape(n_samples, n_steps, n_next)


# ----------------------------------------------------------------------------
# Demo / self-check
# ----------------------------------------------------------------------------
if __name__ == "__main__":
    # Small shapes consistent with the module.
    n_samples = 2
    n_steps = 16
    input_dim = 32
    vocab_size = 50         # vocab indices must be valid indices into Pn
    n_noise = 25            # default of NCE -> n_next = 26

    key = jax.random.PRNGKey(0)
    k_w, k_ctx, k_nxt, k_noise = jax.random.split(key, 4)

    # Parameters: W xavier_uniform, b zeros, Pn uniform (all deterministic).
    limit = float(np.sqrt(6.0 / (vocab_size + input_dim)))
    W = jax.random.uniform(k_w, (vocab_size, input_dim),
                           minval=-limit, maxval=limit, dtype=jnp.float32)
    b = jnp.zeros((vocab_size,), dtype=jnp.float32)
    Pn = jnp.full((vocab_size,), 1.0 / vocab_size, dtype=jnp.float32)

    # Inputs
    context = jax.random.normal(k_ctx, (n_samples, n_steps, input_dim), dtype=jnp.float32)
    next_inp = jax.random.randint(k_nxt, (n_samples, n_steps), 0, vocab_size, dtype=jnp.int32)

    out = nce_seq_forward(context, next_inp, W, b, Pn, n_noise, k_noise)
    out = jax.block_until_ready(out)
    assert out.shape == (n_samples, n_steps, n_noise + 1)

    # Pure-JAX f32 reference of the same math (same noise key -> same samples).
    noise_w = jax.random.choice(k_noise, vocab_size,
                                shape=(n_samples, n_steps, n_noise), p=Pn).astype(jnp.int32)
    next_w = jnp.concatenate([next_inp[..., None], noise_w], axis=-1)
    W_g = W[next_w]                                        # (ns, nt, K, D)
    b_g = b[next_w]
    s_theta = jnp.einsum("ntd,ntkd->ntk", context, W_g) + b_g
    ref = jax.nn.sigmoid(s_theta - jnp.log(jnp.float32(n_noise) * Pn[next_w]))

    # Tolerance covers the bf16 cast of W / ctx feeding the MXU (f32 accumulate).
    np.testing.assert_allclose(np.asarray(out), np.asarray(ref), rtol=2e-2, atol=2e-2)

    print("KERNEL_OK")
</pallas_src>

<mosaic_0001>
module attributes {stable_mosaic.version = 11 : i64} {
  func.func @_nce_seq_kernel(%arg0: i32, %arg1: memref<16x128xbf16, #tpu.memory_space<vmem>>, %arg2: memref<16x128xi32, #tpu.memory_space<vmem>>, %arg3: memref<128x128xbf16, #tpu.memory_space<vmem>>, %arg4: memref<16x128xf32, #tpu.memory_space<vmem>>) attributes {dimension_semantics = [#tpu.dimension_semantics<parallel>], iteration_bounds = array<i64: 2>, scalar_prefetch = 0 : i64, scratch_operands = 0 : i64, tpu.core_type = #tpu.core_type<tc>, window_params = [{transform_indices = @transform_0, window_bounds = array<i64: 16, 128>}, {transform_indices = @transform_1, window_bounds = array<i64: 16, 128>}, {pipeline_mode = #tpu.pipeline_mode<synchronous>, transform_indices = @transform_2, window_bounds = array<i64: 128, 128>}, {transform_indices = @transform_3, window_bounds = array<i64: 16, 128>}]} {
    %c0 = arith.constant 0 : index
    %c0_0 = arith.constant 0 : index
    %0 = vector.load %arg1[%c0, %c0_0] : memref<16x128xbf16, #tpu.memory_space<vmem>>, vector<16x128xbf16>
    %c0_1 = arith.constant 0 : index
    %c0_2 = arith.constant 0 : index
    %1 = vector.load %arg3[%c0_1, %c0_2] : memref<128x128xbf16, #tpu.memory_space<vmem>>, vector<128x128xbf16>
    %c0_3 = arith.constant 0 : index
    %c0_4 = arith.constant 0 : index
    %2 = vector.load %arg2[%c0_3, %c0_4] : memref<16x128xi32, #tpu.memory_space<vmem>>, vector<16x128xi32>
    %cst = arith.constant dense<0.000000e+00> : vector<16x128xf32>
    %3 = tpu.matmul %0, %1, %cst {dimension_numbers = #tpu.dot_dimension_numbers<[1], [0], [0], [1], [0, 0, 1, 1], [], []>} : vector<16x128xbf16>, vector<128x128xbf16>, vector<16x128xf32> -> vector<16x128xf32>
    %4 = tpu.iota {dimensions = array<i32: 1>} : vector<16x128xi32>
    %5 = tpu.iota {dimensions = array<i32: 1>} : vector<16x128xi32>
    %cst_5 = arith.constant 0.000000e+00 : f32
    %6 = vector.broadcast %cst_5 : f32 to vector<16x128xf32>
    %7 = vector.extract_strided_slice %2 {offsets = [0, 0], sizes = [16, 1], strides = [1, 1]} : vector<16x128xi32> to vector<16x1xi32>
    %8 = vector.broadcast %7 : vector<16x1xi32> to vector<16x128xi32>
    %9 = arith.cmpi eq, %4, %8 : vector<16x128xi32>
    %cst_6 = arith.constant 0.000000e+00 : f32
    %10 = vector.broadcast %cst_6 : f32 to vector<16x128xf32>
    %11 = arith.select %9, %3, %10 : vector<16x128xi1>, vector<16x128xf32>
    %cst_7 = arith.constant dense<0.000000e+00> : vector<16xf32>
    %12 = vector.multi_reduction <add>, %11, %cst_7 [1] : vector<16x128xf32> to vector<16xf32>
    %13 = vector.shape_cast %12 : vector<16xf32> to vector<16x1xf32>
    %c0_i32 = arith.constant 0 : i32
    %14 = vector.broadcast %c0_i32 : i32 to vector<16x128xi32>
    %15 = arith.cmpi eq, %5, %14 : vector<16x128xi32>
    %16 = vector.shape_cast %13 : vector<16x1xf32> to vector<16x1xf32>
    %17 = vector.broadcast %16 : vector<16x1xf32> to vector<16x128xf32>
    %18 = arith.select %15, %17, %6 : vector<16x128xi1>, vector<16x128xf32>
    %19 = vector.extract_strided_slice %2 {offsets = [0, 1], sizes = [16, 1], strides = [1, 1]} : vector<16x128xi32> to vector<16x1xi32>
    %20 = vector.broadcast %19 : vector<16x1xi32> to vector<16x128xi32>
    %21 = arith.cmpi eq, %4, %20 : vector<16x128xi32>
    %cst_8 = arith.constant 0.000000e+00 : f32
    %22 = vector.broadcast %cst_8 : f32 to vector<16x128xf32>
    %23 = arith.select %21, %3, %22 : vector<16x128xi1>, vector<16x128xf32>
    %cst_9 = arith.constant dense<0.000000e+00> : vector<16xf32>
    %24 = vector.multi_reduction <add>, %23, %cst_9 [1] : vector<16x128xf32> to vector<16xf32>
    %25 = vector.shape_cast %24 : vector<16xf32> to vector<16x1xf32>
    %c1_i32 = arith.constant 1 : i32
    %26 = vector.broadcast %c1_i32 : i32 to vector<16x128xi32>
    %27 = arith.cmpi eq, %5, %26 : vector<16x128xi32>
    %28 = vector.shape_cast %25 : vector<16x1xf32> to vector<16x1xf32>
    %29 = vector.broadcast %28 : vector<16x1xf32> to vector<16x128xf32>
    %30 = arith.select %27, %29, %18 : vector<16x128xi1>, vector<16x128xf32>
    %31 = vector.extract_strided_slice %2 {offsets = [0, 2], sizes = [16, 1], strides = [1, 1]} : vector<16x128xi32> to vector<16x1xi32>
    %32 = vector.broadcast %31 : vector<16x1xi32> to vector<16x128xi32>
    %33 = arith.cmpi eq, %4, %32 : vector<16x128xi32>
    %cst_10 = arith.constant 0.000000e+00 : f32
    %34 = vector.broadcast %cst_10 : f32 to vector<16x128xf32>
    %35 = arith.select %33, %3, %34 : vector<16x128xi1>, vector<16x128xf32>
    %cst_11 = arith.constant dense<0.000000e+00> : vector<16xf32>
    %36 = vector.multi_reduction <add>, %35, %cst_11 [1] : vector<16x128xf32> to vector<16xf32>
    %37 = vector.shape_cast %36 : vector<16xf32> to vector<16x1xf32>
    %c2_i32 = arith.constant 2 : i32
    %38 = vector.broadcast %c2_i32 : i32 to vector<16x128xi32>
    %39 = arith.cmpi eq, %5, %38 : vector<16x128xi32>
    %40 = vector.shape_cast %37 : vector<16x1xf32> to vector<16x1xf32>
    %41 = vector.broadcast %40 : vector<16x1xf32> to vector<16x128xf32>
    %42 = arith.select %39, %41, %30 : vector<16x128xi1>, vector<16x128xf32>
    %43 = vector.extract_strided_slice %2 {offsets = [0, 3], sizes = [16, 1], strides = [1, 1]} : vector<16x128xi32> to vector<16x1xi32>
    %44 = vector.broadcast %43 : vector<16x1xi32> to vector<16x128xi32>
    %45 = arith.cmpi eq, %4, %44 : vector<16x128xi32>
    %cst_12 = arith.constant 0.000000e+00 : f32
    %46 = vector.broadcast %cst_12 : f32 to vector<16x128xf32>
    %47 = arith.select %45, %3, %46 : vector<16x128xi1>, vector<16x128xf32>
    %cst_13 = arith.constant dense<0.000000e+00> : vector<16xf32>
    %48 = vector.multi_reduction <add>, %47, %cst_13 [1] : vector<16x128xf32> to vector<16xf32>
    %49 = vector.shape_cast %48 : vector<16xf32> to vector<16x1xf32>
    %c3_i32 = arith.constant 3 : i32
    %50 = vector.broadcast %c3_i32 : i32 to vector<16x128xi32>
    %51 = arith.cmpi eq, %5, %50 : vector<16x128xi32>
    %52 = vector.shape_cast %49 : vector<16x1xf32> to vector<16x1xf32>
    %53 = vector.broadcast %52 : vector<16x1xf32> to vector<16x128xf32>
    %54 = arith.select %51, %53, %42 : vector<16x128xi1>, vector<16x128xf32>
    %55 = vector.extract_strided_slice %2 {offsets = [0, 4], sizes = [16, 1], strides = [1, 1]} : vector<16x128xi32> to vector<16x1xi32>
    %56 = vector.broadcast %55 : vector<16x1xi32> to vector<16x128xi32>
    %57 = arith.cmpi eq, %4, %56 : vector<16x128xi32>
    %cst_14 = arith.constant 0.000000e+00 : f32
    %58 = vector.broadcast %cst_14 : f32 to vector<16x128xf32>
    %59 = arith.select %57, %3, %58 : vector<16x128xi1>, vector<16x128xf32>
    %cst_15 = arith.constant dense<0.000000e+00> : vector<16xf32>
    %60 = vector.multi_reduction <add>, %59, %cst_15 [1] : vector<16x128xf32> to vector<16xf32>
    %61 = vector.shape_cast %60 : vector<16xf32> to vector<16x1xf32>
    %c4_i32 = arith.constant 4 : i32
    %62 = vector.broadcast %c4_i32 : i32 to vector<16x128xi32>
    %63 = arith.cmpi eq, %5, %62 : vector<16x128xi32>
    %64 = vector.shape_cast %61 : vector<16x1xf32> to vector<16x1xf32>
    %65 = vector.broadcast %64 : vector<16x1xf32> to vector<16x128xf32>
    %66 = arith.select %63, %65, %54 : vector<16x128xi1>, vector<16x128xf32>
    %67 = vector.extract_strided_slice %2 {offsets = [0, 5], sizes = [16, 1], strides = [1, 1]} : vector<16x128xi32> to vector<16x1xi32>
    %68 = vector.broadcast %67 : vector<16x1xi32> to vector<16x128xi32>
    %69 = arith.cmpi eq, %4, %68 : vector<16x128xi32>
    %cst_16 = arith.constant 0.000000e+00 : f32
    %70 = vector.broadcast %cst_16 : f32 to vector<16x128xf32>
    %71 = arith.select %69, %3, %70 : vector<16x128xi1>, vector<16x128xf32>
    %cst_17 = arith.constant dense<0.000000e+00> : vector<16xf32>
    %72 = vector.multi_reduction <add>, %71, %cst_17 [1] : vector<16x128xf32> to vector<16xf32>
    %73 = vector.shape_cast %72 : vector<16xf32> to vector<16x1xf32>
    %c5_i32 = arith.constant 5 : i32
    %74 = vector.broadcast %c5_i32 : i32 to vector<16x128xi32>
    %75 = arith.cmpi eq, %5, %74 : vector<16x128xi32>
    %76 = vector.shape_cast %73 : vector<16x1xf32> to vector<16x1xf32>
    %77 = vector.broadcast %76 : vector<16x1xf32> to vector<16x128xf32>
    %78 = arith.select %75, %77, %66 : vector<16x128xi1>, vector<16x128xf32>
    %79 = vector.extract_strided_slice %2 {offsets = [0, 6], sizes = [16, 1], strides = [1, 1]} : vector<16x128xi32> to vector<16x1xi32>
    %80 = vector.broadcast %79 : vector<16x1xi32> to vector<16x128xi32>
    %81 = arith.cmpi eq, %4, %80 : vector<16x128xi32>
    %cst_18 = arith.constant 0.000000e+00 : f32
    %82 = vector.broadcast %cst_18 : f32 to vector<16x128xf32>
    %83 = arith.select %81, %3, %82 : vector<16x128xi1>, vector<16x128xf32>
    %cst_19 = arith.constant dense<0.000000e+00> : vector<16xf32>
    %84 = vector.multi_reduction <add>, %83, %cst_19 [1] : vector<16x128xf32> to vector<16xf32>
    %85 = vector.shape_cast %84 : vector<16xf32> to vector<16x1xf32>
    %c6_i32 = arith.constant 6 : i32
    %86 = vector.broadcast %c6_i32 : i32 to vector<16x128xi32>
    %87 = arith.cmpi eq, %5, %86 : vector<16x128xi32>
    %88 = vector.shape_cast %85 : vector<16x1xf32> to vector<16x1xf32>
    %89 = vector.broadcast %88 : vector<16x1xf32> to vector<16x128xf32>
    %90 = arith.select %87, %89, %78 : vector<16x128xi1>, vector<16x128xf32>
    %91 = vector.extract_strided_slice %2 {offsets = [0, 7], sizes = [16, 1], strides = [1, 1]} : vector<16x128xi32> to vector<16x1xi32>
    %92 = vector.broadcast %91 : vector<16x1xi32> to vector<16x128xi32>
    %93 = arith.cmpi eq, %4, %92 : vector<16x128xi32>
    %cst_20 = arith.constant 0.000000e+00 : f32
    %94 = vector.broadcast %cst_20 : f32 to vector<16x128xf32>
    %95 = arith.select %93, %3, %94 : vector<16x128xi1>, vector<16x128xf32>
    %cst_21 = arith.constant dense<0.000000e+00> : vector<16xf32>
    %96 = vector.multi_reduction <add>, %95, %cst_21 [1] : vector<16x128xf32> to vector<16xf32>
    %97 = vector.shape_cast %96 : vector<16xf32> to vector<16x1xf32>
    %c7_i32 = arith.constant 7 : i32
    %98 = vector.broadcast %c7_i32 : i32 to vector<16x128xi32>
    %99 = arith.cmpi eq, %5, %98 : vector<16x128xi32>
    %100 = vector.shape_cast %97 : vector<16x1xf32> to vector<16x1xf32>
    %101 = vector.broadcast %100 : vector<16x1xf32> to vector<16x128xf32>
    %102 = arith.select %99, %101, %90 : vector<16x128xi1>, vector<16x128xf32>
    %103 = vector.extract_strided_slice %2 {offsets = [0, 8], sizes = [16, 1], strides = [1, 1]} : vector<16x128xi32> to vector<16x1xi32>
    %104 = vector.broadcast %103 : vector<16x1xi32> to vector<16x128xi32>
    %105 = arith.cmpi eq, %4, %104 : vector<16x128xi32>
    %cst_22 = arith.constant 0.000000e+00 : f32
    %106 = vector.broadcast %cst_22 : f32 to vector<16x128xf32>
    %107 = arith.select %105, %3, %106 : vector<16x128xi1>, vector<16x128xf32>
    %cst_23 = arith.constant dense<0.000000e+00> : vector<16xf32>
    %108 = vector.multi_reduction <add>, %107, %cst_23 [1] : vector<16x128xf32> to vector<16xf32>
    %109 = vector.shape_cast %108 : vector<16xf32> to vector<16x1xf32>
    %c8_i32 = arith.constant 8 : i32
    %110 = vector.broadcast %c8_i32 : i32 to vector<16x128xi32>
    %111 = arith.cmpi eq, %5, %110 : vector<16x128xi32>
    %112 = vector.shape_cast %109 : vector<16x1xf32> to vector<16x1xf32>
    %113 = vector.broadcast %112 : vector<16x1xf32> to vector<16x128xf32>
    %114 = arith.select %111, %113, %102 : vector<16x128xi1>, vector<16x128xf32>
    %115 = vector.extract_strided_slice %2 {offsets = [0, 9], sizes = [16, 1], strides = [1, 1]} : vector<16x128xi32> to vector<16x1xi32>
    %116 = vector.broadcast %115 : vector<16x1xi32> to vector<16x128xi32>
    %117 = arith.cmpi eq, %4, %116 : vector<16x128xi32>
    %cst_24 = arith.constant 0.000000e+00 : f32
    %118 = vector.broadcast %cst_24 : f32 to vector<16x128xf32>
    %119 = arith.select %117, %3, %118 : vector<16x128xi1>, vector<16x128xf32>
    %cst_25 = arith.constant dense<0.000000e+00> : vector<16xf32>
    %120 = vector.multi_reduction <add>, %119, %cst_25 [1] : vector<16x128xf32> to vector<16xf32>
    %121 = vector.shape_cast %120 : vector<16xf32> to vector<16x1xf32>
    %c9_i32 = arith.constant 9 : i32
    %122 = vector.broadcast %c9_i32 : i32 to vector<16x128xi32>
    %123 = arith.cmpi eq, %5, %122 : vector<16x128xi32>
    %124 = vector.shape_cast %121 : vector<16x1xf32> to vector<16x1xf32>
    %125 = vector.broadcast %124 : vector<16x1xf32> to vector<16x128xf32>
    %126 = arith.select %123, %125, %114 : vector<16x128xi1>, vector<16x128xf32>
    %127 = vector.extract_strided_slice %2 {offsets = [0, 10], sizes = [16, 1], strides = [1, 1]} : vector<16x128xi32> to vector<16x1xi32>
    %128 = vector.broadcast %127 : vector<16x1xi32> to vector<16x128xi32>
    %129 = arith.cmpi eq, %4, %128 : vector<16x128xi32>
    %cst_26 = arith.constant 0.000000e+00 : f32
    %130 = vector.broadcast %cst_26 : f32 to vector<16x128xf32>
    %131 = arith.select %129, %3, %130 : vector<16x128xi1>, vector<16x128xf32>
    %cst_27 = arith.constant dense<0.000000e+00> : vector<16xf32>
    %132 = vector.multi_reduction <add>, %131, %cst_27 [1] : vector<16x128xf32> to vector<16xf32>
    %133 = vector.shape_cast %132 : vector<16xf32> to vector<16x1xf32>
    %c10_i32 = arith.constant 10 : i32
    %134 = vector.broadcast %c10_i32 : i32 to vector<16x128xi32>
    %135 = arith.cmpi eq, %5, %134 : vector<16x128xi32>
    %136 = vector.shape_cast %133 : vector<16x1xf32> to vector<16x1xf32>
    %137 = vector.broadcast %136 : vector<16x1xf32> to vector<16x128xf32>
    %138 = arith.select %135, %137, %126 : vector<16x128xi1>, vector<16x128xf32>
    %139 = vector.extract_strided_slice %2 {offsets = [0, 11], sizes = [16, 1], strides = [1, 1]} : vector<16x128xi32> to vector<16x1xi32>
    %140 = vector.broadcast %139 : vector<16x1xi32> to vector<16x128xi32>
    %141 = arith.cmpi eq, %4, %140 : vector<16x128xi32>
    %cst_28 = arith.constant 0.000000e+00 : f32
    %142 = vector.broadcast %cst_28 : f32 to vector<16x128xf32>
    %143 = arith.select %141, %3, %142 : vector<16x128xi1>, vector<16x128xf32>
    %cst_29 = arith.constant dense<0.000000e+00> : vector<16xf32>
    %144 = vector.multi_reduction <add>, %143, %cst_29 [1] : vector<16x128xf32> to vector<16xf32>
    %145 = vector.shape_cast %144 : vector<16xf32> to vector<16x1xf32>
    %c11_i32 = arith.constant 11 : i32
    %146 = vector.broadcast %c11_i32 : i32 to vector<16x128xi32>
    %147 = arith.cmpi eq, %5, %146 : vector<16x128xi32>
    %148 = vector.shape_cast %145 : vector<16x1xf32> to vector<16x1xf32>
    %149 = vector.broadcast %148 : vector<16x1xf32> to vector<16x128xf32>
    %150 = arith.select %147, %149, %138 : vector<16x128xi1>, vector<16x128xf32>
    %151 = vector.extract_strided_slice %2 {offsets = [0, 12], sizes = [16, 1], strides = [1, 1]} : vector<16x128xi32> to vector<16x1xi32>
    %152 = vector.broadcast %151 : vector<16x1xi32> to vector<16x128xi32>
    %153 = arith.cmpi eq, %4, %152 : vector<16x128xi32>
    %cst_30 = arith.constant 0.000000e+00 : f32
    %154 = vector.broadcast %cst_30 : f32 to vector<16x128xf32>
    %155 = arith.select %153, %3, %154 : vector<16x128xi1>, vector<16x128xf32>
    %cst_31 = arith.constant dense<0.000000e+00> : vector<16xf32>
    %156 = vector.multi_reduction <add>, %155, %cst_31 [1] : vector<16x128xf32> to vector<16xf32>
    %157 = vector.shape_cast %156 : vector<16xf32> to vector<16x1xf32>
    %c12_i32 = arith.constant 12 : i32
    %158 = vector.broadcast %c12_i32 : i32 to vector<16x128xi32>
    %159 = arith.cmpi eq, %5, %158 : vector<16x128xi32>
    %160 = vector.shape_cast %157 : vector<16x1xf32> to vector<16x1xf32>
    %161 = vector.broadcast %160 : vector<16x1xf32> to vector<16x128xf32>
    %162 = arith.select %159, %161, %150 : vector<16x128xi1>, vector<16x128xf32>
    %163 = vector.extract_strided_slice %2 {offsets = [0, 13], sizes = [16, 1], strides = [1, 1]} : vector<16x128xi32> to vector<16x1xi32>
    %164 = vector.broadcast %163 : vector<16x1xi32> to vector<16x128xi32>
    %165 = arith.cmpi eq, %4, %164 : vector<16x128xi32>
    %cst_32 = arith.constant 0.000000e+00 : f32
    %166 = vector.broadcast %cst_32 : f32 to vector<16x128xf32>
    %167 = arith.select %165, %3, %166 : vector<16x128xi1>, vector<16x128xf32>
    %cst_33 = arith.constant dense<0.000000e+00> : vector<16xf32>
    %168 = vector.multi_reduction <add>, %167, %cst_33 [1] : vector<16x128xf32> to vector<16xf32>
    %169 = vector.shape_cast %168 : vector<16xf32> to vector<16x1xf32>
    %c13_i32 = arith.constant 13 : i32
    %170 = vector.broadcast %c13_i32 : i32 to vector<16x128xi32>
    %171 = arith.cmpi eq, %5, %170 : vector<16x128xi32>
    %172 = vector.shape_cast %169 : vector<16x1xf32> to vector<16x1xf32>
    %173 = vector.broadcast %172 : vector<16x1xf32> to vector<16x128xf32>
    %174 = arith.select %171, %173, %162 : vector<16x128xi1>, vector<16x128xf32>
    %175 = vector.extract_strided_slice %2 {offsets = [0, 14], sizes = [16, 1], strides = [1, 1]} : vector<16x128xi32> to vector<16x1xi32>
    %176 = vector.broadcast %175 : vector<16x1xi32> to vector<16x128xi32>
    %177 = arith.cmpi eq, %4, %176 : vector<16x128xi32>
    %cst_34 = arith.constant 0.000000e+00 : f32
    %178 = vector.broadcast %cst_34 : f32 to vector<16x128xf32>
    %179 = arith.select %177, %3, %178 : vector<16x128xi1>, vector<16x128xf32>
    %cst_35 = arith.constant dense<0.000000e+00> : vector<16xf32>
    %180 = vector.multi_reduction <add>, %179, %cst_35 [1] : vector<16x128xf32> to vector<16xf32>
    %181 = vector.shape_cast %180 : vector<16xf32> to vector<16x1xf32>
    %c14_i32 = arith.constant 14 : i32
    %182 = vector.broadcast %c14_i32 : i32 to vector<16x128xi32>
    %183 = arith.cmpi eq, %5, %182 : vector<16x128xi32>
    %184 = vector.shape_cast %181 : vector<16x1xf32> to vector<16x1xf32>
    %185 = vector.broadcast %184 : vector<16x1xf32> to vector<16x128xf32>
    %186 = arith.select %183, %185, %174 : vector<16x128xi1>, vector<16x128xf32>
    %187 = vector.extract_strided_slice %2 {offsets = [0, 15], sizes = [16, 1], strides = [1, 1]} : vector<16x128xi32> to vector<16x1xi32>
    %188 = vector.broadcast %187 : vector<16x1xi32> to vector<16x128xi32>
    %189 = arith.cmpi eq, %4, %188 : vector<16x128xi32>
    %cst_36 = arith.constant 0.000000e+00 : f32
    %190 = vector.broadcast %cst_36 : f32 to vector<16x128xf32>
    %191 = arith.select %189, %3, %190 : vector<16x128xi1>, vector<16x128xf32>
    %cst_37 = arith.constant dense<0.000000e+00> : vector<16xf32>
    %192 = vector.multi_reduction <add>, %191, %cst_37 [1] : vector<16x128xf32> to vector<16xf32>
    %193 = vector.shape_cast %192 : vector<16xf32> to vector<16x1xf32>
    %c15_i32 = arith.constant 15 : i32
    %194 = vector.broadcast %c15_i32 : i32 to vector<16x128xi32>
    %195 = arith.cmpi eq, %5, %194 : vector<16x128xi32>
    %196 = vector.shape_cast %193 : vector<16x1xf32> to vector<16x1xf32>
    %197 = vector.broadcast %196 : vector<16x1xf32> to vector<16x128xf32>
    %198 = arith.select %195, %197, %186 : vector<16x128xi1>, vector<16x128xf32>
    %199 = vector.extract_strided_slice %2 {offsets = [0, 16], sizes = [16, 1], strides = [1, 1]} : vector<16x128xi32> to vector<16x1xi32>
    %200 = vector.broadcast %199 : vector<16x1xi32> to vector<16x128xi32>
    %201 = arith.cmpi eq, %4, %200 : vector<16x128xi32>
    %cst_38 = arith.constant 0.000000e+00 : f32
    %202 = vector.broadcast %cst_38 : f32 to vector<16x128xf32>
    %203 = arith.select %201, %3, %202 : vector<16x128xi1>, vector<16x128xf32>
    %cst_39 = arith.constant dense<0.000000e+00> : vector<16xf32>
    %204 = vector.multi_reduction <add>, %203, %cst_39 [1] : vector<16x128xf32> to vector<16xf32>
    %205 = vector.shape_cast %204 : vector<16xf32> to vector<16x1xf32>
    %c16_i32 = arith.constant 16 : i32
    %206 = vector.broadcast %c16_i32 : i32 to vector<16x128xi32>
    %207 = arith.cmpi eq, %5, %206 : vector<16x128xi32>
    %208 = vector.shape_cast %205 : vector<16x1xf32> to vector<16x1xf32>
    %209 = vector.broadcast %208 : vector<16x1xf32> to vector<16x128xf32>
    %210 = arith.select %207, %209, %198 : vector<16x128xi1>, vector<16x128xf32>
    %211 = vector.extract_strided_slice %2 {offsets = [0, 17], sizes = [16, 1], strides = [1, 1]} : vector<16x128xi32> to vector<16x1xi32>
    %212 = vector.broadcast %211 : vector<16x1xi32> to vector<16x128xi32>
    %213 = arith.cmpi eq, %4, %212 : vector<16x128xi32>
    %cst_40 = arith.constant 0.000000e+00 : f32
    %214 = vector.broadcast %cst_40 : f32 to vector<16x128xf32>
    %215 = arith.select %213, %3, %214 : vector<16x128xi1>, vector<16x128xf32>
    %cst_41 = arith.constant dense<0.000000e+00> : vector<16xf32>
    %216 = vector.multi_reduction <add>, %215, %cst_41 [1] : vector<16x128xf32> to vector<16xf32>
    %217 = vector.shape_cast %216 : vector<16xf32> to vector<16x1xf32>
    %c17_i32 = arith.constant 17 : i32
    %218 = vector.broadcast %c17_i32 : i32 to vector<16x128xi32>
    %219 = arith.cmpi eq, %5, %218 : vector<16x128xi32>
    %220 = vector.shape_cast %217 : vector<16x1xf32> to vector<16x1xf32>
    %221 = vector.broadcast %220 : vector<16x1xf32> to vector<16x128xf32>
    %222 = arith.select %219, %221, %210 : vector<16x128xi1>, vector<16x128xf32>
    %223 = vector.extract_strided_slice %2 {offsets = [0, 18], sizes = [16, 1], strides = [1, 1]} : vector<16x128xi32> to vector<16x1xi32>
    %224 = vector.broadcast %223 : vector<16x1xi32> to vector<16x128xi32>
    %225 = arith.cmpi eq, %4, %224 : vector<16x128xi32>
    %cst_42 = arith.constant 0.000000e+00 : f32
    %226 = vector.broadcast %cst_42 : f32 to vector<16x128xf32>
    %227 = arith.select %225, %3, %226 : vector<16x128xi1>, vector<16x128xf32>
    %cst_43 = arith.constant dense<0.000000e+00> : vector<16xf32>
    %228 = vector.multi_reduction <add>, %227, %cst_43 [1] : vector<16x128xf32> to vector<16xf32>
    %229 = vector.shape_cast %228 : vector<16xf32> to vector<16x1xf32>
    %c18_i32 = arith.constant 18 : i32
    %230 = vector.broadcast %c18_i32 : i32 to vector<16x128xi32>
    %231 = arith.cmpi eq, %5, %230 : vector<16x128xi32>
    %232 = vector.shape_cast %229 : vector<16x1xf32> to vector<16x1xf32>
    %233 = vector.broadcast %232 : vector<16x1xf32> to vector<16x128xf32>
    %234 = arith.select %231, %233, %222 : vector<16x128xi1>, vector<16x128xf32>
    %235 = vector.extract_strided_slice %2 {offsets = [0, 19], sizes = [16, 1], strides = [1, 1]} : vector<16x128xi32> to vector<16x1xi32>
    %236 = vector.broadcast %235 : vector<16x1xi32> to vector<16x128xi32>
    %237 = arith.cmpi eq, %4, %236 : vector<16x128xi32>
    %cst_44 = arith.constant 0.000000e+00 : f32
    %238 = vector.broadcast %cst_44 : f32 to vector<16x128xf32>
    %239 = arith.select %237, %3, %238 : vector<16x128xi1>, vector<16x128xf32>
    %cst_45 = arith.constant dense<0.000000e+00> : vector<16xf32>
    %240 = vector.multi_reduction <add>, %239, %cst_45 [1] : vector<16x128xf32> to vector<16xf32>
    %241 = vector.shape_cast %240 : vector<16xf32> to vector<16x1xf32>
    %c19_i32 = arith.constant 19 : i32
    %242 = vector.broadcast %c19_i32 : i32 to vector<16x128xi32>
    %243 = arith.cmpi eq, %5, %242 : vector<16x128xi32>
    %244 = vector.shape_cast %241 : vector<16x1xf32> to vector<16x1xf32>
    %245 = vector.broadcast %244 : vector<16x1xf32> to vector<16x128xf32>
    %246 = arith.select %243, %245, %234 : vector<16x128xi1>, vector<16x128xf32>
    %247 = vector.extract_strided_slice %2 {offsets = [0, 20], sizes = [16, 1], strides = [1, 1]} : vector<16x128xi32> to vector<16x1xi32>
    %248 = vector.broadcast %247 : vector<16x1xi32> to vector<16x128xi32>
    %249 = arith.cmpi eq, %4, %248 : vector<16x128xi32>
    %cst_46 = arith.constant 0.000000e+00 : f32
    %250 = vector.broadcast %cst_46 : f32 to vector<16x128xf32>
    %251 = arith.select %249, %3, %250 : vector<16x128xi1>, vector<16x128xf32>
    %cst_47 = arith.constant dense<0.000000e+00> : vector<16xf32>
    %252 = vector.multi_reduction <add>, %251, %cst_47 [1] : vector<16x128xf32> to vector<16xf32>
    %253 = vector.shape_cast %252 : vector<16xf32> to vector<16x1xf32>
    %c20_i32 = arith.constant 20 : i32
    %254 = vector.broadcast %c20_i32 : i32 to vector<16x128xi32>
    %255 = arith.cmpi eq, %5, %254 : vector<16x128xi32>
    %256 = vector.shape_cast %253 : vector<16x1xf32> to vector<16x1xf32>
    %257 = vector.broadcast %256 : vector<16x1xf32> to vector<16x128xf32>
    %258 = arith.select %255, %257, %246 : vector<16x128xi1>, vector<16x128xf32>
    %259 = vector.extract_strided_slice %2 {offsets = [0, 21], sizes = [16, 1], strides = [1, 1]} : vector<16x128xi32> to vector<16x1xi32>
    %260 = vector.broadcast %259 : vector<16x1xi32> to vector<16x128xi32>
    %261 = arith.cmpi eq, %4, %260 : vector<16x128xi32>
    %cst_48 = arith.constant 0.000000e+00 : f32
    %262 = vector.broadcast %cst_48 : f32 to vector<16x128xf32>
    %263 = arith.select %261, %3, %262 : vector<16x128xi1>, vector<16x128xf32>
    %cst_49 = arith.constant dense<0.000000e+00> : vector<16xf32>
    %264 = vector.multi_reduction <add>, %263, %cst_49 [1] : vector<16x128xf32> to vector<16xf32>
    %265 = vector.shape_cast %264 : vector<16xf32> to vector<16x1xf32>
    %c21_i32 = arith.constant 21 : i32
    %266 = vector.broadcast %c21_i32 : i32 to vector<16x128xi32>
    %267 = arith.cmpi eq, %5, %266 : vector<16x128xi32>
    %268 = vector.shape_cast %265 : vector<16x1xf32> to vector<16x1xf32>
    %269 = vector.broadcast %268 : vector<16x1xf32> to vector<16x128xf32>
    %270 = arith.select %267, %269, %258 : vector<16x128xi1>, vector<16x128xf32>
    %271 = vector.extract_strided_slice %2 {offsets = [0, 22], sizes = [16, 1], strides = [1, 1]} : vector<16x128xi32> to vector<16x1xi32>
    %272 = vector.broadcast %271 : vector<16x1xi32> to vector<16x128xi32>
    %273 = arith.cmpi eq, %4, %272 : vector<16x128xi32>
    %cst_50 = arith.constant 0.000000e+00 : f32
    %274 = vector.broadcast %cst_50 : f32 to vector<16x128xf32>
    %275 = arith.select %273, %3, %274 : vector<16x128xi1>, vector<16x128xf32>
    %cst_51 = arith.constant dense<0.000000e+00> : vector<16xf32>
    %276 = vector.multi_reduction <add>, %275, %cst_51 [1] : vector<16x128xf32> to vector<16xf32>
    %277 = vector.shape_cast %276 : vector<16xf32> to vector<16x1xf32>
    %c22_i32 = arith.constant 22 : i32
    %278 = vector.broadcast %c22_i32 : i32 to vector<16x128xi32>
    %279 = arith.cmpi eq, %5, %278 : vector<16x128xi32>
    %280 = vector.shape_cast %277 : vector<16x1xf32> to vector<16x1xf32>
    %281 = vector.broadcast %280 : vector<16x1xf32> to vector<16x128xf32>
    %282 = arith.select %279, %281, %270 : vector<16x128xi1>, vector<16x128xf32>
    %283 = vector.extract_strided_slice %2 {offsets = [0, 23], sizes = [16, 1], strides = [1, 1]} : vector<16x128xi32> to vector<16x1xi32>
    %284 = vector.broadcast %283 : vector<16x1xi32> to vector<16x128xi32>
    %285 = arith.cmpi eq, %4, %284 : vector<16x128xi32>
    %cst_52 = arith.constant 0.000000e+00 : f32
    %286 = vector.broadcast %cst_52 : f32 to vector<16x128xf32>
    %287 = arith.select %285, %3, %286 : vector<16x128xi1>, vector<16x128xf32>
    %cst_53 = arith.constant dense<0.000000e+00> : vector<16xf32>
    %288 = vector.multi_reduction <add>, %287, %cst_53 [1] : vector<16x128xf32> to vector<16xf32>
    %289 = vector.shape_cast %288 : vector<16xf32> to vector<16x1xf32>
    %c23_i32 = arith.constant 23 : i32
    %290 = vector.broadcast %c23_i32 : i32 to vector<16x128xi32>
    %291 = arith.cmpi eq, %5, %290 : vector<16x128xi32>
    %292 = vector.shape_cast %289 : vector<16x1xf32> to vector<16x1xf32>
    %293 = vector.broadcast %292 : vector<16x1xf32> to vector<16x128xf32>
    %294 = arith.select %291, %293, %282 : vector<16x128xi1>, vector<16x128xf32>
    %295 = vector.extract_strided_slice %2 {offsets = [0, 24], sizes = [16, 1], strides = [1, 1]} : vector<16x128xi32> to vector<16x1xi32>
    %296 = vector.broadcast %295 : vector<16x1xi32> to vector<16x128xi32>
    %297 = arith.cmpi eq, %4, %296 : vector<16x128xi32>
    %cst_54 = arith.constant 0.000000e+00 : f32
    %298 = vector.broadcast %cst_54 : f32 to vector<16x128xf32>
    %299 = arith.select %297, %3, %298 : vector<16x128xi1>, vector<16x128xf32>
    %cst_55 = arith.constant dense<0.000000e+00> : vector<16xf32>
    %300 = vector.multi_reduction <add>, %299, %cst_55 [1] : vector<16x128xf32> to vector<16xf32>
    %301 = vector.shape_cast %300 : vector<16xf32> to vector<16x1xf32>
    %c24_i32 = arith.constant 24 : i32
    %302 = vector.broadcast %c24_i32 : i32 to vector<16x128xi32>
    %303 = arith.cmpi eq, %5, %302 : vector<16x128xi32>
    %304 = vector.shape_cast %301 : vector<16x1xf32> to vector<16x1xf32>
    %305 = vector.broadcast %304 : vector<16x1xf32> to vector<16x128xf32>
    %306 = arith.select %303, %305, %294 : vector<16x128xi1>, vector<16x128xf32>
    %307 = vector.extract_strided_slice %2 {offsets = [0, 25], sizes = [16, 1], strides = [1, 1]} : vector<16x128xi32> to vector<16x1xi32>
    %308 = vector.broadcast %307 : vector<16x1xi32> to vector<16x128xi32>
    %309 = arith.cmpi eq, %4, %308 : vector<16x128xi32>
    %cst_56 = arith.constant 0.000000e+00 : f32
    %310 = vector.broadcast %cst_56 : f32 to vector<16x128xf32>
    %311 = arith.select %309, %3, %310 : vector<16x128xi1>, vector<16x128xf32>
    %cst_57 = arith.constant dense<0.000000e+00> : vector<16xf32>
    %312 = vector.multi_reduction <add>, %311, %cst_57 [1] : vector<16x128xf32> to vector<16xf32>
    %313 = vector.shape_cast %312 : vector<16xf32> to vector<16x1xf32>
    %c25_i32 = arith.constant 25 : i32
    %314 = vector.broadcast %c25_i32 : i32 to vector<16x128xi32>
    %315 = arith.cmpi eq, %5, %314 : vector<16x128xi32>
    %316 = vector.shape_cast %313 : vector<16x1xf32> to vector<16x1xf32>
    %317 = vector.broadcast %316 : vector<16x1xf32> to vector<16x128xf32>
    %318 = arith.select %315, %317, %306 : vector<16x128xi1>, vector<16x128xf32>
    %319 = arith.negf %318 : vector<16x128xf32>
    %320 = math.exp %319 : vector<16x128xf32>
    %cst_58 = arith.constant 1.000000e+00 : f32
    %321 = vector.broadcast %cst_58 : f32 to vector<16x128xf32>
    %322 = arith.addf %321, %320 : vector<16x128xf32>
    %323 = arith.divf %321, %322 : vector<16x128xf32>
    %c0_59 = arith.constant 0 : index
    %c0_60 = arith.constant 0 : index
    %324 = vector.load %arg4[%c0_59, %c0_60] : memref<16x128xf32, #tpu.memory_space<vmem>>, vector<16x128xf32>
    tpu.vector_store %arg4[%c0_59, %c0_60], %323 {strides = array<i32>} : memref<16x128xf32, #tpu.memory_space<vmem>>, vector<16x128xf32>,
    return
  }
  func.func @transform_0(%arg0: i32) -> (i32, i32) {
    %c0_i32 = arith.constant 0 : i32
    %c0_i32_0 = arith.constant 0 : i32
    return %arg0, %c0_i32 : i32, i32
  }
  func.func @transform_1(%arg0: i32) -> (i32, i32) {
    %c0_i32 = arith.constant 0 : i32
    %c0_i32_0 = arith.constant 0 : i32
    return %arg0, %c0_i32 : i32, i32
  }
  func.func @transform_2(%arg0: i32) -> (i32, i32) {
    %c0_i32 = arith.constant 0 : i32
    %c0_i32_0 = arith.constant 0 : i32
    %c0_i32_1 = arith.constant 0 : i32
    return %c0_i32, %c0_i32_0 : i32, i32
  }
  func.func @transform_3(%arg0: i32) -> (i32, i32) {
    %c0_i32 = arith.constant 0 : i32
    %c0_i32_0 = arith.constant 0 : i32
    return %arg0, %c0_i32 : i32, i32
  }
}

module attributes {stable_mosaic.version = 11 : i64} {
  func.func @_nce_seq_kernel(%arg0: i32, %arg1: memref<16x128xbf16, #tpu.memory_space<vmem>>, %arg2: memref<16x128xi32, #tpu.memory_space<vmem>>, %arg3: memref<128x128xbf16, #tpu.memory_space<vmem>>, %arg4: memref<16x128xf32, #tpu.memory_space<vmem>>) attributes {dimension_semantics = [#tpu.dimension_semantics<parallel>], iteration_bounds = array<i64: 2>, scalar_prefetch = 0 : i64, scratch_operands = 0 : i64, tpu.core_type = #tpu.core_type<tc>, window_params = [{transform_indices = @transform_0, window_bounds = array<i64: 16, 128>}, {transform_indices = @transform_1, window_bounds = array<i64: 16, 128>}, {pipeline_mode = #tpu.pipeline_mode<synchronous>, transform_indices = @transform_2, window_bounds = array<i64: 128, 128>}, {transform_indices = @transform_3, window_bounds = array<i64: 16, 128>}]} {
    %c0 = arith.constant 0 : index
    %c0_0 = arith.constant 0 : index
    %0 = vector.load %arg1[%c0, %c0_0] : memref<16x128xbf16, #tpu.memory_space<vmem>>, vector<16x128xbf16>
    %c0_1 = arith.constant 0 : index
    %c0_2 = arith.constant 0 : index
    %1 = vector.load %arg3[%c0_1, %c0_2] : memref<128x128xbf16, #tpu.memory_space<vmem>>, vector<128x128xbf16>
    %c0_3 = arith.constant 0 : index
    %c0_4 = arith.constant 0 : index
    %2 = vector.load %arg2[%c0_3, %c0_4] : memref<16x128xi32, #tpu.memory_space<vmem>>, vector<16x128xi32>
    %cst = arith.constant dense<0.000000e+00> : vector<16x128xf32>
    %3 = tpu.matmul %0, %1, %cst {dimension_numbers = #tpu.dot_dimension_numbers<[1], [0], [0], [1], [0, 0, 1, 1], [], []>} : vector<16x128xbf16>, vector<128x128xbf16>, vector<16x128xf32> -> vector<16x128xf32>
    %4 = tpu.iota {dimensions = array<i32: 1>} : vector<16x128xi32>
    %5 = tpu.iota {dimensions = array<i32: 1>} : vector<16x128xi32>
    %cst_5 = arith.constant 0.000000e+00 : f32
    %6 = vector.broadcast %cst_5 : f32 to vector<16x128xf32>
    %7 = vector.extract_strided_slice %2 {offsets = [0, 0], sizes = [16, 1], strides = [1, 1]} : vector<16x128xi32> to vector<16x1xi32>
    %8 = vector.broadcast %7 : vector<16x1xi32> to vector<16x128xi32>
    %9 = arith.cmpi eq, %4, %8 : vector<16x128xi32>
    %cst_6 = arith.constant 0.000000e+00 : f32
    %10 = vector.broadcast %cst_6 : f32 to vector<16x128xf32>
    %11 = arith.select %9, %3, %10 : vector<16x128xi1>, vector<16x128xf32>
    %cst_7 = arith.constant dense<0.000000e+00> : vector<16xf32>
    %12 = vector.multi_reduction <add>, %11, %cst_7 [1] : vector<16x128xf32> to vector<16xf32>
    %13 = vector.shape_cast %12 : vector<16xf32> to vector<16x1xf32>
    %c0_i32 = arith.constant 0 : i32
    %14 = vector.broadcast %c0_i32 : i32 to vector<16x128xi32>
    %15 = arith.cmpi eq, %5, %14 : vector<16x128xi32>
    %16 = vector.shape_cast %13 : vector<16x1xf32> to vector<16x1xf32>
    %17 = vector.broadcast %16 : vector<16x1xf32> to vector<16x128xf32>
    %18 = arith.select %15, %17, %6 : vector<16x128xi1>, vector<16x128xf32>
    %19 = vector.extract_strided_slice %2 {offsets = [0, 1], sizes = [16, 1], strides = [1, 1]} : vector<16x128xi32> to vector<16x1xi32>
    %20 = vector.broadcast %19 : vector<16x1xi32> to vector<16x128xi32>
    %21 = arith.cmpi eq, %4, %20 : vector<16x128xi32>
    %cst_8 = arith.constant 0.000000e+00 : f32
    %22 = vector.broadcast %cst_8 : f32 to vector<16x128xf32>
    %23 = arith.select %21, %3, %22 : vector<16x128xi1>, vector<16x128xf32>
    %cst_9 = arith.constant dense<0.000000e+00> : vector<16xf32>
    %24 = vector.multi_reduction <add>, %23, %cst_9 [1] : vector<16x128xf32> to vector<16xf32>
    %25 = vector.shape_cast %24 : vector<16xf32> to vector<16x1xf32>
    %c1_i32 = arith.constant 1 : i32
    %26 = vector.broadcast %c1_i32 : i32 to vector<16x128xi32>
    %27 = arith.cmpi eq, %5, %26 : vector<16x128xi32>
    %28 = vector.shape_cast %25 : vector<16x1xf32> to vector<16x1xf32>
    %29 = vector.broadcast %28 : vector<16x1xf32> to vector<16x128xf32>
    %30 = arith.select %27, %29, %18 : vector<16x128xi1>, vector<16x128xf32>
    %31 = vector.extract_strided_slice %2 {offsets = [0, 2], sizes = [16, 1], strides = [1, 1]} : vector<16x128xi32> to vector<16x1xi32>
    %32 = vector.broadcast %31 : vector<16x1xi32> to vector<16x128xi32>
    %33 = arith.cmpi eq, %4, %32 : vector<16x128xi32>
    %cst_10 = arith.constant 0.000000e+00 : f32
    %34 = vector.broadcast %cst_10 : f32 to vector<16x128xf32>
    %35 = arith.select %33, %3, %34 : vector<16x128xi1>, vector<16x128xf32>
    %cst_11 = arith.constant dense<0.000000e+00> : vector<16xf32>
    %36 = vector.multi_reduction <add>, %35, %cst_11 [1] : vector<16x128xf32> to vector<16xf32>
    %37 = vector.shape_cast %36 : vector<16xf32> to vector<16x1xf32>
    %c2_i32 = arith.constant 2 : i32
    %38 = vector.broadcast %c2_i32 : i32 to vector<16x128xi32>
    %39 = arith.cmpi eq, %5, %38 : vector<16x128xi32>
    %40 = vector.shape_cast %37 : vector<16x1xf32> to vector<16x1xf32>
    %41 = vector.broadcast %40 : vector<16x1xf32> to vector<16x128xf32>
    %42 = arith.select %39, %41, %30 : vector<16x128xi1>, vector<16x128xf32>
    %43 = vector.extract_strided_slice %2 {offsets = [0, 3], sizes = [16, 1], strides = [1, 1]} : vector<16x128xi32> to vector<16x1xi32>
    %44 = vector.broadcast %43 : vector<16x1xi32> to vector<16x128xi32>
    %45 = arith.cmpi eq, %4, %44 : vector<16x128xi32>
    %cst_12 = arith.constant 0.000000e+00 : f32
    %46 = vector.broadcast %cst_12 : f32 to vector<16x128xf32>
    %47 = arith.select %45, %3, %46 : vector<16x128xi1>, vector<16x128xf32>
    %cst_13 = arith.constant dense<0.000000e+00> : vector<16xf32>
    %48 = vector.multi_reduction <add>, %47, %cst_13 [1] : vector<16x128xf32> to vector<16xf32>
    %49 = vector.shape_cast %48 : vector<16xf32> to vector<16x1xf32>
    %c3_i32 = arith.constant 3 : i32
    %50 = vector.broadcast %c3_i32 : i32 to vector<16x128xi32>
    %51 = arith.cmpi eq, %5, %50 : vector<16x128xi32>
    %52 = vector.shape_cast %49 : vector<16x1xf32> to vector<16x1xf32>
    %53 = vector.broadcast %52 : vector<16x1xf32> to vector<16x128xf32>
    %54 = arith.select %51, %53, %42 : vector<16x128xi1>, vector<16x128xf32>
    %55 = vector.extract_strided_slice %2 {offsets = [0, 4], sizes = [16, 1], strides = [1, 1]} : vector<16x128xi32> to vector<16x1xi32>
    %56 = vector.broadcast %55 : vector<16x1xi32> to vector<16x128xi32>
    %57 = arith.cmpi eq, %4, %56 : vector<16x128xi32>
    %cst_14 = arith.constant 0.000000e+00 : f32
    %58 = vector.broadcast %cst_14 : f32 to vector<16x128xf32>
    %59 = arith.select %57, %3, %58 : vector<16x128xi1>, vector<16x128xf32>
    %cst_15 = arith.constant dense<0.000000e+00> : vector<16xf32>
    %60 = vector.multi_reduction <add>, %59, %cst_15 [1] : vector<16x128xf32> to vector<16xf32>
    %61 = vector.shape_cast %60 : vector<16xf32> to vector<16x1xf32>
    %c4_i32 = arith.constant 4 : i32
    %62 = vector.broadcast %c4_i32 : i32 to vector<16x128xi32>
    %63 = arith.cmpi eq, %5, %62 : vector<16x128xi32>
    %64 = vector.shape_cast %61 : vector<16x1xf32> to vector<16x1xf32>
    %65 = vector.broadcast %64 : vector<16x1xf32> to vector<16x128xf32>
    %66 = arith.select %63, %65, %54 : vector<16x128xi1>, vector<16x128xf32>
    %67 = vector.extract_strided_slice %2 {offsets = [0, 5], sizes = [16, 1], strides = [1, 1]} : vector<16x128xi32> to vector<16x1xi32>
    %68 = vector.broadcast %67 : vector<16x1xi32> to vector<16x128xi32>
    %69 = arith.cmpi eq, %4, %68 : vector<16x128xi32>
    %cst_16 = arith.constant 0.000000e+00 : f32
    %70 = vector.broadcast %cst_16 : f32 to vector<16x128xf32>
    %71 = arith.select %69, %3, %70 : vector<16x128xi1>, vector<16x128xf32>
    %cst_17 = arith.constant dense<0.000000e+00> : vector<16xf32>
    %72 = vector.multi_reduction <add>, %71, %cst_17 [1] : vector<16x128xf32> to vector<16xf32>
    %73 = vector.shape_cast %72 : vector<16xf32> to vector<16x1xf32>
    %c5_i32 = arith.constant 5 : i32
    %74 = vector.broadcast %c5_i32 : i32 to vector<16x128xi32>
    %75 = arith.cmpi eq, %5, %74 : vector<16x128xi32>
    %76 = vector.shape_cast %73 : vector<16x1xf32> to vector<16x1xf32>
    %77 = vector.broadcast %76 : vector<16x1xf32> to vector<16x128xf32>
    %78 = arith.select %75, %77, %66 : vector<16x128xi1>, vector<16x128xf32>
    %79 = vector.extract_strided_slice %2 {offsets = [0, 6], sizes = [16, 1], strides = [1, 1]} : vector<16x128xi32> to vector<16x1xi32>
    %80 = vector.broadcast %79 : vector<16x1xi32> to vector<16x128xi32>
    %81 = arith.cmpi eq, %4, %80 : vector<16x128xi32>
    %cst_18 = arith.constant 0.000000e+00 : f32
    %82 = vector.broadcast %cst_18 : f32 to vector<16x128xf32>
    %83 = arith.select %81, %3, %82 : vector<16x128xi1>, vector<16x128xf32>
    %cst_19 = arith.constant dense<0.000000e+00> : vector<16xf32>
    %84 = vector.multi_reduction <add>, %83, %cst_19 [1] : vector<16x128xf32> to vector<16xf32>
    %85 = vector.shape_cast %84 : vector<16xf32> to vector<16x1xf32>
    %c6_i32 = arith.constant 6 : i32
    %86 = vector.broadcast %c6_i32 : i32 to vector<16x128xi32>
    %87 = arith.cmpi eq, %5, %86 : vector<16x128xi32>
    %88 = vector.shape_cast %85 : vector<16x1xf32> to vector<16x1xf32>
    %89 = vector.broadcast %88 : vector<16x1xf32> to vector<16x128xf32>
    %90 = arith.select %87, %89, %78 : vector<16x128xi1>, vector<16x128xf32>
    %91 = vector.extract_strided_slice %2 {offsets = [0, 7], sizes = [16, 1], strides = [1, 1]} : vector<16x128xi32> to vector<16x1xi32>
    %92 = vector.broadcast %91 : vector<16x1xi32> to vector<16x128xi32>
    %93 = arith.cmpi eq, %4, %92 : vector<16x128xi32>
    %cst_20 = arith.constant 0.000000e+00 : f32
    %94 = vector.broadcast %cst_20 : f32 to vector<16x128xf32>
    %95 = arith.select %93, %3, %94 : vector<16x128xi1>, vector<16x128xf32>
    %cst_21 = arith.constant dense<0.000000e+00> : vector<16xf32>
    %96 = vector.multi_reduction <add>, %95, %cst_21 [1] : vector<16x128xf32> to vector<16xf32>
    %97 = vector.shape_cast %96 : vector<16xf32> to vector<16x1xf32>
    %c7_i32 = arith.constant 7 : i32
    %98 = vector.broadcast %c7_i32 : i32 to vector<16x128xi32>
    %99 = arith.cmpi eq, %5, %98 : vector<16x128xi32>
    %100 = vector.shape_cast %97 : vector<16x1xf32> to vector<16x1xf32>
    %101 = vector.broadcast %100 : vector<16x1xf32> to vector<16x128xf32>
    %102 = arith.select %99, %101, %90 : vector<16x128xi1>, vector<16x128xf32>
    %103 = vector.extract_strided_slice %2 {offsets = [0, 8], sizes = [16, 1], strides = [1, 1]} : vector<16x128xi32> to vector<16x1xi32>
    %104 = vector.broadcast %103 : vector<16x1xi32> to vector<16x128xi32>
    %105 = arith.cmpi eq, %4, %104 : vector<16x128xi32>
    %cst_22 = arith.constant 0.000000e+00 : f32
    %106 = vector.broadcast %cst_22 : f32 to vector<16x128xf32>
    %107 = arith.select %105, %3, %106 : vector<16x128xi1>, vector<16x128xf32>
    %cst_23 = arith.constant dense<0.000000e+00> : vector<16xf32>
    %108 = vector.multi_reduction <add>, %107, %cst_23 [1] : vector<16x128xf32> to vector<16xf32>
    %109 = vector.shape_cast %108 : vector<16xf32> to vector<16x1xf32>
    %c8_i32 = arith.constant 8 : i32
    %110 = vector.broadcast %c8_i32 : i32 to vector<16x128xi32>
    %111 = arith.cmpi eq, %5, %110 : vector<16x128xi32>
    %112 = vector.shape_cast %109 : vector<16x1xf32> to vector<16x1xf32>
    %113 = vector.broadcast %112 : vector<16x1xf32> to vector<16x128xf32>
    %114 = arith.select %111, %113, %102 : vector<16x128xi1>, vector<16x128xf32>
    %115 = vector.extract_strided_slice %2 {offsets = [0, 9], sizes = [16, 1], strides = [1, 1]} : vector<16x128xi32> to vector<16x1xi32>
    %116 = vector.broadcast %115 : vector<16x1xi32> to vector<16x128xi32>
    %117 = arith.cmpi eq, %4, %116 : vector<16x128xi32>
    %cst_24 = arith.constant 0.000000e+00 : f32
    %118 = vector.broadcast %cst_24 : f32 to vector<16x128xf32>
    %119 = arith.select %117, %3, %118 : vector<16x128xi1>, vector<16x128xf32>
    %cst_25 = arith.constant dense<0.000000e+00> : vector<16xf32>
    %120 = vector.multi_reduction <add>, %119, %cst_25 [1] : vector<16x128xf32> to vector<16xf32>
    %121 = vector.shape_cast %120 : vector<16xf32> to vector<16x1xf32>
    %c9_i32 = arith.constant 9 : i32
    %122 = vector.broadcast %c9_i32 : i32 to vector<16x128xi32>
    %123 = arith.cmpi eq, %5, %122 : vector<16x128xi32>
    %124 = vector.shape_cast %121 : vector<16x1xf32> to vector<16x1xf32>
    %125 = vector.broadcast %124 : vector<16x1xf32> to vector<16x128xf32>
    %126 = arith.select %123, %125, %114 : vector<16x128xi1>, vector<16x128xf32>
    %127 = vector.extract_strided_slice %2 {offsets = [0, 10], sizes = [16, 1], strides = [1, 1]} : vector<16x128xi32> to vector<16x1xi32>
    %128 = vector.broadcast %127 : vector<16x1xi32> to vector<16x128xi32>
    %129 = arith.cmpi eq, %4, %128 : vector<16x128xi32>
    %cst_26 = arith.constant 0.000000e+00 : f32
    %130 = vector.broadcast %cst_26 : f32 to vector<16x128xf32>
    %131 = arith.select %129, %3, %130 : vector<16x128xi1>, vector<16x128xf32>
    %cst_27 = arith.constant dense<0.000000e+00> : vector<16xf32>
    %132 = vector.multi_reduction <add>, %131, %cst_27 [1] : vector<16x128xf32> to vector<16xf32>
    %133 = vector.shape_cast %132 : vector<16xf32> to vector<16x1xf32>
    %c10_i32 = arith.constant 10 : i32
    %134 = vector.broadcast %c10_i32 : i32 to vector<16x128xi32>
    %135 = arith.cmpi eq, %5, %134 : vector<16x128xi32>
    %136 = vector.shape_cast %133 : vector<16x1xf32> to vector<16x1xf32>
    %137 = vector.broadcast %136 : vector<16x1xf32> to vector<16x128xf32>
    %138 = arith.select %135, %137, %126 : vector<16x128xi1>, vector<16x128xf32>
    %139 = vector.extract_strided_slice %2 {offsets = [0, 11], sizes = [16, 1], strides = [1, 1]} : vector<16x128xi32> to vector<16x1xi32>
    %140 = vector.broadcast %139 : vector<16x1xi32> to vector<16x128xi32>
    %141 = arith.cmpi eq, %4, %140 : vector<16x128xi32>
    %cst_28 = arith.constant 0.000000e+00 : f32
    %142 = vector.broadcast %cst_28 : f32 to vector<16x128xf32>
    %143 = arith.select %141, %3, %142 : vector<16x128xi1>, vector<16x128xf32>
    %cst_29 = arith.constant dense<0.000000e+00> : vector<16xf32>
    %144 = vector.multi_reduction <add>, %143, %cst_29 [1] : vector<16x128xf32> to vector<16xf32>
    %145 = vector.shape_cast %144 : vector<16xf32> to vector<16x1xf32>
    %c11_i32 = arith.constant 11 : i32
    %146 = vector.broadcast %c11_i32 : i32 to vector<16x128xi32>
    %147 = arith.cmpi eq, %5, %146 : vector<16x128xi32>
    %148 = vector.shape_cast %145 : vector<16x1xf32> to vector<16x1xf32>
    %149 = vector.broadcast %148 : vector<16x1xf32> to vector<16x128xf32>
    %150 = arith.select %147, %149, %138 : vector<16x128xi1>, vector<16x128xf32>
    %151 = vector.extract_strided_slice %2 {offsets = [0, 12], sizes = [16, 1], strides = [1, 1]} : vector<16x128xi32> to vector<16x1xi32>
    %152 = vector.broadcast %151 : vector<16x1xi32> to vector<16x128xi32>
    %153 = arith.cmpi eq, %4, %152 : vector<16x128xi32>
    %cst_30 = arith.constant 0.000000e+00 : f32
    %154 = vector.broadcast %cst_30 : f32 to vector<16x128xf32>
    %155 = arith.select %153, %3, %154 : vector<16x128xi1>, vector<16x128xf32>
    %cst_31 = arith.constant dense<0.000000e+00> : vector<16xf32>
    %156 = vector.multi_reduction <add>, %155, %cst_31 [1] : vector<16x128xf32> to vector<16xf32>
    %157 = vector.shape_cast %156 : vector<16xf32> to vector<16x1xf32>
    %c12_i32 = arith.constant 12 : i32
    %158 = vector.broadcast %c12_i32 : i32 to vector<16x128xi32>
    %159 = arith.cmpi eq, %5, %158 : vector<16x128xi32>
    %160 = vector.shape_cast %157 : vector<16x1xf32> to vector<16x1xf32>
    %161 = vector.broadcast %160 : vector<16x1xf32> to vector<16x128xf32>
    %162 = arith.select %159, %161, %150 : vector<16x128xi1>, vector<16x128xf32>
    %163 = vector.extract_strided_slice %2 {offsets = [0, 13], sizes = [16, 1], strides = [1, 1]} : vector<16x128xi32> to vector<16x1xi32>
    %164 = vector.broadcast %163 : vector<16x1xi32> to vector<16x128xi32>
    %165 = arith.cmpi eq, %4, %164 : vector<16x128xi32>
    %cst_32 = arith.constant 0.000000e+00 : f32
    %166 = vector.broadcast %cst_32 : f32 to vector<16x128xf32>
    %167 = arith.select %165, %3, %166 : vector<16x128xi1>, vector<16x128xf32>
    %cst_33 = arith.constant dense<0.000000e+00> : vector<16xf32>
    %168 = vector.multi_reduction <add>, %167, %cst_33 [1] : vector<16x128xf32> to vector<16xf32>
    %169 = vector.shape_cast %168 : vector<16xf32> to vector<16x1xf32>
    %c13_i32 = arith.constant 13 : i32
    %170 = vector.broadcast %c13_i32 : i32 to vector<16x128xi32>
    %171 = arith.cmpi eq, %5, %170 : vector<16x128xi32>
    %172 = vector.shape_cast %169 : vector<16x1xf32> to vector<16x1xf32>
    %173 = vector.broadcast %172 : vector<16x1xf32> to vector<16x128xf32>
    %174 = arith.select %171, %173, %162 : vector<16x128xi1>, vector<16x128xf32>
    %175 = vector.extract_strided_slice %2 {offsets = [0, 14], sizes = [16, 1], strides = [1, 1]} : vector<16x128xi32> to vector<16x1xi32>
    %176 = vector.broadcast %175 : vector<16x1xi32> to vector<16x128xi32>
    %177 = arith.cmpi eq, %4, %176 : vector<16x128xi32>
    %cst_34 = arith.constant 0.000000e+00 : f32
    %178 = vector.broadcast %cst_34 : f32 to vector<16x128xf32>
    %179 = arith.select %177, %3, %178 : vector<16x128xi1>, vector<16x128xf32>
    %cst_35 = arith.constant dense<0.000000e+00> : vector<16xf32>
    %180 = vector.multi_reduction <add>, %179, %cst_35 [1] : vector<16x128xf32> to vector<16xf32>
    %181 = vector.shape_cast %180 : vector<16xf32> to vector<16x1xf32>
    %c14_i32 = arith.constant 14 : i32
    %182 = vector.broadcast %c14_i32 : i32 to vector<16x128xi32>
    %183 = arith.cmpi eq, %5, %182 : vector<16x128xi32>
    %184 = vector.shape_cast %181 : vector<16x1xf32> to vector<16x1xf32>
    %185 = vector.broadcast %184 : vector<16x1xf32> to vector<16x128xf32>
    %186 = arith.select %183, %185, %174 : vector<16x128xi1>, vector<16x128xf32>
    %187 = vector.extract_strided_slice %2 {offsets = [0, 15], sizes = [16, 1], strides = [1, 1]} : vector<16x128xi32> to vector<16x1xi32>
    %188 = vector.broadcast %187 : vector<16x1xi32> to vector<16x128xi32>
    %189 = arith.cmpi eq, %4, %188 : vector<16x128xi32>
    %cst_36 = arith.constant 0.000000e+00 : f32
    %190 = vector.broadcast %cst_36 : f32 to vector<16x128xf32>
    %191 = arith.select %189, %3, %190 : vector<16x128xi1>, vector<16x128xf32>
    %cst_37 = arith.constant dense<0.000000e+00> : vector<16xf32>
    %192 = vector.multi_reduction <add>, %191, %cst_37 [1] : vector<16x128xf32> to vector<16xf32>
    %193 = vector.shape_cast %192 : vector<16xf32> to vector<16x1xf32>
    %c15_i32 = arith.constant 15 : i32
    %194 = vector.broadcast %c15_i32 : i32 to vector<16x128xi32>
    %195 = arith.cmpi eq, %5, %194 : vector<16x128xi32>
    %196 = vector.shape_cast %193 : vector<16x1xf32> to vector<16x1xf32>
    %197 = vector.broadcast %196 : vector<16x1xf32> to vector<16x128xf32>
    %198 = arith.select %195, %197, %186 : vector<16x128xi1>, vector<16x128xf32>
    %199 = vector.extract_strided_slice %2 {offsets = [0, 16], sizes = [16, 1], strides = [1, 1]} : vector<16x128xi32> to vector<16x1xi32>
    %200 = vector.broadcast %199 : vector<16x1xi32> to vector<16x128xi32>
    %201 = arith.cmpi eq, %4, %200 : vector<16x128xi32>
    %cst_38 = arith.constant 0.000000e+00 : f32
    %202 = vector.broadcast %cst_38 : f32 to vector<16x128xf32>
    %203 = arith.select %201, %3, %202 : vector<16x128xi1>, vector<16x128xf32>
    %cst_39 = arith.constant dense<0.000000e+00> : vector<16xf32>
    %204 = vector.multi_reduction <add>, %203, %cst_39 [1] : vector<16x128xf32> to vector<16xf32>
    %205 = vector.shape_cast %204 : vector<16xf32> to vector<16x1xf32>
    %c16_i32 = arith.constant 16 : i32
    %206 = vector.broadcast %c16_i32 : i32 to vector<16x128xi32>
    %207 = arith.cmpi eq, %5, %206 : vector<16x128xi32>
    %208 = vector.shape_cast %205 : vector<16x1xf32> to vector<16x1xf32>
    %209 = vector.broadcast %208 : vector<16x1xf32> to vector<16x128xf32>
    %210 = arith.select %207, %209, %198 : vector<16x128xi1>, vector<16x128xf32>
    %211 = vector.extract_strided_slice %2 {offsets = [0, 17], sizes = [16, 1], strides = [1, 1]} : vector<16x128xi32> to vector<16x1xi32>
    %212 = vector.broadcast %211 : vector<16x1xi32> to vector<16x128xi32>
    %213 = arith.cmpi eq, %4, %212 : vector<16x128xi32>
    %cst_40 = arith.constant 0.000000e+00 : f32
    %214 = vector.broadcast %cst_40 : f32 to vector<16x128xf32>
    %215 = arith.select %213, %3, %214 : vector<16x128xi1>, vector<16x128xf32>
    %cst_41 = arith.constant dense<0.000000e+00> : vector<16xf32>
    %216 = vector.multi_reduction <add>, %215, %cst_41 [1] : vector<16x128xf32> to vector<16xf32>
    %217 = vector.shape_cast %216 : vector<16xf32> to vector<16x1xf32>
    %c17_i32 = arith.constant 17 : i32
    %218 = vector.broadcast %c17_i32 : i32 to vector<16x128xi32>
    %219 = arith.cmpi eq, %5, %218 : vector<16x128xi32>
    %220 = vector.shape_cast %217 : vector<16x1xf32> to vector<16x1xf32>
    %221 = vector.broadcast %220 : vector<16x1xf32> to vector<16x128xf32>
    %222 = arith.select %219, %221, %210 : vector<16x128xi1>, vector<16x128xf32>
    %223 = vector.extract_strided_slice %2 {offsets = [0, 18], sizes = [16, 1], strides = [1, 1]} : vector<16x128xi32> to vector<16x1xi32>
    %224 = vector.broadcast %223 : vector<16x1xi32> to vector<16x128xi32>
    %225 = arith.cmpi eq, %4, %224 : vector<16x128xi32>
    %cst_42 = arith.constant 0.000000e+00 : f32
    %226 = vector.broadcast %cst_42 : f32 to vector<16x128xf32>
    %227 = arith.select %225, %3, %226 : vector<16x128xi1>, vector<16x128xf32>
    %cst_43 = arith.constant dense<0.000000e+00> : vector<16xf32>
    %228 = vector.multi_reduction <add>, %227, %cst_43 [1] : vector<16x128xf32> to vector<16xf32>
    %229 = vector.shape_cast %228 : vector<16xf32> to vector<16x1xf32>
    %c18_i32 = arith.constant 18 : i32
    %230 = vector.broadcast %c18_i32 : i32 to vector<16x128xi32>
    %231 = arith.cmpi eq, %5, %230 : vector<16x128xi32>
    %232 = vector.shape_cast %229 : vector<16x1xf32> to vector<16x1xf32>
    %233 = vector.broadcast %232 : vector<16x1xf32> to vector<16x128xf32>
    %234 = arith.select %231, %233, %222 : vector<16x128xi1>, vector<16x128xf32>
    %235 = vector.extract_strided_slice %2 {offsets = [0, 19], sizes = [16, 1], strides = [1, 1]} : vector<16x128xi32> to vector<16x1xi32>
    %236 = vector.broadcast %235 : vector<16x1xi32> to vector<16x128xi32>
    %237 = arith.cmpi eq, %4, %236 : vector<16x128xi32>
    %cst_44 = arith.constant 0.000000e+00 : f32
    %238 = vector.broadcast %cst_44 : f32 to vector<16x128xf32>
    %239 = arith.select %237, %3, %238 : vector<16x128xi1>, vector<16x128xf32>
    %cst_45 = arith.constant dense<0.000000e+00> : vector<16xf32>
    %240 = vector.multi_reduction <add>, %239, %cst_45 [1] : vector<16x128xf32> to vector<16xf32>
    %241 = vector.shape_cast %240 : vector<16xf32> to vector<16x1xf32>
    %c19_i32 = arith.constant 19 : i32
    %242 = vector.broadcast %c19_i32 : i32 to vector<16x128xi32>
    %243 = arith.cmpi eq, %5, %242 : vector<16x128xi32>
    %244 = vector.shape_cast %241 : vector<16x1xf32> to vector<16x1xf32>
    %245 = vector.broadcast %244 : vector<16x1xf32> to vector<16x128xf32>
    %246 = arith.select %243, %245, %234 : vector<16x128xi1>, vector<16x128xf32>
    %247 = vector.extract_strided_slice %2 {offsets = [0, 20], sizes = [16, 1], strides = [1, 1]} : vector<16x128xi32> to vector<16x1xi32>
    %248 = vector.broadcast %247 : vector<16x1xi32> to vector<16x128xi32>
    %249 = arith.cmpi eq, %4, %248 : vector<16x128xi32>
    %cst_46 = arith.constant 0.000000e+00 : f32
    %250 = vector.broadcast %cst_46 : f32 to vector<16x128xf32>
    %251 = arith.select %249, %3, %250 : vector<16x128xi1>, vector<16x128xf32>
    %cst_47 = arith.constant dense<0.000000e+00> : vector<16xf32>
    %252 = vector.multi_reduction <add>, %251, %cst_47 [1] : vector<16x128xf32> to vector<16xf32>
    %253 = vector.shape_cast %252 : vector<16xf32> to vector<16x1xf32>
    %c20_i32 = arith.constant 20 : i32
    %254 = vector.broadcast %c20_i32 : i32 to vector<16x128xi32>
    %255 = arith.cmpi eq, %5, %254 : vector<16x128xi32>
    %256 = vector.shape_cast %253 : vector<16x1xf32> to vector<16x1xf32>
    %257 = vector.broadcast %256 : vector<16x1xf32> to vector<16x128xf32>
    %258 = arith.select %255, %257, %246 : vector<16x128xi1>, vector<16x128xf32>
    %259 = vector.extract_strided_slice %2 {offsets = [0, 21], sizes = [16, 1], strides = [1, 1]} : vector<16x128xi32> to vector<16x1xi32>
    %260 = vector.broadcast %259 : vector<16x1xi32> to vector<16x128xi32>
    %261 = arith.cmpi eq, %4, %260 : vector<16x128xi32>
    %cst_48 = arith.constant 0.000000e+00 : f32
    %262 = vector.broadcast %cst_48 : f32 to vector<16x128xf32>
    %263 = arith.select %261, %3, %262 : vector<16x128xi1>, vector<16x128xf32>
    %cst_49 = arith.constant dense<0.000000e+00> : vector<16xf32>
    %264 = vector.multi_reduction <add>, %263, %cst_49 [1] : vector<16x128xf32> to vector<16xf32>
    %265 = vector.shape_cast %264 : vector<16xf32> to vector<16x1xf32>
    %c21_i32 = arith.constant 21 : i32
    %266 = vector.broadcast %c21_i32 : i32 to vector<16x128xi32>
    %267 = arith.cmpi eq, %5, %266 : vector<16x128xi32>
    %268 = vector.shape_cast %265 : vector<16x1xf32> to vector<16x1xf32>
    %269 = vector.broadcast %268 : vector<16x1xf32> to vector<16x128xf32>
    %270 = arith.select %267, %269, %258 : vector<16x128xi1>, vector<16x128xf32>
    %271 = vector.extract_strided_slice %2 {offsets = [0, 22], sizes = [16, 1], strides = [1, 1]} : vector<16x128xi32> to vector<16x1xi32>
    %272 = vector.broadcast %271 : vector<16x1xi32> to vector<16x128xi32>
    %273 = arith.cmpi eq, %4, %272 : vector<16x128xi32>
    %cst_50 = arith.constant 0.000000e+00 : f32
    %274 = vector.broadcast %cst_50 : f32 to vector<16x128xf32>
    %275 = arith.select %273, %3, %274 : vector<16x128xi1>, vector<16x128xf32>
    %cst_51 = arith.constant dense<0.000000e+00> : vector<16xf32>
    %276 = vector.multi_reduction <add>, %275, %cst_51 [1] : vector<16x128xf32> to vector<16xf32>
    %277 = vector.shape_cast %276 : vector<16xf32> to vector<16x1xf32>
    %c22_i32 = arith.constant 22 : i32
    %278 = vector.broadcast %c22_i32 : i32 to vector<16x128xi32>
    %279 = arith.cmpi eq, %5, %278 : vector<16x128xi32>
    %280 = vector.shape_cast %277 : vector<16x1xf32> to vector<16x1xf32>
    %281 = vector.broadcast %280 : vector<16x1xf32> to vector<16x128xf32>
    %282 = arith.select %279, %281, %270 : vector<16x128xi1>, vector<16x128xf32>
    %283 = vector.extract_strided_slice %2 {offsets = [0, 23], sizes = [16, 1], strides = [1, 1]} : vector<16x128xi32> to vector<16x1xi32>
    %284 = vector.broadcast %283 : vector<16x1xi32> to vector<16x128xi32>
    %285 = arith.cmpi eq, %4, %284 : vector<16x128xi32>
    %cst_52 = arith.constant 0.000000e+00 : f32
    %286 = vector.broadcast %cst_52 : f32 to vector<16x128xf32>
    %287 = arith.select %285, %3, %286 : vector<16x128xi1>, vector<16x128xf32>
    %cst_53 = arith.constant dense<0.000000e+00> : vector<16xf32>
    %288 = vector.multi_reduction <add>, %287, %cst_53 [1] : vector<16x128xf32> to vector<16xf32>
    %289 = vector.shape_cast %288 : vector<16xf32> to vector<16x1xf32>
    %c23_i32 = arith.constant 23 : i32
    %290 = vector.broadcast %c23_i32 : i32 to vector<16x128xi32>
    %291 = arith.cmpi eq, %5, %290 : vector<16x128xi32>
    %292 = vector.shape_cast %289 : vector<16x1xf32> to vector<16x1xf32>
    %293 = vector.broadcast %292 : vector<16x1xf32> to vector<16x128xf32>
    %294 = arith.select %291, %293, %282 : vector<16x128xi1>, vector<16x128xf32>
    %295 = vector.extract_strided_slice %2 {offsets = [0, 24], sizes = [16, 1], strides = [1, 1]} : vector<16x128xi32> to vector<16x1xi32>
    %296 = vector.broadcast %295 : vector<16x1xi32> to vector<16x128xi32>
    %297 = arith.cmpi eq, %4, %296 : vector<16x128xi32>
    %cst_54 = arith.constant 0.000000e+00 : f32
    %298 = vector.broadcast %cst_54 : f32 to vector<16x128xf32>
    %299 = arith.select %297, %3, %298 : vector<16x128xi1>, vector<16x128xf32>
    %cst_55 = arith.constant dense<0.000000e+00> : vector<16xf32>
    %300 = vector.multi_reduction <add>, %299, %cst_55 [1] : vector<16x128xf32> to vector<16xf32>
    %301 = vector.shape_cast %300 : vector<16xf32> to vector<16x1xf32>
    %c24_i32 = arith.constant 24 : i32
    %302 = vector.broadcast %c24_i32 : i32 to vector<16x128xi32>
    %303 = arith.cmpi eq, %5, %302 : vector<16x128xi32>
    %304 = vector.shape_cast %301 : vector<16x1xf32> to vector<16x1xf32>
    %305 = vector.broadcast %304 : vector<16x1xf32> to vector<16x128xf32>
    %306 = arith.select %303, %305, %294 : vector<16x128xi1>, vector<16x128xf32>
    %307 = vector.extract_strided_slice %2 {offsets = [0, 25], sizes = [16, 1], strides = [1, 1]} : vector<16x128xi32> to vector<16x1xi32>
    %308 = vector.broadcast %307 : vector<16x1xi32> to vector<16x128xi32>
    %309 = arith.cmpi eq, %4, %308 : vector<16x128xi32>
    %cst_56 = arith.constant 0.000000e+00 : f32
    %310 = vector.broadcast %cst_56 : f32 to vector<16x128xf32>
    %311 = arith.select %309, %3, %310 : vector<16x128xi1>, vector<16x128xf32>
    %cst_57 = arith.constant dense<0.000000e+00> : vector<16xf32>
    %312 = vector.multi_reduction <add>, %311, %cst_57 [1] : vector<16x128xf32> to vector<16xf32>
    %313 = vector.shape_cast %312 : vector<16xf32> to vector<16x1xf32>
    %c25_i32 = arith.constant 25 : i32
    %314 = vector.broadcast %c25_i32 : i32 to vector<16x128xi32>
    %315 = arith.cmpi eq, %5, %314 : vector<16x128xi32>
    %316 = vector.shape_cast %313 : vector<16x1xf32> to vector<16x1xf32>
    %317 = vector.broadcast %316 : vector<16x1xf32> to vector<16x128xf32>
    %318 = arith.select %315, %317, %306 : vector<16x128xi1>, vector<16x128xf32>
    %319 = arith.negf %318 : vector<16x128xf32>
    %320 = math.exp %319 : vector<16x128xf32>
    %cst_58 = arith.constant 1.000000e+00 : f32
    %321 = vector.broadcast %cst_58 : f32 to vector<16x128xf32>
    %322 = arith.addf %321, %320 : vector<16x128xf32>
    %323 = arith.divf %321, %322 : vector<16x128xf32>
    %c0_59 = arith.constant 0 : index
    %c0_60 = arith.constant 0 : index
    %324 = vector.load %arg4[%c0_59, %c0_60] : memref<16x128xf32, #tpu.memory_space<vmem>>, vector<16x128xf32>
    tpu.vector_store %arg4[%c0_59, %c0_60], %323 {strides = array<i32>} : memref<16x128xf32, #tpu.memory_space<vmem>>, vector<16x128xf32>,
    return
  }
  func.func @transform_0(%arg0: i32) -> (i32, i32) {
    %c0_i32 = arith.constant 0 : i32
    %c0_i32_0 = arith.constant 0 : i32
    return %arg0, %c0_i32 : i32, i32
  }
  func.func @transform_1(%arg0: i32) -> (i32, i32) {
    %c0_i32 = arith.constant 0 : i32
    %c0_i32_0 = arith.constant 0 : i32
    return %arg0, %c0_i32 : i32, i32
  }
  func.func @transform_2(%arg0: i32) -> (i32, i32) {
    %c0_i32 = arith.constant 0 : i32
    %c0_i32_0 = arith.constant 0 : i32
    %c0_i32_1 = arith.constant 0 : i32
    return %c0_i32, %c0_i32_0 : i32, i32
  }
  func.func @transform_3(%arg0: i32) -> (i32, i32) {
    %c0_i32 = arith.constant 0 : i32
    %c0_i32_0 = arith.constant 0 : i32
    return %arg0, %c0_i32 : i32, i32
  }
}

</mosaic_0001>

<bundles_post_ra>
// kernel: tpu_custom_call.1
= control target key start
LH: loop header
LB: loop body
LE: loop exit
PB: predicated region body
PF: predicated region fallthrough
CT: control target
= control target key end

     0   :  { %s1856_s0 = inlined_call_operand.hbm [shape: bf16[32,128], index: 0, kind: input, shape index: {}]   ;;  %s1857_s1 = inlined_call_operand.hbm [shape: s32[32,128], index: 1, kind: input, shape index: {}]   ;;  %s1858_s2 = inlined_call_operand.hbm [shape: bf16[128,128], index: 2, kind: input, shape index: {}]   ;;  %s1859_s3 = inlined_call_operand.hbm [shape: f32[32,128], index: 3, kind: output, shape index: {}]  }
   0x1   :  { %1863 = sst [smem:[#allocation13_spill]] %s1856_s0 }
   0x2   :  { %8 = vsyncpa [#allocation3], 0 }
   0x3   :  { %10 = vsyncpa [#allocation3 + $0x1], 0 }
   0x4   :  { %11 = vsyncpa [#allocation6], 0 }
   0x5   :  { %13 = vsyncpa [#allocation6 + $0x1], 0 }
   0x6   :  { %14 = vsyncpa [#allocation4], 0 }
   0x7   :  { %16 = vsyncpa [#allocation4 + $0x1], 0  ;;  %s1383_s12 = smov 0   ;;  %s1385_s13 = smov 0  }
   0x8   :  { %s1387_s14 = smov 0   ;;  %s1389_s15 = smov 0  }
   0x9 LB: > { %s1404_s16 = sadd.s32 4294967295, %s1323_s15   ;;  %s939_s17 = sadd.s32 4294967294, %s1323_s15   ;;  %s1323_s15 = sphi %s1389_s15, %s1881_s15   ;;  %s1319_s14 = sphi %s1387_s14, %s1880_s14   ;;  %s1315_s13 = sphi %s1385_s13, %s1879_s13   ;;  %s1311_s12 = sphi %s1383_s12, %s1878_s12  }
   0xa   : > { %p42_p0 = scmp.ne.s32.totalorder %s1315_s13, %s1311_s12  ;;  %p1860_p1 = scmp.eq.s32.totalorder %s1404_s16, 0 }
   0xb   : > { %p119_p3 = scmp.eq.s32.totalorder %s939_s17, 1  ;;  %p940_p5 = scmp.ge.s32.totalorder %s1323_s15, 1 }
   0xc   : > { %p1413_p4 = por %p1860_p1, %p42_p0  ;;  %p126_p7 = scmp.lt.s32.totalorder %s1323_s15, 3 }
   0xd   : > { %p1418_p6 = por %p119_p3, %p42_p0  ;;  %s1325_s21 = smov [#allocation7]  }
   0xe   : > { %s1864_s18 = scalar_select %p1413_p4, 1, 0 }
   0xf   : > { %s1865_s19 = scalar_select %p1418_p6, 1, 0 }
  0x10   : > { %p1423_p8 = pnand %p940_p5, %p126_p7  ;;  %s138_s22 = sshll.u32 %s1325_s21, 4  ;;  %s1427_s22 = int_to_ptr.vmem [resolvable:$true] %s138_s22 }
  0x11   : > { %s1439_s24 = sadd.s32 1, %s1323_s15   ;;  %s29_s25 = sadd.s32 1, %s1319_s14 }
  0x12   : > { %s1866_s20 = scalar_select %p1423_p8, 1, 0 }
  0x13   : > { %p1012_p9 = pneg %p1423_p8  ;;  %s26_s26 = ssub.s32 %s1323_s15, %s1439_s24 }
  0x14   : > { %s1161_s29 = scalar_lea.hbm %s1858_s2, 1024 }
  0x15   : > { %p1434_p11 = pnand %p1012_p9, %p1860_p1  ;;  %p1162_p12 = scmp.ne.s32.totalorder %s1858_s2, %s1161_s29 }
  0x16   : > { %p1168_p5 = scmp.lt.u32.totalorder %s1161_s29, %s1858_s2 }
  0x17   : > { %p1163_p13 = pneg %p1434_p11 }
  0x19   : > { %p1164_p0 = pnand %p1163_p13, %p1162_p12 }
  0x1b   : > { %p1165_p3 = pneg %p1164_p0 }
  0x1d   : > { %p1170_p7 = pnand %p1168_p5, %p1165_p3 }
  0x1f   : > { %1173 = shalt.err (!%p1170_p7)
}
  0x20   : > { %s1174_s7 = scalar_lea.vmem %s1427_s22, 1024  ;;  %p1182_p2 = scmp.lt.s32.totalorder %s1427_s22, %s1427_s22 }
  0x21   : > { %p1175_p9 = scmp.ne.s32.totalorder %s1427_s22, %s1174_s7  ;;  %p1183_p6 = scmp.lt.s32.totalorder %s1174_s7, %s1174_s7 }
  0x23   : > { %p1177_p10 = pnand %p1175_p9, %p1163_p13  ;;  %p1184_p4 = por %p1183_p6, %p1182_p2 }
  0x25   : > { %p1178_p1 = pneg %p1177_p10 }
  0x27   : > { %p1185_p8 = pnand %p1184_p4, %p1178_p1 }
  0x29   : > { %1188 = shalt.err (!%p1185_p8)
}
  0x2a   : > { %s1326_s8 = smov 64   ;;  %s1327_s9 = smov 4  }
  0x2b   : > { %1015 = dma.hbm_to_vmem [thread:$0]  (!%p1434_p11), %s1858_s2, 1024, %s1427_s22, [#allocation6], %s1326_s8, %s1326_s8, %s1327_s9  }
  0x2c   : > { %p27_p1 = scmp.eq.s32.totalorder %s26_s26, 0  ;;  %p36_p2 = scmp.ne.s32.totalorder %s1319_s14, %s1315_s13 }
  0x2d   : > { %p37_p4 = scmp.eq.s32.totalorder %s1323_s15, 0  ;;  %p1028_p6 = scmp.lt.s32.totalorder %s1323_s15, 2 }
  0x2e   : > { %s1473_s17 = scalar_select %p27_p1, %s1319_s14, %s29_s25  }
  0x2f   : > { %p38_p8 = por %p37_p4, %p36_p2  ;;  %p1868_p10 = scmp.eq.s32.totalorder %s1404_s16, 1 }
  0x30   : > { %s1482_s23 = sand.u32 1, %s1319_s14   ;;  %s970_s27 = sshll.u32 %s1323_s15, 7 }
  0x31   : > { %p1477_p12 = por %p1868_p10, %p36_p2  ;;  %s943_s28 = sshll.u32 %s1482_s23, 3 }
  0x32   : > { %s1870_s0 = sld [smem:[#allocation13_spill]]  ;;  %s156_s25 = scalar_lea.vmem [#allocation2], %s943_s28 }
  0x33   : > { %s163_s30 = sshll.u32 %s156_s25, 4  ;;  %p1491_p11 = pnand %p1028_p6, %p38_p8  ;;  %s1495_s30 = int_to_ptr.vmem [resolvable:$true] %s163_s30 }
  0x34   : > { %s173_s5 = sand.u32 1, %s1323_s15   ;;  %s153_s6 = scalar_lea.sflag [#allocation3], %s1482_s23 }
  0x35   : > { %p1191_p0 = pneg %p1491_p11 }
  0x38   : > { %s1489_s26 = scalar_lea.hbm %s1870_s0, %s970_s27  ;;  %s1194_s27 = scalar_lea.hbm %s1870_s0, 256 }
  0x39   : > { %s1189_s7 = scalar_lea.hbm %s1489_s26, 128  ;;  %p1195_p7 = scmp.lt.u32.totalorder %s1489_s26, %s1870_s0 }
  0x3a   : > { %p1190_p13 = scmp.ne.s32.totalorder %s1489_s26, %s1189_s7  ;;  %p1196_p9 = scmp.lt.u32.totalorder %s1194_s27, %s1189_s7 }
  0x3b   : > { %p1198_p2 = scmp.lt.u32.totalorder %s1189_s7, %s1489_s26 }
  0x3c   : > { %p1192_p3 = pnand %p1191_p0, %p1190_p13  ;;  %p1197_p1 = por %p1196_p9, %p1195_p7 }
  0x3e   : > { %p1193_p5 = pneg %p1192_p3  ;;  %p1199_p4 = por %p1198_p2, %p1197_p1 }
  0x40   : > { %p1200_p6 = pnand %p1199_p4, %p1193_p5 }
  0x42   : > { %1203 = shalt.err (!%p1200_p6)
}
  0x43   : > { %s1204_s29 = scalar_lea.vmem %s1495_s30, 128  ;;  %s1328_s25 = smov [#allocation2]  }
  0x44   : > { %p1205_p8 = scmp.ne.s32.totalorder %s1495_s30, %s1204_s29  ;;  %s1209_s10 = sshll.u32 %s1328_s25, 4  ;;  %s1210_s10 = int_to_ptr.vmem [resolvable:$false] %s1209_s10 }
  0x45   : > { %s1211_s11 = scalar_lea.vmem %s1210_s10, 256  ;;  %p1212_p3 = scmp.lt.s32.totalorder %s1495_s30, %s1210_s10 }
  0x46   : > { %p1207_p10 = pnand %p1205_p8, %p1191_p0  ;;  %p1213_p7 = scmp.lt.s32.totalorder %s1211_s11, %s1204_s29 }
  0x48   : > { %p1208_p13 = pneg %p1207_p10  ;;  %p1214_p9 = por %p1213_p7, %p1212_p3 }
  0x4a   : > { %p1215_p1 = pnand %p1214_p9, %p1208_p13 }
  0x4c   : > { %1218 = shalt.err (!%p1215_p1)
}
  0x4d   : > { %1019 = dma.hbm_to_vmem [thread:$0]  (!%p1491_p11), %s1489_s26, 128, %s1495_s30, %s153_s6, %s1326_s8, %s1326_s8, %s1327_s9  }
  0x4e   : > { %s946_s7 = sshll.u32 %s1482_s23, 4  ;;  %s971_s27 = sshll.u32 %s1323_s15, 8 }
  0x4f   : > { %s1534_s29 = scalar_lea.hbm %s1857_s1, %s971_s27  ;;  %s177_s25 = scalar_lea.vmem [#allocation5], %s946_s7 }
  0x50   : > { %s184_s10 = sshll.u32 %s177_s25, 4  ;;  %s1540_s11 = scalar_lea.sflag [#allocation6], %s173_s5  ;;  %s1536_s10 = int_to_ptr.vmem [resolvable:$true] %s184_s10 }
  0x51   : > { %s1219_s0 = scalar_lea.hbm %s1534_s29, 256  ;;  %s1224_s23 = scalar_lea.hbm %s1857_s1, 512 }
  0x52   : > { %p1220_p5 = scmp.ne.s32.totalorder %s1534_s29, %s1219_s0  ;;  %p1225_p6 = scmp.lt.u32.totalorder %s1534_s29, %s1857_s1 }
  0x53   : > { %p1226_p8 = scmp.lt.u32.totalorder %s1224_s23, %s1219_s0  ;;  %p1228_p13 = scmp.lt.u32.totalorder %s1219_s0, %s1534_s29 }
  0x54   : > { %p1222_p2 = pnand %p1220_p5, %p1191_p0 }
  0x55   : > { %p1227_p10 = por %p1226_p8, %p1225_p6 }
  0x56   : > { %p1223_p4 = pneg %p1222_p2 }
  0x57   : > { %p1229_p3 = por %p1228_p13, %p1227_p10 }
  0x59   : > { %p1230_p7 = pnand %p1229_p3, %p1223_p4 }
  0x5b   : > { %1233 = shalt.err (!%p1230_p7)
}
  0x5c   : > { %s1234_s5 = scalar_lea.vmem %s1536_s10, 256  ;;  %s1329_s6 = smov [#allocation5]  }
  0x5d   : > { %p1235_p9 = scmp.ne.s32.totalorder %s1536_s10, %s1234_s5  ;;  %s1239_s7 = sshll.u32 %s1329_s6, 4  ;;  %s1240_s7 = int_to_ptr.vmem [resolvable:$false] %s1239_s7 }
  0x5e   : > { %s1241_s27 = scalar_lea.vmem %s1240_s7, 512  ;;  %p1242_p2 = scmp.lt.s32.totalorder %s1536_s10, %s1240_s7 }
  0x5f   : > { %p1237_p1 = pnand %p1235_p9, %p1191_p0  ;;  %p1243_p6 = scmp.lt.s32.totalorder %s1241_s27, %s1234_s5 }
  0x61   : > { %p1238_p5 = pneg %p1237_p1  ;;  %p1244_p8 = por %p1243_p6, %p1242_p2 }
  0x63   : > { %p1245_p10 = pnand %p1244_p8, %p1238_p5 }
  0x65   : > { %1248 = shalt.err (!%p1245_p10)
}
  0x66   : > { %s1330_s0 = smov 128   ;;  %s1331_s28 = smov 8  }
  0x67   : > { %1022 = dma.hbm_to_vmem [thread:$0]  (!%p1491_p11), %s1534_s29, 256, %s1536_s10, %s1540_s11, %s1330_s0, %s1330_s0, %s1331_s28  }
  0x68   : > { %p1872_p0 = scmp.ne.s32.totalorder %s1866_s20, 0 }
  0x69   : > { %s1569_s22 = sand.u32 (!%p1872_p0), 1, %s1315_s13   ;;  %p1873_p4 = scmp.ne.s32.totalorder (!%p1872_p0), %s1864_s18, 0 }
  0x6a   : > { %196 = sbr.rel (%p1872_p0) target bundleno = 3042 (0xbe2), region = 32  ;;  %s950_s25 = sshll.u32 (!%p1872_p0), %s1569_s22, 3 }
  0x6b   : > { %s199_s8 = scalar_lea.sflag (!%p1872_p0), [#allocation3], %s1569_s22  ;;  %s1573_s9 = scalar_lea.vmem (!%p1872_p0), [#allocation2], %s950_s25 }
  0x71   : > { %1294 = dma.done.wait (%p1873_p4), %s199_s8, 128  }
  0x72   : > { %1296 = vsyncadd (%p1873_p4), %s199_s8, 4294967168  ;;  %s207_s20 = sand.u32 1, %s1404_s16   ;;  %s951_s4 = sshll.u32 %s1569_s22, 4 }
  0x73   : > { %s208_s29 = scalar_lea.sflag [#allocation6], %s207_s20  ;;  %s211_s10 = scalar_lea.vmem [#allocation5], %s951_s4 }
  0x74   : > { %1298 = dma.done.wait (%p1873_p4), %s208_s29, 256  }
  0x75   : > { %1300 = vsyncadd (%p1873_p4), %s208_s29, 4294967040  ;;  %p1874_p11 = scmp.eq.s32.totalorder %s1404_s16, 0 }
  0x77   : > { %1302 = dma.done.wait (%p1874_p11), [#allocation6], 1024   ;;  %p1875_p13 = pmov %p1874_p11 }
  0x78   : > { %v1332_v0 = vmov 0.0   ;;  %vm1333_vm0 = vmmov 0   ;;  %v1334_v1 = vmov 0   ;;  %v1335_v2 = vmov 1   ;;  %v1144_v3 = vld [vmem:[#allocation7] sm:$0xff]   ;;  %v1145_v4 = vld [vmem:[#allocation7 + $0x8] sm:$0xff]  }
  0x79   : > { %1304 = vsyncadd (%p1875_p13), [#allocation6], 4294966272  ;;  %982 = vmatprep.subr.bf16.mxu0 %v1332_v0  ;;  %998 = vmatprep.mubr.msk.bf16.mxu0 %vm1333_vm0, %v1332_v0  ;;  %v1146_v5 = vld [vmem:[#allocation7 + $0x10] sm:$0xff]   ;;  %v1593_v7 = vld [vmem:[%s211_s10 + $0x8] sm:$0xff]  ;;  %v1336_v10 = vmov 2   ;;  %v1337_v12 = vmov 3   ;;  %v362_v23 = vlaneseq }
  0x7a   : > { %1098 = vset.pattern.permute.xlu0 %v1334_v1  ;;  %1100 = vset.pattern.permute.xlu1 %v1335_v2  ;;  %v1591_v6 = vld [vmem:[%s211_s10] sm:$0xff]  ;;  %v1147_v8 = vld [vmem:[#allocation7 + $0x18] sm:$0xff]   ;;  %v1149_v11 = vld [vmem:[#allocation7 + $0x28] sm:$0xff]   ;;  %v1338_v14 = vmov 4   ;;  %v1339_v17 = vmov 5   ;;  %v1340_v18 = vmov 6  }
  0x7b   : > { %983 = vmatpush3.bf16.msra.mxu0 %v1144_v3  ;;  %365 = vperm.xlu0 %1098, %v1591_v6   ;;  %v1148_v9 = vld [vmem:[#allocation7 + $0x20] sm:$0xff]   ;;  %v1150_v13 = vld [vmem:[#allocation7 + $0x30] sm:$0xff]   ;;  %v1151_v15 = vld [vmem:[#allocation7 + $0x38] sm:$0xff]   ;;  %v1608_v26 = vand.u32 127, %v362_v23  ;;  %v1341_v49 = vmov 7   ;;  %v1343_v23 = vmov 9  }
  0x7c   : > { %984 = vmatprep.subr.bf16.mxu0 %v1332_v0  ;;  %385 = vperm.xlu1 %1100, %v1593_v7   ;;  %v1152_v16 = vld [vmem:[%s1573_s9] sm:$0xff]   ;;  %s972_s18 = sshll.u32 %s1404_s16, 8  ;;  %s242_s11 = scalar_lea.vmem [#allocation8], %s951_s4 }
  0x7d   : > { %vm378_vm13 = vcmp.eq.s32.totalorder %v1608_v26, 0  ;;  %vm395_vm14 = vcmp.eq.s32.totalorder %v1608_v26, 1  ;;  %vm412_vm15 = vcmp.eq.s32.totalorder %v1608_v26, 2  ;;  %vm429_vm0 = vcmp.eq.s32.totalorder %v1608_v26, 3  ;;  %s834_s23 = sshll.u32 %s242_s11, 4  ;;  %s1810_s5 = scalar_lea.hbm %s1859_s3, %s972_s18  ;;  %s1812_s23 = int_to_ptr.vmem [resolvable:$true] %s834_s23 }
  0x7e   : > { %s821_s6 = scalar_lea.sflag [#allocation4], %s1569_s22  ;;  %s1249_s7 = scalar_lea.vmem %s1812_s23, 256 }
  0x7f   : > { %985 = vmatpush3.bf16.msra.mxu0 %v1145_v4  ;;  %368 = vperm.xlu0 %1098, %v1593_v7   ;;  %p1250_p3 = scmp.ne.s32.totalorder %s1812_s23, %s1249_s7  ;;  %s1360_s16 = smov [#allocation8]  }
  0x80   : > { %986 = vmatprep.subr.bf16.mxu0 %v1332_v0  ;;  %1102 = vset.pattern.permute.xlu1 %v1336_v10  ;;  %s1253_s27 = sshll.u32 %s1360_s16, 4  ;;  %s1254_s27 = int_to_ptr.vmem [resolvable:$false] %s1253_s27 }
  0x81   : > { %402 = vperm.xlu1 %1102, %v1593_v7   ;;  %p1251_p7 = pnand %p1250_p3, %p1477_p12  ;;  %s1255_s0 = scalar_lea.vmem %s1254_s27, 512 }
  0x82   : > { %p1256_p1 = scmp.lt.s32.totalorder %s1812_s23, %s1254_s27  ;;  %p1257_p5 = scmp.lt.s32.totalorder %s1255_s0, %s1249_s7 }
  0x83   : > { %987 = vmatpush3.bf16.msra.mxu0 %v1146_v5  ;;  %1099 = vset.pattern.permute.xlu0 %v1335_v2  ;;  %p1252_p9 = pneg %p1251_p7 }
  0x84   : > { %988 = vmatprep.subr.bf16.mxu0 %v1332_v0  ;;  %382 = vperm.xlu0 %1099, %v1591_v6   ;;  %p1258_p2 = por %p1257_p5, %p1256_p1 }
  0x85   : > { %1103 = vset.pattern.permute.xlu1 %v1337_v12 }
  0x86   : > { %416 = vperm.xlu1 %1103, %v1591_v6   ;;  %p1259_p6 = pnand %p1258_p2, %p1252_p9 }
  0x87   : > { %989 = vmatpush3.bf16.msra.mxu0 %v1147_v8 }
  0x88   : > { %990 = vmatprep.subr.bf16.mxu0 %v1332_v0  ;;  %1101 = vset.pattern.permute.xlu0 %v1336_v10 }
  0x89   : > { %399 = vperm.xlu0 %1101, %v1591_v6  }
  0x8a   : > { %1105 = vset.pattern.permute.xlu1 %v1338_v14 }
  0x8b   : > { %991 = vmatpush3.bf16.msra.mxu0 %v1148_v9  ;;  %433 = vperm.xlu1 %1105, %v1591_v6  }
  0x8c   : > { %992 = vmatprep.subr.bf16.mxu0 %v1332_v0 }
  0x8d   : > { %1104 = vset.pattern.permute.xlu0 %v1337_v12 }
  0x8e   : > { %419 = vperm.xlu0 %1104, %v1593_v7  }
  0x8f   : > { %993 = vmatpush3.bf16.msra.mxu0 %v1149_v11  ;;  %436 = vperm.xlu1 %1105, %v1593_v7  }
  0x90   : > { %994 = vmatprep.subr.bf16.mxu0 %v1332_v0 }
  0x92   : > { %1106 = vset.pattern.permute.xlu0 %v1339_v17 }
  0x93   : > { %995 = vmatpush3.bf16.msra.mxu0 %v1150_v13  ;;  %450 = vperm.xlu0 %1106, %v1591_v6  }
  0x94   : > { %996 = vmatprep.subr.bf16.mxu0 %v1332_v0  ;;  %1107 = vset.pattern.permute.xlu1 %v1339_v17 }
  0x95   : > { %453 = vperm.xlu1 %1107, %v1593_v7  }
  0x97   : > { %997 = vmatpush3.bf16.msra.mxu0 %v1151_v15  ;;  %1108 = vset.pattern.permute.xlu0 %v1340_v18 }
  0x99   : > { %1109 = vset.pattern.permute.xlu1 %v1340_v18 }
  0x9a   : > { %999 = vmatmul.mubr.bf16.vlgmr.msra.gmra.mrb[0].mxu0 %v1152_v16  ;;  %v1342_v16 = vmov 8  }
  0xfa   : > { %v366_v19 = vpop.permute.xlu0 %365 }
  0xfb   : > { %v386_v20 = vpop.permute.xlu1 %385  ;;  %vm370_vm1 = vcmp.eq.s32.totalorder %v1608_v26, %v366_v19 }
  0xfc   : > { %vm388_vm11 = vcmp.eq.s32.totalorder %v1608_v26, %v386_v20 }
  0xfe   : > { %v369_v21 = vpop.permute.xlu0 %368 }
  0xff   : > { %vm371_vm10 = vcmp.eq.s32.totalorder %v1608_v26, %v369_v21 }
 0x100   : > { %v403_v22 = vpop.permute.xlu1 %402 }
 0x101   : > { %vm405_vm4 = vcmp.eq.s32.totalorder %v1608_v26, %v403_v22 }
 0x103   : > { %v383_v24 = vpop.permute.xlu0 %382 }
 0x104   : > { %vm387_vm2 = vcmp.eq.s32.totalorder %v1608_v26, %v383_v24 }
 0x105   : > { %v417_v25 = vpop.permute.xlu1 %416 }
 0x106   : > { %vm421_vm6 = vcmp.eq.s32.totalorder %v1608_v26, %v417_v25 }
 0x108   : > { %v400_v27 = vpop.permute.xlu0 %399 }
 0x109   : > { %vm404_vm3 = vcmp.eq.s32.totalorder %v1608_v26, %v400_v27 }
 0x10a   : > { %v434_v28 = vpop.permute.xlu1 %433 }
 0x10b   : > { %vm438_vm7 = vcmp.eq.s32.totalorder %v1608_v26, %v434_v28 }
 0x10d   : > { %v420_v35 = vpop.permute.xlu0 %419 }
 0x10e   : > { %v437_v36 = vpop.permute.xlu1 %436  ;;  %vm422_vm5 = vcmp.eq.s32.totalorder %v1608_v26, %v420_v35 }
 0x10f   : > { %vm439_vm8 = vcmp.eq.s32.totalorder %v1608_v26, %v437_v36 }
 0x112   : > { %v451_v46 = vpop.permute.xlu0 %450 }
 0x113   : > { %vm455_vm12 = vcmp.eq.s32.totalorder %v1608_v26, %v451_v46  ;;  %v1345_v46 = vmov 11  }
 0x114   : > { %v454_v41 = vpop.permute.xlu1 %453 }
 0x115   : > { %vm456_vm9 = vcmp.eq.s32.totalorder %v1608_v26, %v454_v41 }
 0x16d   : > { %v1612_v29 = vpop.f32.mrb[0].mxu0 }
 0x16e   : > { %v1000_v30 = vpop.f32.mrb[1].mxu0  ;;  %v389_v31 = vsel %vm387_vm2, %v1612_v29, 0.0  ;;  %v372_v32 = vsel %vm370_vm1, %v1612_v29, 0.0  ;;  %v406_v37 = vsel %vm404_vm3, %v1612_v29, 0.0  ;;  %v423_v39 = vsel %vm421_vm6, %v1612_v29, 0.0 }
 0x16f   : > { %391 = vadd.xlane.f32.xlu0 %v389_v31  ;;  %374 = vadd.xlane.f32.xlu1 %v372_v32  ;;  %v1617_v33 = vpop.f32.mrb[2].mxu0  ;;  %v440_v42 = vsel %vm438_vm7, %v1612_v29, 0.0  ;;  %v457_v48 = vsel %vm455_vm12, %v1612_v29, 0.0  ;;  %vm446_vm1 = vcmp.eq.s32.totalorder %v1608_v26, 4  ;;  %vm463_vm2 = vcmp.eq.s32.totalorder %v1608_v26, 5 }
 0x170   : > { %v1001_v34 = vpop.f32.mrb[3].mxu0  ;;  %v407_v38 = vsel %vm405_vm4, %v1617_v33, 0.0  ;;  %v424_v40 = vsel %vm422_vm5, %v1617_v33, 0.0  ;;  %v441_v43 = vsel %vm439_vm8, %v1617_v33, 0.0  ;;  %v458_v44 = vsel %vm456_vm9, %v1617_v33, 0.0 }
 0x171   : > { %v373_v45 = vsel %vm371_vm10, %v1617_v33, 0.0  ;;  %v390_v47 = vsel %vm388_vm11, %v1617_v33, 0.0  ;;  %vm480_vm5 = vcmp.eq.s32.totalorder %v1608_v26, 6  ;;  %vm497_vm8 = vcmp.eq.s32.totalorder %v1608_v26, 7 }
 0x172   : > { %vm514_vm11 = vcmp.eq.s32.totalorder %v1608_v26, 8 }
 0x173   : > { %408 = vadd.xlane.f32.xlu1 %v406_v37  ;;  %410 = vadd.xlane.f32.xlu0 %v407_v38  ;;  %v1344_v37 = vmov 10  }
 0x177   : > { %425 = vadd.xlane.f32.xlu1 %v423_v39  ;;  %427 = vadd.xlane.f32.xlu0 %v424_v40 }
 0x17b   : > { %442 = vadd.xlane.f32.xlu1 %v440_v42  ;;  %444 = vadd.xlane.f32.xlu0 %v441_v43 }
 0x17f   : > { %461 = vadd.xlane.f32.xlu0 %v458_v44  ;;  %376 = vadd.xlane.f32.xlu1 %v373_v45 }
 0x183   : > { %393 = vadd.xlane.f32.xlu1 %v390_v47  ;;  %v1346_v47 = vmov 12  }
 0x187   : > { %459 = vadd.xlane.f32.xlu1 %v457_v48 }
 0x195   : > { %467 = vperm.xlu0 %1108, %v1591_v6  }
 0x198   : > { %470 = vperm.xlu1 %1109, %v1593_v7  }
 0x199   : > { %1111 = vset.pattern.permute.xlu0 %v1342_v16 }
 0x19c   : > { %1110 = vset.pattern.permute.xlu1 %v1341_v49 }
 0x1fc   : > { %v392_v50 = vpop.xlane.xlu0 %391  ;;  %v375_v51 = vpop.xlane.xlu1 %374 }
 0x1fd   : > { %v379_v59 = vsel %vm378_vm13, %v375_v51, 0.0 }
 0x1fe   : > { %v396_v63 = vsel %vm395_vm14, %v392_v50, %v379_v59 }
 0x200   : > { %v409_v52 = vpop.xlane.xlu1 %408  ;;  %v411_v53 = vpop.xlane.xlu0 %410 }
 0x201   : > { %v413_v1 = vsel %vm412_vm15, %v409_v52, %v396_v63 }
 0x204   : > { %v426_v54 = vpop.xlane.xlu1 %425  ;;  %v428_v55 = vpop.xlane.xlu0 %427 }
 0x205   : > { %v430_v4 = vsel %vm429_vm0, %v426_v54, %v413_v1 }
 0x208   : > { %v443_v56 = vpop.xlane.xlu1 %442  ;;  %v445_v57 = vpop.xlane.xlu0 %444 }
 0x209   : > { %v447_v8 = vsel %vm446_vm1, %v443_v56, %v430_v4 }
 0x20c   : > { %v377_v58 = vpop.xlane.xlu1 %376  ;;  %v462_v60 = vpop.xlane.xlu0 %461 }
 0x20d   : > { %v380_v61 = vsel %vm378_vm13, %v377_v58, 0.0  ;;  %v1347_v58 = vmov 13  }
 0x210   : > { %v394_v62 = vpop.xlane.xlu1 %393 }
 0x211   : > { %v397_v0 = vsel %vm395_vm14, %v394_v62, %v380_v61  ;;  %vm531_vm14 = vcmp.eq.s32.totalorder %v1608_v26, 9 }
 0x212   : > { %v414_v2 = vsel %vm412_vm15, %v411_v53, %v397_v0 }
 0x213   : > { %v431_v3 = vsel %vm429_vm0, %v428_v55, %v414_v2 }
 0x214   : > { %v468_v5 = vpop.permute.xlu0 %467  ;;  %v460_v9 = vpop.xlane.xlu1 %459  ;;  %v448_v10 = vsel %vm446_vm1, %v445_v57, %v431_v3 }
 0x215   : > { %vm472_vm3 = vcmp.eq.s32.totalorder %v1608_v26, %v468_v5  ;;  %v464_v11 = vsel %vm463_vm2, %v460_v9, %v447_v8  ;;  %v465_v12 = vsel %vm463_vm2, %v462_v60, %v448_v10  ;;  %vm548_vm2 = vcmp.eq.s32.totalorder %v1608_v26, 10 }
 0x216   : > { %v474_v13 = vsel %vm472_vm3, %v1612_v29, 0.0  ;;  %vm565_vm3 = vcmp.eq.s32.totalorder %v1608_v26, 11  ;;  %v1348_v5 = vmov 14  }
 0x217   : > { %476 = vadd.xlane.f32.xlu1 %v474_v13 }
 0x218   : > { %v471_v14 = vpop.permute.xlu1 %470 }
 0x219   : > { %vm473_vm4 = vcmp.eq.s32.totalorder %v1608_v26, %v471_v14 }
 0x21a   : > { %v475_v15 = vsel %vm473_vm4, %v1617_v33, 0.0 }
 0x21b   : > { %478 = vadd.xlane.f32.xlu0 %v475_v15 }
 0x228   : > { %484 = vperm.xlu1 %1110, %v1591_v6  }
 0x22c   : > { %487 = vperm.xlu1 %1110, %v1593_v7  }
 0x230   : > { %1112 = vset.pattern.permute.xlu1 %v1342_v16  ;;  %v1349_v16 = vmov 15  }
 0x2a4   : > { %v477_v17 = vpop.xlane.xlu1 %476 }
 0x2a5   : > { %v481_v18 = vsel %vm480_vm5, %v477_v17, %v464_v11 }
 0x2a8   : > { %v485_v19 = vpop.permute.xlu1 %484  ;;  %v479_v24 = vpop.xlane.xlu0 %478 }
 0x2a9   : > { %vm489_vm6 = vcmp.eq.s32.totalorder %v1608_v26, %v485_v19  ;;  %v482_v28 = vsel %vm480_vm5, %v479_v24, %v465_v12 }
 0x2aa   : > { %v491_v20 = vsel %vm489_vm6, %v1612_v29, 0.0 }
 0x2ab   : > { %493 = vadd.xlane.f32.xlu0 %v491_v20 }
 0x2ac   : > { %v488_v21 = vpop.permute.xlu1 %487 }
 0x2ad   : > { %vm490_vm7 = vcmp.eq.s32.totalorder %v1608_v26, %v488_v21 }
 0x2ae   : > { %v492_v22 = vsel %vm490_vm7, %v1617_v33, 0.0  ;;  %vm582_vm7 = vcmp.eq.s32.totalorder %v1608_v26, 12 }
 0x2af   : > { %495 = vadd.xlane.f32.xlu1 %v492_v22 }
 0x2c0   : > { %504 = vperm.xlu1 %1112, %v1593_v7  }
 0x2c1   : > { %501 = vperm.xlu0 %1111, %v1591_v6  }
 0x2c4   : > { %1114 = vset.pattern.permute.xlu1 %v1343_v23 }
 0x2c5   : > { %1113 = vset.pattern.permute.xlu0 %v1343_v23 }
 0x338   : > { %v494_v25 = vpop.xlane.xlu0 %493 }
 0x339   : > { %v498_v27 = vsel %vm497_vm8, %v494_v25, %v481_v18 }
 0x33c   : > { %v496_v30 = vpop.xlane.xlu1 %495 }
 0x33d   : > { %v499_v31 = vsel %vm497_vm8, %v496_v30, %v482_v28  ;;  %v1350_v28 = vmov 16  }
 0x340   : > { %v502_v32 = vpop.permute.xlu0 %501  ;;  %v505_v34 = vpop.permute.xlu1 %504 }
 0x341   : > { %vm506_vm9 = vcmp.eq.s32.totalorder %v1608_v26, %v502_v32  ;;  %vm507_vm10 = vcmp.eq.s32.totalorder %v1608_v26, %v505_v34 }
 0x342   : > { %v508_v35 = vsel %vm506_vm9, %v1612_v29, 0.0  ;;  %v509_v36 = vsel %vm507_vm10, %v1617_v33, 0.0  ;;  %vm599_vm10 = vcmp.eq.s32.totalorder %v1608_v26, 13 }
 0x343   : > { %510 = vadd.xlane.f32.xlu0 %v508_v35  ;;  %512 = vadd.xlane.f32.xlu1 %v509_v36 }
 0x354   : > { %521 = vperm.xlu1 %1114, %v1593_v7  }
 0x358   : > { %1115 = vset.pattern.permute.xlu1 %v1344_v37 }
 0x359   : > { %518 = vperm.xlu0 %1113, %v1591_v6  }
 0x35d   : > { %1116 = vset.pattern.permute.xlu0 %v1344_v37 }
 0x3d0   : > { %v511_v38 = vpop.xlane.xlu0 %510  ;;  %v513_v39 = vpop.xlane.xlu1 %512 }
 0x3d1   : > { %v515_v40 = vsel %vm514_vm11, %v511_v38, %v498_v27  ;;  %v516_v41 = vsel %vm514_vm11, %v513_v39, %v499_v31 }
 0x3d4   : > { %v522_v42 = vpop.permute.xlu1 %521 }
 0x3d5   : > { %vm524_vm12 = vcmp.eq.s32.totalorder %v1608_v26, %v522_v42 }
 0x3d6   : > { %v526_v43 = vsel %vm524_vm12, %v1617_v33, 0.0 }
 0x3d7   : > { %529 = vadd.xlane.f32.xlu0 %v526_v43 }
 0x3d8   : > { %v519_v44 = vpop.permute.xlu0 %518 }
 0x3d9   : > { %vm523_vm13 = vcmp.eq.s32.totalorder %v1608_v26, %v519_v44 }
 0x3da   : > { %v525_v45 = vsel %vm523_vm13, %v1612_v29, 0.0  ;;  %vm616_vm13 = vcmp.eq.s32.totalorder %v1608_v26, 14 }
 0x3db   : > { %527 = vadd.xlane.f32.xlu1 %v525_v45 }
 0x3ec   : > { %535 = vperm.xlu1 %1115, %v1591_v6  }
 0x3ed   : > { %538 = vperm.xlu0 %1116, %v1593_v7  }
 0x3f0   : > { %1118 = vset.pattern.permute.xlu1 %v1345_v46 }
 0x3f1   : > { %1117 = vset.pattern.permute.xlu0 %v1345_v46 }
 0x3f2   : > { %552 = vperm.xlu0 %1117, %v1591_v6  }
 0x3f6   : > { %1119 = vset.pattern.permute.xlu0 %v1346_v47 }
 0x464   : > { %v530_v48 = vpop.xlane.xlu0 %529 }
 0x465   : > { %v533_v49 = vsel %vm531_vm14, %v530_v48, %v516_v41  ;;  %v1351_v41 = vmov 17  }
 0x468   : > { %v528_v50 = vpop.xlane.xlu1 %527 }
 0x469   : > { %v532_v51 = vsel %vm531_vm14, %v528_v50, %v515_v40  ;;  %v1352_v50 = vmov 18  }
 0x46c   : > { %v539_v52 = vpop.permute.xlu0 %538  ;;  %v536_v53 = vpop.permute.xlu1 %535 }
 0x46d   : > { %vm540_vm15 = vcmp.eq.s32.totalorder %v1608_v26, %v536_v53  ;;  %vm541_vm0 = vcmp.eq.s32.totalorder %v1608_v26, %v539_v52 }
 0x46e   : > { %v542_v54 = vsel %vm540_vm15, %v1612_v29, 0.0  ;;  %v543_v56 = vsel %vm541_vm0, %v1617_v33, 0.0  ;;  %vm633_vm0 = vcmp.eq.s32.totalorder %v1608_v26, 15 }
 0x46f   : > { %544 = vadd.xlane.f32.xlu1 %v542_v54 }
 0x471   : > { %v553_v55 = vpop.permute.xlu0 %552 }
 0x472   : > { %vm557_vm1 = vcmp.eq.s32.totalorder %v1608_v26, %v553_v55 }
 0x473   : > { %546 = vadd.xlane.f32.xlu1 %v543_v56  ;;  %v559_v57 = vsel %vm557_vm1, %v1612_v29, 0.0 }
 0x474   : > { %561 = vadd.xlane.f32.xlu0 %v559_v57  ;;  %v1353_v57 = vmov 19  }
 0x484   : > { %555 = vperm.xlu1 %1118, %v1593_v7  }
 0x488   : > { %1120 = vset.pattern.permute.xlu1 %v1346_v47 }
 0x48a   : > { %569 = vperm.xlu0 %1119, %v1591_v6  }
 0x48e   : > { %1122 = vset.pattern.permute.xlu0 %v1347_v58 }
 0x4fc   : > { %v545_v59 = vpop.xlane.xlu1 %544 }
 0x4fd   : > { %v549_v60 = vsel %vm548_vm2, %v545_v59, %v532_v51 }
 0x500   : > { %v547_v61 = vpop.xlane.xlu1 %546 }
 0x501   : > { %v550_v62 = vsel %vm548_vm2, %v547_v61, %v533_v49  ;;  %v562_v63 = vpop.xlane.xlu0 %561 }
 0x502   : > { %v566_v0 = vsel %vm565_vm3, %v562_v63, %v549_v60 }
 0x504   : > { %v556_v1 = vpop.permute.xlu1 %555 }
 0x505   : > { %vm558_vm4 = vcmp.eq.s32.totalorder %v1608_v26, %v556_v1 }
 0x506   : > { %v560_v2 = vsel %vm558_vm4, %v1617_v33, 0.0 }
 0x507   : > { %563 = vadd.xlane.f32.xlu1 %v560_v2 }
 0x509   : > { %v570_v3 = vpop.permute.xlu0 %569 }
 0x50a   : > { %vm574_vm5 = vcmp.eq.s32.totalorder %v1608_v26, %v570_v3 }
 0x50b   : > { %v576_v4 = vsel %vm574_vm5, %v1612_v29, 0.0 }
 0x518   : > { %572 = vperm.xlu1 %1120, %v1593_v7  }
 0x51c   : > { %1121 = vset.pattern.permute.xlu1 %v1347_v58 }
 0x53c   : > { %578 = vadd.xlane.f32.xlu1 %v576_v4  ;;  %v1354_v4 = vmov 20  }
 0x54d   : > { %586 = vperm.xlu1 %1121, %v1591_v6  }
 0x551   : > { %1123 = vset.pattern.permute.xlu1 %v1348_v5 }
 0x594   : > { %v564_v8 = vpop.xlane.xlu1 %563 }
 0x595   : > { %v567_v9 = vsel %vm565_vm3, %v564_v8, %v550_v62  ;;  %vm650_vm3 = vcmp.eq.s32.totalorder %v1608_v26, 16 }
 0x598   : > { %v573_v10 = vpop.permute.xlu1 %572 }
 0x599   : > { %vm575_vm6 = vcmp.eq.s32.totalorder %v1608_v26, %v573_v10 }
 0x59a   : > { %v577_v11 = vsel %vm575_vm6, %v1617_v33, 0.0  ;;  %vm667_vm6 = vcmp.eq.s32.totalorder %v1608_v26, 17 }
 0x59b   : > { %580 = vadd.xlane.f32.xlu0 %v577_v11 }
 0x5b1   : > { %589 = vperm.xlu0 %1122, %v1593_v7  }
 0x5b5   : > { %1124 = vset.pattern.permute.xlu0 %v1349_v16 }
 0x5c9   : > { %v579_v12 = vpop.xlane.xlu1 %578 }
 0x5ca   : > { %v583_v13 = vsel %vm582_vm7, %v579_v12, %v566_v0 }
 0x5cd   : > { %v587_v14 = vpop.permute.xlu1 %586 }
 0x5ce   : > { %vm591_vm8 = vcmp.eq.s32.totalorder %v1608_v26, %v587_v14 }
 0x5cf   : > { %v593_v15 = vsel %vm591_vm8, %v1612_v29, 0.0 }
 0x5d0   : > { %595 = vadd.xlane.f32.xlu1 %v593_v15  ;;  %v1355_v15 = vmov 21  }
 0x5e1   : > { %603 = vperm.xlu1 %1123, %v1591_v6  }
 0x5e5   : > { %606 = vperm.xlu1 %1123, %v1593_v7  }
 0x5e9   : > { %1125 = vset.pattern.permute.xlu1 %v1349_v16  ;;  %v1356_v16 = vmov 22  }
 0x628   : > { %v581_v17 = vpop.xlane.xlu0 %580 }
 0x629   : > { %v584_v18 = vsel %vm582_vm7, %v581_v17, %v567_v9 }
 0x630   : > { %v590_v19 = vpop.permute.xlu0 %589 }
 0x631   : > { %vm592_vm9 = vcmp.eq.s32.totalorder %v1608_v26, %v590_v19 }
 0x632   : > { %v594_v20 = vsel %vm592_vm9, %v1617_v33, 0.0  ;;  %vm684_vm9 = vcmp.eq.s32.totalorder %v1608_v26, 18 }
 0x633   : > { %597 = vadd.xlane.f32.xlu0 %v594_v20 }
 0x65d   : > { %v596_v21 = vpop.xlane.xlu1 %595 }
 0x65e   : > { %v600_v22 = vsel %vm599_vm10, %v596_v21, %v583_v13 }
 0x661   : > { %v604_v23 = vpop.permute.xlu1 %603 }
 0x662   : > { %vm608_vm11 = vcmp.eq.s32.totalorder %v1608_v26, %v604_v23 }
 0x663   : > { %v610_v24 = vsel %vm608_vm11, %v1612_v29, 0.0 }
 0x664   : > { %612 = vadd.xlane.f32.xlu1 %v610_v24 }
 0x665   : > { %v607_v25 = vpop.permute.xlu1 %606 }
 0x666   : > { %vm609_vm12 = vcmp.eq.s32.totalorder %v1608_v26, %v607_v25 }
 0x667   : > { %v611_v27 = vsel %vm609_vm12, %v1617_v33, 0.0  ;;  %vm701_vm12 = vcmp.eq.s32.totalorder %v1608_v26, 19 }
 0x668   : > { %614 = vadd.xlane.f32.xlu0 %v611_v27 }
 0x675   : > { %623 = vperm.xlu1 %1125, %v1593_v7  }
 0x679   : > { %1127 = vset.pattern.permute.xlu1 %v1350_v28 }
 0x67e   : > { %620 = vperm.xlu0 %1124, %v1591_v6  }
 0x682   : > { %1126 = vset.pattern.permute.xlu0 %v1350_v28  ;;  %v1357_v28 = vmov 24  }
 0x6c0   : > { %v598_v30 = vpop.xlane.xlu0 %597 }
 0x6c1   : > { %v601_v31 = vsel %vm599_vm10, %v598_v30, %v584_v18  ;;  %v1358_v30 = vmov 25  }
 0x6f1   : > { %v613_v32 = vpop.xlane.xlu1 %612 }
 0x6f2   : > { %v617_v34 = vsel %vm616_vm13, %v613_v32, %v600_v22 }
 0x6f5   : > { %v615_v35 = vpop.xlane.xlu0 %614  ;;  %v624_v36 = vpop.permute.xlu1 %623 }
 0x6f6   : > { %v618_v37 = vsel %vm616_vm13, %v615_v35, %v601_v31  ;;  %vm626_vm14 = vcmp.eq.s32.totalorder %v1608_v26, %v624_v36 }
 0x6f7   : > { %v628_v38 = vsel %vm626_vm14, %v1617_v33, 0.0 }
 0x6f8   : > { %631 = vadd.xlane.f32.xlu0 %v628_v38 }
 0x6fd   : > { %v621_v39 = vpop.permute.xlu0 %620 }
 0x6fe   : > { %vm625_vm15 = vcmp.eq.s32.totalorder %v1608_v26, %v621_v39 }
 0x6ff   : > { %v627_v40 = vsel %vm625_vm15, %v1612_v29, 0.0 }
 0x700   : > { %629 = vadd.xlane.f32.xlu1 %v627_v40 }
 0x70e   : > { %637 = vperm.xlu0 %1126, %v1591_v6  }
 0x711   : > { %640 = vperm.xlu1 %1127, %v1593_v7  }
 0x712   : > { %1129 = vset.pattern.permute.xlu0 %v1352_v50 }
 0x715   : > { %1128 = vset.pattern.permute.xlu1 %v1351_v41 }
 0x785   : > { %v632_v42 = vpop.xlane.xlu0 %631 }
 0x786   : > { %v635_v43 = vsel %vm633_vm0, %v632_v42, %v618_v37  ;;  %v1359_v42 = vmov 23  }
 0x78d   : > { %v638_v44 = vpop.permute.xlu0 %637  ;;  %v630_v45 = vpop.xlane.xlu1 %629 }
 0x78e   : > { %vm642_vm1 = vcmp.eq.s32.totalorder %v1608_v26, %v638_v44  ;;  %v634_v46 = vsel %vm633_vm0, %v630_v45, %v617_v34  ;;  %vm718_vm0 = vcmp.eq.s32.totalorder %v1608_v26, 20 }
 0x78f   : > { %v644_v47 = vsel %vm642_vm1, %v1612_v29, 0.0  ;;  %vm735_vm1 = vcmp.eq.s32.totalorder %v1608_v26, 21 }
 0x790   : > { %646 = vadd.xlane.f32.xlu1 %v644_v47 }
 0x791   : > { %v641_v48 = vpop.permute.xlu1 %640 }
 0x792   : > { %vm643_vm2 = vcmp.eq.s32.totalorder %v1608_v26, %v641_v48 }
 0x793   : > { %v645_v49 = vsel %vm643_vm2, %v1617_v33, 0.0 }
 0x794   : > { %648 = vadd.xlane.f32.xlu0 %v645_v49 }
 0x7a1   : > { %654 = vperm.xlu1 %1128, %v1591_v6  }
 0x7a5   : > { %657 = vperm.xlu1 %1128, %v1593_v7  }
 0x7a9   : > { %1130 = vset.pattern.permute.xlu1 %v1352_v50 }
 0x81d   : > { %v647_v51 = vpop.xlane.xlu1 %646 }
 0x81e   : > { %v651_v52 = vsel %vm650_vm3, %v647_v51, %v634_v46 }
 0x821   : > { %v655_v53 = vpop.permute.xlu1 %654  ;;  %v649_v58 = vpop.xlane.xlu0 %648 }
 0x822   : > { %vm659_vm4 = vcmp.eq.s32.totalorder %v1608_v26, %v655_v53  ;;  %v652_v61 = vsel %vm650_vm3, %v649_v58, %v635_v43 }
 0x823   : > { %v661_v54 = vsel %vm659_vm4, %v1612_v29, 0.0 }
 0x824   : > { %663 = vadd.xlane.f32.xlu0 %v661_v54 }
 0x825   : > { %v658_v55 = vpop.permute.xlu1 %657 }
 0x826   : > { %vm660_vm5 = vcmp.eq.s32.totalorder %v1608_v26, %v658_v55 }
 0x827   : > { %v662_v56 = vsel %vm660_vm5, %v1617_v33, 0.0 }
 0x828   : > { %665 = vadd.xlane.f32.xlu1 %v662_v56 }
 0x839   : > { %674 = vperm.xlu1 %1130, %v1593_v7  }
 0x83a   : > { %671 = vperm.xlu0 %1129, %v1591_v6  }
 0x83d   : > { %1132 = vset.pattern.permute.xlu1 %v1353_v57 }
 0x83e   : > { %1131 = vset.pattern.permute.xlu0 %v1353_v57 }
 0x8b1   : > { %v664_v59 = vpop.xlane.xlu0 %663 }
 0x8b2   : > { %v668_v60 = vsel %vm667_vm6, %v664_v59, %v651_v52 }
 0x8b5   : > { %v666_v62 = vpop.xlane.xlu1 %665 }
 0x8b6   : > { %v669_v63 = vsel %vm667_vm6, %v666_v62, %v652_v61 }
 0x8b9   : > { %v672_v0 = vpop.permute.xlu0 %671  ;;  %v675_v1 = vpop.permute.xlu1 %674 }
 0x8ba   : > { %vm676_vm7 = vcmp.eq.s32.totalorder %v1608_v26, %v672_v0  ;;  %vm677_vm8 = vcmp.eq.s32.totalorder %v1608_v26, %v675_v1 }
 0x8bb   : > { %v678_v2 = vsel %vm676_vm7, %v1612_v29, 0.0  ;;  %v679_v3 = vsel %vm677_vm8, %v1617_v33, 0.0 }
 0x8bc   : > { %680 = vadd.xlane.f32.xlu0 %v678_v2  ;;  %682 = vadd.xlane.f32.xlu1 %v679_v3 }
 0x8cd   : > { %691 = vperm.xlu1 %1132, %v1593_v7  }
 0x8d1   : > { %1133 = vset.pattern.permute.xlu1 %v1354_v4 }
 0x8d2   : > { %688 = vperm.xlu0 %1131, %v1591_v6  }
 0x8d6   : > { %1134 = vset.pattern.permute.xlu0 %v1354_v4 }
 0x949   : > { %v681_v5 = vpop.xlane.xlu0 %680  ;;  %v683_v8 = vpop.xlane.xlu1 %682 }
 0x94a   : > { %v685_v9 = vsel %vm684_vm9, %v681_v5, %v668_v60  ;;  %v686_v10 = vsel %vm684_vm9, %v683_v8, %v669_v63 }
 0x94d   : > { %v692_v11 = vpop.permute.xlu1 %691 }
 0x94e   : > { %vm694_vm10 = vcmp.eq.s32.totalorder %v1608_v26, %v692_v11 }
 0x94f   : > { %v696_v12 = vsel %vm694_vm10, %v1617_v33, 0.0 }
 0x950   : > { %699 = vadd.xlane.f32.xlu0 %v696_v12 }
 0x951   : > { %v689_v13 = vpop.permute.xlu0 %688 }
 0x952   : > { %vm693_vm11 = vcmp.eq.s32.totalorder %v1608_v26, %v689_v13 }
 0x953   : > { %v695_v14 = vsel %vm693_vm11, %v1612_v29, 0.0  ;;  %vm752_vm11 = vcmp.eq.s32.totalorder %v1608_v26, 22 }
 0x954   : > { %697 = vadd.xlane.f32.xlu1 %v695_v14 }
 0x965   : > { %705 = vperm.xlu1 %1133, %v1591_v6  }
 0x966   : > { %708 = vperm.xlu0 %1134, %v1593_v7  }
 0x969   : > { %1136 = vset.pattern.permute.xlu1 %v1355_v15 }
 0x96a   : > { %1135 = vset.pattern.permute.xlu0 %v1355_v15 }
 0x96b   : > { %722 = vperm.xlu0 %1135, %v1591_v6  }
 0x96f   : > { %1137 = vset.pattern.permute.xlu0 %v1356_v16 }
 0x9dd   : > { %v700_v17 = vpop.xlane.xlu0 %699 }
 0x9de   : > { %v703_v18 = vsel %vm701_vm12, %v700_v17, %v686_v10 }
 0x9e1   : > { %v698_v19 = vpop.xlane.xlu1 %697 }
 0x9e2   : > { %v702_v20 = vsel %vm701_vm12, %v698_v19, %v685_v9  ;;  %vm769_vm12 = vcmp.eq.s32.totalorder %v1608_v26, 23 }
 0x9e5   : > { %v709_v21 = vpop.permute.xlu0 %708  ;;  %v706_v22 = vpop.permute.xlu1 %705 }
 0x9e6   : > { %vm710_vm13 = vcmp.eq.s32.totalorder %v1608_v26, %v706_v22  ;;  %vm711_vm14 = vcmp.eq.s32.totalorder %v1608_v26, %v709_v21 }
 0x9e7   : > { %v712_v23 = vsel %vm710_vm13, %v1612_v29, 0.0  ;;  %v713_v25 = vsel %vm711_vm14, %v1617_v33, 0.0  ;;  %vm786_vm13 = vcmp.eq.s32.totalorder %v1608_v26, 24  ;;  %vm803_vm14 = vcmp.eq.s32.totalorder %v1608_v26, 25 }
 0x9e8   : > { %714 = vadd.xlane.f32.xlu1 %v712_v23 }
 0x9ea   : > { %v723_v24 = vpop.permute.xlu0 %722 }
 0x9eb   : > { %vm727_vm15 = vcmp.eq.s32.totalorder %v1608_v26, %v723_v24 }
 0x9ec   : > { %716 = vadd.xlane.f32.xlu1 %v713_v25  ;;  %v729_v27 = vsel %vm727_vm15, %v1612_v29, 0.0 }
 0x9ed   : > { %731 = vadd.xlane.f32.xlu0 %v729_v27 }
 0x9fd   : > { %725 = vperm.xlu1 %1136, %v1593_v7  }
 0xa01   : > { %1138 = vset.pattern.permute.xlu1 %v1356_v16 }
 0xa03   : > { %739 = vperm.xlu0 %1137, %v1591_v6  }
 0xa07   : > { %1141 = vset.pattern.permute.xlu0 %v1357_v28 }
 0xa08   : > { %776 = vperm.xlu0 %1141, %v1593_v7  }
 0xa0c   : > { %1143 = vset.pattern.permute.xlu0 %v1358_v30 }
 0xa75   : > { %v715_v31 = vpop.xlane.xlu1 %714 }
 0xa76   : > { %v719_v32 = vsel %vm718_vm0, %v715_v31, %v702_v20 }
 0xa79   : > { %v717_v34 = vpop.xlane.xlu1 %716 }
 0xa7a   : > { %v720_v35 = vsel %vm718_vm0, %v717_v34, %v703_v18  ;;  %v732_v36 = vpop.xlane.xlu0 %731 }
 0xa7b   : > { %v736_v37 = vsel %vm735_vm1, %v732_v36, %v719_v32 }
 0xa7d   : > { %v726_v38 = vpop.permute.xlu1 %725 }
 0xa7e   : > { %vm728_vm2 = vcmp.eq.s32.totalorder %v1608_v26, %v726_v38 }
 0xa7f   : > { %v730_v39 = vsel %vm728_vm2, %v1617_v33, 0.0 }
 0xa80   : > { %733 = vadd.xlane.f32.xlu1 %v730_v39 }
 0xa82   : > { %v740_v40 = vpop.permute.xlu0 %739 }
 0xa83   : > { %vm744_vm3 = vcmp.eq.s32.totalorder %v1608_v26, %v740_v40 }
 0xa84   : > { %v746_v41 = vsel %vm744_vm3, %v1612_v29, 0.0 }
 0xa85   : > { %748 = vadd.xlane.f32.xlu0 %v746_v41 }
 0xa87   : > { %v777_v49 = vpop.permute.xlu0 %776 }
 0xa88   : > { %vm779_vm7 = vcmp.eq.s32.totalorder %v1608_v26, %v777_v49 }
 0xa89   : > { %v781_v51 = vsel %vm779_vm7, %v1617_v33, 0.0 }
 0xa91   : > { %742 = vperm.xlu1 %1138, %v1593_v7  }
 0xa95   : > { %1139 = vset.pattern.permute.xlu1 %v1359_v42 }
 0xa96   : > { %756 = vperm.xlu1 %1139, %v1591_v6  }
 0xa9a   : > { %759 = vperm.xlu1 %1139, %v1593_v7  }
 0xa9e   : > { %1140 = vset.pattern.permute.xlu1 %v1357_v28 }
 0xa9f   : > { %773 = vperm.xlu1 %1140, %v1591_v6  }
 0xaa3   : > { %1142 = vset.pattern.permute.xlu1 %v1358_v30 }
 0xaa4   : > { %790 = vperm.xlu1 %1142, %v1591_v6  }
 0xaa8   : > { %793 = vperm.xlu1 %1142, %v1593_v7  }
 0xb0d   : > { %v734_v43 = vpop.xlane.xlu1 %733 }
 0xb0e   : > { %v737_v44 = vsel %vm735_vm1, %v734_v43, %v720_v35 }
 0xb11   : > { %v743_v45 = vpop.permute.xlu1 %742 }
 0xb12   : > { %vm745_vm4 = vcmp.eq.s32.totalorder %v1608_v26, %v743_v45  ;;  %v749_v57 = vpop.xlane.xlu0 %748 }
 0xb13   : > { %v747_v46 = vsel %vm745_vm4, %v1617_v33, 0.0  ;;  %v753_v62 = vsel %vm752_vm11, %v749_v57, %v736_v37 }
 0xb14   : > { %750 = vadd.xlane.f32.xlu1 %v747_v46 }
 0xb15   : > { %v757_v47 = vpop.permute.xlu1 %756 }
 0xb16   : > { %vm761_vm5 = vcmp.eq.s32.totalorder %v1608_v26, %v757_v47 }
 0xb17   : > { %v763_v48 = vsel %vm761_vm5, %v1612_v29, 0.0 }
 0xb18   : > { %765 = vadd.xlane.f32.xlu0 %v763_v48 }
 0xb19   : > { %v760_v6 = vpop.permute.xlu1 %759 }
 0xb1a   : > { %vm762_vm6 = vcmp.eq.s32.totalorder %v1608_v26, %v760_v6 }
 0xb1b   : > { %v764_v7 = vsel %vm762_vm6, %v1617_v33, 0.0 }
 0xb1c   : > { %767 = vadd.xlane.f32.xlu0 %v764_v7 }
 0xb1e   : > { %v774_v50 = vpop.permute.xlu1 %773 }
 0xb1f   : > { %vm778_vm8 = vcmp.eq.s32.totalorder %v1608_v26, %v774_v50 }
 0xb20   : > { %v780_v52 = vsel %vm778_vm8, %v1612_v29, 0.0  ;;  %784 = vadd.xlane.f32.xlu0 %v781_v51 }
 0xb21   : > { %782 = vadd.xlane.f32.xlu1 %v780_v52 }
 0xb23   : > { %v791_v53 = vpop.permute.xlu1 %790 }
 0xb24   : > { %vm795_vm9 = vcmp.eq.s32.totalorder %v1608_v26, %v791_v53 }
 0xb25   : > { %v797_v54 = vsel %vm795_vm9, %v1612_v29, 0.0 }
 0xb26   : > { %799 = vadd.xlane.f32.xlu1 %v797_v54 }
 0xb27   : > { %v794_v55 = vpop.permute.xlu1 %793 }
 0xb28   : > { %vm796_vm10 = vcmp.eq.s32.totalorder %v1608_v26, %v794_v55 }
 0xb29   : > { %v798_v56 = vsel %vm796_vm10, %v1617_v33, 0.0 }
 0xb2a   : > { %801 = vadd.xlane.f32.xlu0 %v798_v56 }
 0xba1   : > { %v751_v59 = vpop.xlane.xlu1 %750 }
 0xba2   : > { %v754_v2 = vsel %vm752_vm11, %v751_v59, %v737_v44 }
 0xba5   : > { %v766_v58 = vpop.xlane.xlu0 %765 }
 0xba6   : > { %v770_v29 = vsel %vm769_vm12, %v766_v58, %v753_v62 }
 0xba9   : > { %v768_v60 = vpop.xlane.xlu0 %767 }
 0xbaa   : > { %v771_v4 = vsel %vm769_vm12, %v768_v60, %v754_v2 }
 0xbad   : > { %v785_v63 = vpop.xlane.xlu0 %784 }
 0xbae   : > { %v783_v61 = vpop.xlane.xlu1 %782  ;;  %v788_v5 = vsel %vm786_vm13, %v785_v63, %v771_v4 }
 0xbaf   : > { %v787_v0 = vsel %vm786_vm13, %v783_v61, %v770_v29 }
 0xbb3   : > { %v800_v1 = vpop.xlane.xlu1 %799 }
 0xbb4   : > { %v804_v33 = vsel %vm803_vm14, %v800_v1, %v787_v0 }
 0xbb5   : > { %v963_v3 = vmul.f32 -1.442695, %v804_v33 }
 0xbb7   : > { %1153 = vpow2.f32 %v963_v3  ;;  %v802_v8 = vpop.xlane.xlu0 %801 }
 0xbb8   : > { %v805_v9 = vsel %vm803_vm14, %v802_v8, %v788_v5 }
 0xbb9   : > { %v964_v10 = vmul.f32 -1.442695, %v805_v9 }
 0xbbb   : > { %1155 = vpow2.f32 %v964_v10 }
 0xbc1   : > { %v1154_v11 = vpop.eup %1153 }
 0xbc2   : > { %v812_v12 = vadd.f32 1.0, %v1154_v11 }
 0xbc4   : > { %1157 = vrcp.f32 %v812_v12 }
 0xbc5   : > { %v1156_v26 = vpop.eup %1155 }
 0xbc6   : > { %v813_v13 = vadd.f32 1.0, %v1156_v26 }
 0xbc8   : > { %1159 = vrcp.f32 %v813_v13 }
 0xbce   : > { %v1158_v14 = vpop.eup %1157 }
 0xbcf   : > { %818 = vst [vmem:[%s242_s11] sm:$0xff] %v1158_v14 }
 0xbd2   : > { %v1160_v15 = vpop.eup %1159 }
 0xbd3   : > { %819 = vst [vmem:[%s242_s11 + $0x8] sm:$0xff] %v1160_v15 }
 0xbd4   : > { %1262 = shalt.err (!%p1259_p6)
}
 0xbd5   : > { %s1263_s28 = scalar_lea.hbm %s1810_s5, 256  ;;  %s1267_s9 = scalar_lea.hbm %s1859_s3, 512 }
 0xbd6   : > { %p1264_p8 = scmp.ne.s32.totalorder %s1810_s5, %s1263_s28  ;;  %p1268_p4 = scmp.lt.u32.totalorder %s1810_s5, %s1859_s3 }
 0xbd7   : > { %p1269_p11 = scmp.lt.u32.totalorder %s1267_s9, %s1263_s28  ;;  %p1271_p3 = scmp.lt.u32.totalorder %s1263_s28, %s1810_s5 }
 0xbd8   : > { %p1265_p10 = pnand %p1264_p8, %p1477_p12 }
 0xbd9   : > { %p1270_p13 = por %p1269_p11, %p1268_p4 }
 0xbda   : > { %p1266_p0 = pneg %p1265_p10 }
 0xbdb   : > { %p1272_p7 = por %p1271_p3, %p1270_p13 }
 0xbdd   : > { %p1273_p9 = pnand %p1272_p7, %p1266_p0 }
 0xbdf   : > { %1276 = shalt.err (!%p1273_p9)
}
 0xbe0   : > { %s1361_s29 = smov 128   ;;  %s1362_s10 = smov 8  }
 0xbe1   : > { %1010 = dma.vmem_to_hbm [thread:$0]  (%p1477_p12), %s1812_s23, 256, %s1810_s5, %s821_s6, %s1361_s29, %s1361_s29, %s1362_s10  }
 0xbe2 PF: > { %s849_s18 = sand.u32 1, %s1311_s12   ;;  %p1876_p1 = scmp.ne.s32.totalorder %s1865_s19, 0 }
 0xbe3   : > { %p1877_p5 = scmp.ge.s32.totalorder %s1323_s15, 2  ;;  %s850_s11 = scalar_lea.sflag [#allocation4], %s849_s18 }
 0xbe5   : > { %p1024_p2 = pnand %p1877_p5, %p1876_p1 }
 0xbe7   : > { %1306 = dma.done.wait (!%p1024_p2), %s850_s11, 256  }
 0xbe8   : > { %1308 = vsyncadd (!%p1024_p2), %s850_s11, 4294967040  ;;  %p19_p6 = scmp.ge.s32.totalorder %s1439_s24, 4   ;;  %s1878_s12 = smov %s1315_s13 }
 0xbe9   : > { %s1879_s13 = smov %s1319_s14  ;;  %s1880_s14 = smov %s1473_s17 }
 0xbea   : > { %s1881_s15 = smov %s1439_s24  ;;  %21 = sbr.rel (!%p19_p6) target bundleno = 9 (0x9), region = 94 }
 0xbf1   :  { %855 = vsyncpa [#allocation3], 1 }
 0xbf2   :  { %857 = vsyncpa [#allocation3 + $0x1], 1 }
 0xbf3   :  { %858 = vsyncpa [#allocation6], 1 }
 0xbf4   :  { %860 = vsyncpa [#allocation6 + $0x1], 1 }
 0xbf5   :  { %861 = vsyncpa [#allocation4], 1 }
 0xbf6   :  { %863 = vsyncpa [#allocation4 + $0x1], 1 }

// kernel: tpu_custom_call.1
= control target key start
LH: loop header
LB: loop body
LE: loop exit
PB: predicated region body
PF: predicated region fallthrough
CT: control target
= control target key end

     0   :  { %s1856_s0 = inlined_call_operand.hbm [shape: bf16[32,128], index: 0, kind: input, shape index: {}]   ;;  %s1857_s1 = inlined_call_operand.hbm [shape: s32[32,128], index: 1, kind: input, shape index: {}]   ;;  %s1858_s2 = inlined_call_operand.hbm [shape: bf16[128,128], index: 2, kind: input, shape index: {}]   ;;  %s1859_s3 = inlined_call_operand.hbm [shape: f32[32,128], index: 3, kind: output, shape index: {}]  }
   0x1   :  { %1863 = sst [smem:[#allocation13_spill]] %s1856_s0 }
   0x2   :  { %8 = vsyncpa [#allocation3], 0 }
   0x3   :  { %10 = vsyncpa [#allocation3 + $0x1], 0 }
   0x4   :  { %11 = vsyncpa [#allocation6], 0 }
   0x5   :  { %13 = vsyncpa [#allocation6 + $0x1], 0 }
   0x6   :  { %14 = vsyncpa [#allocation4], 0 }
   0x7   :  { %16 = vsyncpa [#allocation4 + $0x1], 0  ;;  %s1383_s12 = smov 0   ;;  %s1385_s13 = smov 0  }
   0x8   :  { %s1387_s14 = smov 0   ;;  %s1389_s15 = smov 0  }
   0x9 LB: > { %s1404_s16 = sadd.s32 4294967295, %s1323_s15   ;;  %s939_s17 = sadd.s32 4294967294, %s1323_s15   ;;  %s1323_s15 = sphi %s1389_s15, %s1881_s15   ;;  %s1319_s14 = sphi %s1387_s14, %s1880_s14   ;;  %s1315_s13 = sphi %s1385_s13, %s1879_s13   ;;  %s1311_s12 = sphi %s1383_s12, %s1878_s12  }
   0xa   : > { %p42_p0 = scmp.ne.s32.totalorder %s1315_s13, %s1311_s12  ;;  %p1860_p1 = scmp.eq.s32.totalorder %s1404_s16, 0 }
   0xb   : > { %p119_p3 = scmp.eq.s32.totalorder %s939_s17, 1  ;;  %p940_p5 = scmp.ge.s32.totalorder %s1323_s15, 1 }
   0xc   : > { %p1413_p4 = por %p1860_p1, %p42_p0  ;;  %p126_p7 = scmp.lt.s32.totalorder %s1323_s15, 3 }
   0xd   : > { %p1418_p6 = por %p119_p3, %p42_p0  ;;  %s1325_s21 = smov [#allocation7]  }
   0xe   : > { %s1864_s18 = scalar_select %p1413_p4, 1, 0 }
   0xf   : > { %s1865_s19 = scalar_select %p1418_p6, 1, 0 }
  0x10   : > { %p1423_p8 = pnand %p940_p5, %p126_p7  ;;  %s138_s22 = sshll.u32 %s1325_s21, 4  ;;  %s1427_s22 = int_to_ptr.vmem [resolvable:$true] %s138_s22 }
  0x11   : > { %s1439_s24 = sadd.s32 1, %s1323_s15   ;;  %s29_s25 = sadd.s32 1, %s1319_s14 }
  0x12   : > { %s1866_s20 = scalar_select %p1423_p8, 1, 0 }
  0x13   : > { %p1012_p9 = pneg %p1423_p8  ;;  %s26_s26 = ssub.s32 %s1323_s15, %s1439_s24 }
  0x14   : > { %s1161_s29 = scalar_lea.hbm %s1858_s2, 1024 }
  0x15   : > { %p1434_p11 = pnand %p1012_p9, %p1860_p1  ;;  %p1162_p12 = scmp.ne.s32.totalorder %s1858_s2, %s1161_s29 }
  0x16   : > { %p1168_p5 = scmp.lt.u32.totalorder %s1161_s29, %s1858_s2 }
  0x17   : > { %p1163_p13 = pneg %p1434_p11 }
  0x19   : > { %p1164_p0 = pnand %p1163_p13, %p1162_p12 }
  0x1b   : > { %p1165_p3 = pneg %p1164_p0 }
  0x1d   : > { %p1170_p7 = pnand %p1168_p5, %p1165_p3 }
  0x1f   : > { %1173 = shalt.err (!%p1170_p7)
}
  0x20   : > { %s1174_s7 = scalar_lea.vmem %s1427_s22, 1024  ;;  %p1182_p2 = scmp.lt.s32.totalorder %s1427_s22, %s1427_s22 }
  0x21   : > { %p1175_p9 = scmp.ne.s32.totalorder %s1427_s22, %s1174_s7  ;;  %p1183_p6 = scmp.lt.s32.totalorder %s1174_s7, %s1174_s7 }
  0x23   : > { %p1177_p10 = pnand %p1175_p9, %p1163_p13  ;;  %p1184_p4 = por %p1183_p6, %p1182_p2 }
  0x25   : > { %p1178_p1 = pneg %p1177_p10 }
  0x27   : > { %p1185_p8 = pnand %p1184_p4, %p1178_p1 }
  0x29   : > { %1188 = shalt.err (!%p1185_p8)
}
  0x2a   : > { %s1326_s8 = smov 64   ;;  %s1327_s9 = smov 4  }
  0x2b   : > { %1015 = dma.hbm_to_vmem [thread:$0]  (!%p1434_p11), %s1858_s2, 1024, %s1427_s22, [#allocation6], %s1326_s8, %s1326_s8, %s1327_s9  }
  0x2c   : > { %p27_p1 = scmp.eq.s32.totalorder %s26_s26, 0  ;;  %p36_p2 = scmp.ne.s32.totalorder %s1319_s14, %s1315_s13 }
  0x2d   : > { %p37_p4 = scmp.eq.s32.totalorder %s1323_s15, 0  ;;  %p1028_p6 = scmp.lt.s32.totalorder %s1323_s15, 2 }
  0x2e   : > { %s1473_s17 = scalar_select %p27_p1, %s1319_s14, %s29_s25  }
  0x2f   : > { %p38_p8 = por %p37_p4, %p36_p2  ;;  %p1868_p10 = scmp.eq.s32.totalorder %s1404_s16, 1 }
  0x30   : > { %s1482_s23 = sand.u32 1, %s1319_s14   ;;  %s970_s27 = sshll.u32 %s1323_s15, 7 }
  0x31   : > { %p1477_p12 = por %p1868_p10, %p36_p2  ;;  %s943_s28 = sshll.u32 %s1482_s23, 3 }
  0x32   : > { %s1870_s0 = sld [smem:[#allocation13_spill]]  ;;  %s156_s25 = scalar_lea.vmem [#allocation2], %s943_s28 }
  0x33   : > { %s163_s30 = sshll.u32 %s156_s25, 4  ;;  %p1491_p11 = pnand %p1028_p6, %p38_p8  ;;  %s1495_s30 = int_to_ptr.vmem [resolvable:$true] %s163_s30 }
  0x34   : > { %s173_s5 = sand.u32 1, %s1323_s15   ;;  %s153_s6 = scalar_lea.sflag [#allocation3], %s1482_s23 }
  0x35   : > { %p1191_p0 = pneg %p1491_p11 }
  0x38   : > { %s1489_s26 = scalar_lea.hbm %s1870_s0, %s970_s27  ;;  %s1194_s27 = scalar_lea.hbm %s1870_s0, 256 }
  0x39   : > { %s1189_s7 = scalar_lea.hbm %s1489_s26, 128  ;;  %p1195_p7 = scmp.lt.u32.totalorder %s1489_s26, %s1870_s0 }
  0x3a   : > { %p1190_p13 = scmp.ne.s32.totalorder %s1489_s26, %s1189_s7  ;;  %p1196_p9 = scmp.lt.u32.totalorder %s1194_s27, %s1189_s7 }
  0x3b   : > { %p1198_p2 = scmp.lt.u32.totalorder %s1189_s7, %s1489_s26 }
  0x3c   : > { %p1192_p3 = pnand %p1191_p0, %p1190_p13  ;;  %p1197_p1 = por %p1196_p9, %p1195_p7 }
  0x3e   : > { %p1193_p5 = pneg %p1192_p3  ;;  %p1199_p4 = por %p1198_p2, %p1197_p1 }
  0x40   : > { %p1200_p6 = pnand %p1199_p4, %p1193_p5 }
  0x42   : > { %1203 = shalt.err (!%p1200_p6)
}
  0x43   : > { %s1204_s29 = scalar_lea.vmem %s1495_s30, 128  ;;  %s1328_s25 = smov [#allocation2]  }
  0x44   : > { %p1205_p8 = scmp.ne.s32.totalorder %s1495_s30, %s1204_s29  ;;  %s1209_s10 = sshll.u32 %s1328_s25, 4  ;;  %s1210_s10 = int_to_ptr.vmem [resolvable:$false] %s1209_s10 }
  0x45   : > { %s1211_s11 = scalar_lea.vmem %s1210_s10, 256  ;;  %p1212_p3 = scmp.lt.s32.totalorder %s1495_s30, %s1210_s10 }
  0x46   : > { %p1207_p10 = pnand %p1205_p8, %p1191_p0  ;;  %p1213_p7 = scmp.lt.s32.totalorder %s1211_s11, %s1204_s29 }
  0x48   : > { %p1208_p13 = pneg %p1207_p10  ;;  %p1214_p9 = por %p1213_p7, %p1212_p3 }
  0x4a   : > { %p1215_p1 = pnand %p1214_p9, %p1208_p13 }
  0x4c   : > { %1218 = shalt.err (!%p1215_p1)
}
  0x4d   : > { %1019 = dma.hbm_to_vmem [thread:$0]  (!%p1491_p11), %s1489_s26, 128, %s1495_s30, %s153_s6, %s1326_s8, %s1326_s8, %s1327_s9  }
  0x4e   : > { %s946_s7 = sshll.u32 %s1482_s23, 4  ;;  %s971_s27 = sshll.u32 %s1323_s15, 8 }
  0x4f   : > { %s1534_s29 = scalar_lea.hbm %s1857_s1, %s971_s27  ;;  %s177_s25 = scalar_lea.vmem [#allocation5], %s946_s7 }
  0x50   : > { %s184_s10 = sshll.u32 %s177_s25, 4  ;;  %s1540_s11 = scalar_lea.sflag [#allocation6], %s173_s5  ;;  %s1536_s10 = int_to_ptr.vmem [resolvable:$true] %s184_s10 }
  0x51   : > { %s1219_s0 = scalar_lea.hbm %s1534_s29, 256  ;;  %s1224_s23 = scalar_lea.hbm %s1857_s1, 512 }
  0x52   : > { %p1220_p5 = scmp.ne.s32.totalorder %s1534_s29, %s1219_s0  ;;  %p1225_p6 = scmp.lt.u32.totalorder %s1534_s29, %s1857_s1 }
  0x53   : > { %p1226_p8 = scmp.lt.u32.totalorder %s1224_s23, %s1219_s0  ;;  %p1228_p13 = scmp.lt.u32.totalorder %s1219_s0, %s1534_s29 }
  0x54   : > { %p1222_p2 = pnand %p1220_p5, %p1191_p0 }
  0x55   : > { %p1227_p10 = por %p1226_p8, %p1225_p6 }
  0x56   : > { %p1223_p4 = pneg %p1222_p2 }
  0x57   : > { %p1229_p3 = por %p1228_p13, %p1227_p10 }
  0x59   : > { %p1230_p7 = pnand %p1229_p3, %p1223_p4 }
  0x5b   : > { %1233 = shalt.err (!%p1230_p7)
}
  0x5c   : > { %s1234_s5 = scalar_lea.vmem %s1536_s10, 256  ;;  %s1329_s6 = smov [#allocation5]  }
  0x5d   : > { %p1235_p9 = scmp.ne.s32.totalorder %s1536_s10, %s1234_s5  ;;  %s1239_s7 = sshll.u32 %s1329_s6, 4  ;;  %s1240_s7 = int_to_ptr.vmem [resolvable:$false] %s1239_s7 }
  0x5e   : > { %s1241_s27 = scalar_lea.vmem %s1240_s7, 512  ;;  %p1242_p2 = scmp.lt.s32.totalorder %s1536_s10, %s1240_s7 }
  0x5f   : > { %p1237_p1 = pnand %p1235_p9, %p1191_p0  ;;  %p1243_p6 = scmp.lt.s32.totalorder %s1241_s27, %s1234_s5 }
  0x61   : > { %p1238_p5 = pneg %p1237_p1  ;;  %p1244_p8 = por %p1243_p6, %p1242_p2 }
  0x63   : > { %p1245_p10 = pnand %p1244_p8, %p1238_p5 }
  0x65   : > { %1248 = shalt.err (!%p1245_p10)
}
  0x66   : > { %s1330_s0 = smov 128   ;;  %s1331_s28 = smov 8  }
  0x67   : > { %1022 = dma.hbm_to_vmem [thread:$0]  (!%p1491_p11), %s1534_s29, 256, %s1536_s10, %s1540_s11, %s1330_s0, %s1330_s0, %s1331_s28  }
  0x68   : > { %p1872_p0 = scmp.ne.s32.totalorder %s1866_s20, 0 }
  0x69   : > { %s1569_s22 = sand.u32 (!%p1872_p0), 1, %s1315_s13   ;;  %p1873_p4 = scmp.ne.s32.totalorder (!%p1872_p0), %s1864_s18, 0 }
  0x6a   : > { %196 = sbr.rel (%p1872_p0) target bundleno = 3042 (0xbe2), region = 32  ;;  %s950_s25 = sshll.u32 (!%p1872_p0), %s1569_s22, 3 }
  0x6b   : > { %s199_s8 = scalar_lea.sflag (!%p1872_p0), [#allocation3], %s1569_s22  ;;  %s1573_s9 = scalar_lea.vmem (!%p1872_p0), [#allocation2], %s950_s25 }
  0x71   : > { %1294 = dma.done.wait (%p1873_p4), %s199_s8, 128  }
  0x72   : > { %1296 = vsyncadd (%p1873_p4), %s199_s8, 4294967168  ;;  %s207_s20 = sand.u32 1, %s1404_s16   ;;  %s951_s4 = sshll.u32 %s1569_s22, 4 }
  0x73   : > { %s208_s29 = scalar_lea.sflag [#allocation6], %s207_s20  ;;  %s211_s10 = scalar_lea.vmem [#allocation5], %s951_s4 }
  0x74   : > { %1298 = dma.done.wait (%p1873_p4), %s208_s29, 256  }
  0x75   : > { %1300 = vsyncadd (%p1873_p4), %s208_s29, 4294967040  ;;  %p1874_p11 = scmp.eq.s32.totalorder %s1404_s16, 0 }
  0x77   : > { %1302 = dma.done.wait (%p1874_p11), [#allocation6], 1024   ;;  %p1875_p13 = pmov %p1874_p11 }
  0x78   : > { %v1332_v0 = vmov 0.0   ;;  %vm1333_vm0 = vmmov 0   ;;  %v1334_v1 = vmov 0   ;;  %v1335_v2 = vmov 1   ;;  %v1144_v3 = vld [vmem:[#allocation7] sm:$0xff]   ;;  %v1145_v4 = vld [vmem:[#allocation7 + $0x8] sm:$0xff]  }
  0x79   : > { %1304 = vsyncadd (%p1875_p13), [#allocation6], 4294966272  ;;  %982 = vmatprep.subr.bf16.mxu0 %v1332_v0  ;;  %998 = vmatprep.mubr.msk.bf16.mxu0 %vm1333_vm0, %v1332_v0  ;;  %v1146_v5 = vld [vmem:[#allocation7 + $0x10] sm:$0xff]   ;;  %v1593_v7 = vld [vmem:[%s211_s10 + $0x8] sm:$0xff]  ;;  %v1336_v10 = vmov 2   ;;  %v1337_v12 = vmov 3   ;;  %v362_v23 = vlaneseq }
  0x7a   : > { %1098 = vset.pattern.permute.xlu0 %v1334_v1  ;;  %1100 = vset.pattern.permute.xlu1 %v1335_v2  ;;  %v1591_v6 = vld [vmem:[%s211_s10] sm:$0xff]  ;;  %v1147_v8 = vld [vmem:[#allocation7 + $0x18] sm:$0xff]   ;;  %v1149_v11 = vld [vmem:[#allocation7 + $0x28] sm:$0xff]   ;;  %v1338_v14 = vmov 4   ;;  %v1339_v17 = vmov 5   ;;  %v1340_v18 = vmov 6  }
  0x7b   : > { %983 = vmatpush3.bf16.msra.mxu0 %v1144_v3  ;;  %365 = vperm.xlu0 %1098, %v1591_v6   ;;  %v1148_v9 = vld [vmem:[#allocation7 + $0x20] sm:$0xff]   ;;  %v1150_v13 = vld [vmem:[#allocation7 + $0x30] sm:$0xff]   ;;  %v1151_v15 = vld [vmem:[#allocation7 + $0x38] sm:$0xff]   ;;  %v1608_v26 = vand.u32 127, %v362_v23  ;;  %v1341_v49 = vmov 7   ;;  %v1343_v23 = vmov 9  }
  0x7c   : > { %984 = vmatprep.subr.bf16.mxu0 %v1332_v0  ;;  %385 = vperm.xlu1 %1100, %v1593_v7   ;;  %v1152_v16 = vld [vmem:[%s1573_s9] sm:$0xff]   ;;  %s972_s18 = sshll.u32 %s1404_s16, 8  ;;  %s242_s11 = scalar_lea.vmem [#allocation8], %s951_s4 }
  0x7d   : > { %vm378_vm13 = vcmp.eq.s32.totalorder %v1608_v26, 0  ;;  %vm395_vm14 = vcmp.eq.s32.totalorder %v1608_v26, 1  ;;  %vm412_vm15 = vcmp.eq.s32.totalorder %v1608_v26, 2  ;;  %vm429_vm0 = vcmp.eq.s32.totalorder %v1608_v26, 3  ;;  %s834_s23 = sshll.u32 %s242_s11, 4  ;;  %s1810_s5 = scalar_lea.hbm %s1859_s3, %s972_s18  ;;  %s1812_s23 = int_to_ptr.vmem [resolvable:$true] %s834_s23 }
  0x7e   : > { %s821_s6 = scalar_lea.sflag [#allocation4], %s1569_s22  ;;  %s1249_s7 = scalar_lea.vmem %s1812_s23, 256 }
  0x7f   : > { %985 = vmatpush3.bf16.msra.mxu0 %v1145_v4  ;;  %368 = vperm.xlu0 %1098, %v1593_v7   ;;  %p1250_p3 = scmp.ne.s32.totalorder %s1812_s23, %s1249_s7  ;;  %s1360_s16 = smov [#allocation8]  }
  0x80   : > { %986 = vmatprep.subr.bf16.mxu0 %v1332_v0  ;;  %1102 = vset.pattern.permute.xlu1 %v1336_v10  ;;  %s1253_s27 = sshll.u32 %s1360_s16, 4  ;;  %s1254_s27 = int_to_ptr.vmem [resolvable:$false] %s1253_s27 }
  0x81   : > { %402 = vperm.xlu1 %1102, %v1593_v7   ;;  %p1251_p7 = pnand %p1250_p3, %p1477_p12  ;;  %s1255_s0 = scalar_lea.vmem %s1254_s27, 512 }
  0x82   : > { %p1256_p1 = scmp.lt.s32.totalorder %s1812_s23, %s1254_s27  ;;  %p1257_p5 = scmp.lt.s32.totalorder %s1255_s0, %s1249_s7 }
  0x83   : > { %987 = vmatpush3.bf16.msra.mxu0 %v1146_v5  ;;  %1099 = vset.pattern.permute.xlu0 %v1335_v2  ;;  %p1252_p9 = pneg %p1251_p7 }
  0x84   : > { %988 = vmatprep.subr.bf16.mxu0 %v1332_v0  ;;  %382 = vperm.xlu0 %1099, %v1591_v6   ;;  %p1258_p2 = por %p1257_p5, %p1256_p1 }
  0x85   : > { %1103 = vset.pattern.permute.xlu1 %v1337_v12 }
  0x86   : > { %416 = vperm.xlu1 %1103, %v1591_v6   ;;  %p1259_p6 = pnand %p1258_p2, %p1252_p9 }
  0x87   : > { %989 = vmatpush3.bf16.msra.mxu0 %v1147_v8 }
  0x88   : > { %990 = vmatprep.subr.bf16.mxu0 %v1332_v0  ;;  %1101 = vset.pattern.permute.xlu0 %v1336_v10 }
  0x89   : > { %399 = vperm.xlu0 %1101, %v1591_v6  }
  0x8a   : > { %1105 = vset.pattern.permute.xlu1 %v1338_v14 }
  0x8b   : > { %991 = vmatpush3.bf16.msra.mxu0 %v1148_v9  ;;  %433 = vperm.xlu1 %1105, %v1591_v6  }
  0x8c   : > { %992 = vmatprep.subr.bf16.mxu0 %v1332_v0 }
  0x8d   : > { %1104 = vset.pattern.permute.xlu0 %v1337_v12 }
  0x8e   : > { %419 = vperm.xlu0 %1104, %v1593_v7  }
  0x8f   : > { %993 = vmatpush3.bf16.msra.mxu0 %v1149_v11  ;;  %436 = vperm.xlu1 %1105, %v1593_v7  }
  0x90   : > { %994 = vmatprep.subr.bf16.mxu0 %v1332_v0 }
  0x92   : > { %1106 = vset.pattern.permute.xlu0 %v1339_v17 }
  0x93   : > { %995 = vmatpush3.bf16.msra.mxu0 %v1150_v13  ;;  %450 = vperm.xlu0 %1106, %v1591_v6  }
  0x94   : > { %996 = vmatprep.subr.bf16.mxu0 %v1332_v0  ;;  %1107 = vset.pattern.permute.xlu1 %v1339_v17 }
  0x95   : > { %453 = vperm.xlu1 %1107, %v1593_v7  }
  0x97   : > { %997 = vmatpush3.bf16.msra.mxu0 %v1151_v15  ;;  %1108 = vset.pattern.permute.xlu0 %v1340_v18 }
  0x99   : > { %1109 = vset.pattern.permute.xlu1 %v1340_v18 }
  0x9a   : > { %999 = vmatmul.mubr.bf16.vlgmr.msra.gmra.mrb[0].mxu0 %v1152_v16  ;;  %v1342_v16 = vmov 8  }
  0xfa   : > { %v366_v19 = vpop.permute.xlu0 %365 }
  0xfb   : > { %v386_v20 = vpop.permute.xlu1 %385  ;;  %vm370_vm1 = vcmp.eq.s32.totalorder %v1608_v26, %v366_v19 }
  0xfc   : > { %vm388_vm11 = vcmp.eq.s32.totalorder %v1608_v26, %v386_v20 }
  0xfe   : > { %v369_v21 = vpop.permute.xlu0 %368 }
  0xff   : > { %vm371_vm10 = vcmp.eq.s32.totalorder %v1608_v26, %v369_v21 }
 0x100   : > { %v403_v22 = vpop.permute.xlu1 %402 }
 0x101   : > { %vm405_vm4 = vcmp.eq.s32.totalorder %v1608_v26, %v403_v22 }
 0x103   : > { %v383_v24 = vpop.permute.xlu0 %382 }
 0x104   : > { %vm387_vm2 = vcmp.eq.s32.totalorder %v1608_v26, %v383_v24 }
 0x105   : > { %v417_v25 = vpop.permute.xlu1 %416 }
 0x106   : > { %vm421_vm6 = vcmp.eq.s32.totalorder %v1608_v26, %v417_v25 }
 0x108   : > { %v400_v27 = vpop.permute.xlu0 %399 }
 0x109   : > { %vm404_vm3 = vcmp.eq.s32.totalorder %v1608_v26, %v400_v27 }
 0x10a   : > { %v434_v28 = vpop.permute.xlu1 %433 }
 0x10b   : > { %vm438_vm7 = vcmp.eq.s32.totalorder %v1608_v26, %v434_v28 }
 0x10d   : > { %v420_v35 = vpop.permute.xlu0 %419 }
 0x10e   : > { %v437_v36 = vpop.permute.xlu1 %436  ;;  %vm422_vm5 = vcmp.eq.s32.totalorder %v1608_v26, %v420_v35 }
 0x10f   : > { %vm439_vm8 = vcmp.eq.s32.totalorder %v1608_v26, %v437_v36 }
 0x112   : > { %v451_v46 = vpop.permute.xlu0 %450 }
 0x113   : > { %vm455_vm12 = vcmp.eq.s32.totalorder %v1608_v26, %v451_v46  ;;  %v1345_v46 = vmov 11  }
 0x114   : > { %v454_v41 = vpop.permute.xlu1 %453 }
 0x115   : > { %vm456_vm9 = vcmp.eq.s32.totalorder %v1608_v26, %v454_v41 }
 0x16d   : > { %v1612_v29 = vpop.f32.mrb[0].mxu0 }
 0x16e   : > { %v1000_v30 = vpop.f32.mrb[1].mxu0  ;;  %v389_v31 = vsel %vm387_vm2, %v1612_v29, 0.0  ;;  %v372_v32 = vsel %vm370_vm1, %v1612_v29, 0.0  ;;  %v406_v37 = vsel %vm404_vm3, %v1612_v29, 0.0  ;;  %v423_v39 = vsel %vm421_vm6, %v1612_v29, 0.0 }
 0x16f   : > { %391 = vadd.xlane.f32.xlu0 %v389_v31  ;;  %374 = vadd.xlane.f32.xlu1 %v372_v32  ;;  %v1617_v33 = vpop.f32.mrb[2].mxu0  ;;  %v440_v42 = vsel %vm438_vm7, %v1612_v29, 0.0  ;;  %v457_v48 = vsel %vm455_vm12, %v1612_v29, 0.0  ;;  %vm446_vm1 = vcmp.eq.s32.totalorder %v1608_v26, 4  ;;  %vm463_vm2 = vcmp.eq.s32.totalorder %v1608_v26, 5 }
 0x170   : > { %v1001_v34 = vpop.f32.mrb[3].mxu0  ;;  %v407_v38 = vsel %vm405_vm4, %v1617_v33, 0.0  ;;  %v424_v40 = vsel %vm422_vm5, %v1617_v33, 0.0  ;;  %v441_v43 = vsel %vm439_vm8, %v1617_v33, 0.0  ;;  %v458_v44 = vsel %vm456_vm9, %v1617_v33, 0.0 }
 0x171   : > { %v373_v45 = vsel %vm371_vm10, %v1617_v33, 0.0  ;;  %v390_v47 = vsel %vm388_vm11, %v1617_v33, 0.0  ;;  %vm480_vm5 = vcmp.eq.s32.totalorder %v1608_v26, 6  ;;  %vm497_vm8 = vcmp.eq.s32.totalorder %v1608_v26, 7 }
 0x172   : > { %vm514_vm11 = vcmp.eq.s32.totalorder %v1608_v26, 8 }
 0x173   : > { %408 = vadd.xlane.f32.xlu1 %v406_v37  ;;  %410 = vadd.xlane.f32.xlu0 %v407_v38  ;;  %v1344_v37 = vmov 10  }
 0x177   : > { %425 = vadd.xlane.f32.xlu1 %v423_v39  ;;  %427 = vadd.xlane.f32.xlu0 %v424_v40 }
 0x17b   : > { %442 = vadd.xlane.f32.xlu1 %v440_v42  ;;  %444 = vadd.xlane.f32.xlu0 %v441_v43 }
 0x17f   : > { %461 = vadd.xlane.f32.xlu0 %v458_v44  ;;  %376 = vadd.xlane.f32.xlu1 %v373_v45 }
 0x183   : > { %393 = vadd.xlane.f32.xlu1 %v390_v47  ;;  %v1346_v47 = vmov 12  }
 0x187   : > { %459 = vadd.xlane.f32.xlu1 %v457_v48 }
 0x195   : > { %467 = vperm.xlu0 %1108, %v1591_v6  }
 0x198   : > { %470 = vperm.xlu1 %1109, %v1593_v7  }
 0x199   : > { %1111 = vset.pattern.permute.xlu0 %v1342_v16 }
 0x19c   : > { %1110 = vset.pattern.permute.xlu1 %v1341_v49 }
 0x1fc   : > { %v392_v50 = vpop.xlane.xlu0 %391  ;;  %v375_v51 = vpop.xlane.xlu1 %374 }
 0x1fd   : > { %v379_v59 = vsel %vm378_vm13, %v375_v51, 0.0 }
 0x1fe   : > { %v396_v63 = vsel %vm395_vm14, %v392_v50, %v379_v59 }
 0x200   : > { %v409_v52 = vpop.xlane.xlu1 %408  ;;  %v411_v53 = vpop.xlane.xlu0 %410 }
 0x201   : > { %v413_v1 = vsel %vm412_vm15, %v409_v52, %v396_v63 }
 0x204   : > { %v426_v54 = vpop.xlane.xlu1 %425  ;;  %v428_v55 = vpop.xlane.xlu0 %427 }
 0x205   : > { %v430_v4 = vsel %vm429_vm0, %v426_v54, %v413_v1 }
 0x208   : > { %v443_v56 = vpop.xlane.xlu1 %442  ;;  %v445_v57 = vpop.xlane.xlu0 %444 }
 0x209   : > { %v447_v8 = vsel %vm446_vm1, %v443_v56, %v430_v4 }
 0x20c   : > { %v377_v58 = vpop.xlane.xlu1 %376  ;;  %v462_v60 = vpop.xlane.xlu0 %461 }
 0x20d   : > { %v380_v61 = vsel %vm378_vm13, %v377_v58, 0.0  ;;  %v1347_v58 = vmov 13  }
 0x210   : > { %v394_v62 = vpop.xlane.xlu1 %393 }
 0x211   : > { %v397_v0 = vsel %vm395_vm14, %v394_v62, %v380_v61  ;;  %vm531_vm14 = vcmp.eq.s32.totalorder %v1608_v26, 9 }
 0x212   : > { %v414_v2 = vsel %vm412_vm15, %v411_v53, %v397_v0 }
 0x213   : > { %v431_v3 = vsel %vm429_vm0, %v428_v55, %v414_v2 }
 0x214   : > { %v468_v5 = vpop.permute.xlu0 %467  ;;  %v460_v9 = vpop.xlane.xlu1 %459  ;;  %v448_v10 = vsel %vm446_vm1, %v445_v57, %v431_v3 }
 0x215   : > { %vm472_vm3 = vcmp.eq.s32.totalorder %v1608_v26, %v468_v5  ;;  %v464_v11 = vsel %vm463_vm2, %v460_v9, %v447_v8  ;;  %v465_v12 = vsel %vm463_vm2, %v462_v60, %v448_v10  ;;  %vm548_vm2 = vcmp.eq.s32.totalorder %v1608_v26, 10 }
 0x216   : > { %v474_v13 = vsel %vm472_vm3, %v1612_v29, 0.0  ;;  %vm565_vm3 = vcmp.eq.s32.totalorder %v1608_v26, 11  ;;  %v1348_v5 = vmov 14  }
 0x217   : > { %476 = vadd.xlane.f32.xlu1 %v474_v13 }
 0x218   : > { %v471_v14 = vpop.permute.xlu1 %470 }
 0x219   : > { %vm473_vm4 = vcmp.eq.s32.totalorder %v1608_v26, %v471_v14 }
 0x21a   : > { %v475_v15 = vsel %vm473_vm4, %v1617_v33, 0.0 }
 0x21b   : > { %478 = vadd.xlane.f32.xlu0 %v475_v15 }
 0x228   : > { %484 = vperm.xlu1 %1110, %v1591_v6  }
 0x22c   : > { %487 = vperm.xlu1 %1110, %v1593_v7  }
 0x230   : > { %1112 = vset.pattern.permute.xlu1 %v1342_v16  ;;  %v1349_v16 = vmov 15  }
 0x2a4   : > { %v477_v17 = vpop.xlane.xlu1 %476 }
 0x2a5   : > { %v481_v18 = vsel %vm480_vm5, %v477_v17, %v464_v11 }
 0x2a8   : > { %v485_v19 = vpop.permute.xlu1 %484  ;;  %v479_v24 = vpop.xlane.xlu0 %478 }
 0x2a9   : > { %vm489_vm6 = vcmp.eq.s32.totalorder %v1608_v26, %v485_v19  ;;  %v482_v28 = vsel %vm480_vm5, %v479_v24, %v465_v12 }
 0x2aa   : > { %v491_v20 = vsel %vm489_vm6, %v1612_v29, 0.0 }
 0x2ab   : > { %493 = vadd.xlane.f32.xlu0 %v491_v20 }
 0x2ac   : > { %v488_v21 = vpop.permute.xlu1 %487 }
 0x2ad   : > { %vm490_vm7 = vcmp.eq.s32.totalorder %v1608_v26, %v488_v21 }
 0x2ae   : > { %v492_v22 = vsel %vm490_vm7, %v1617_v33, 0.0  ;;  %vm582_vm7 = vcmp.eq.s32.totalorder %v1608_v26, 12 }
 0x2af   : > { %495 = vadd.xlane.f32.xlu1 %v492_v22 }
 0x2c0   : > { %504 = vperm.xlu1 %1112, %v1593_v7  }
 0x2c1   : > { %501 = vperm.xlu0 %1111, %v1591_v6  }
 0x2c4   : > { %1114 = vset.pattern.permute.xlu1 %v1343_v23 }
 0x2c5   : > { %1113 = vset.pattern.permute.xlu0 %v1343_v23 }
 0x338   : > { %v494_v25 = vpop.xlane.xlu0 %493 }
 0x339   : > { %v498_v27 = vsel %vm497_vm8, %v494_v25, %v481_v18 }
 0x33c   : > { %v496_v30 = vpop.xlane.xlu1 %495 }
 0x33d   : > { %v499_v31 = vsel %vm497_vm8, %v496_v30, %v482_v28  ;;  %v1350_v28 = vmov 16  }
 0x340   : > { %v502_v32 = vpop.permute.xlu0 %501  ;;  %v505_v34 = vpop.permute.xlu1 %504 }
 0x341   : > { %vm506_vm9 = vcmp.eq.s32.totalorder %v1608_v26, %v502_v32  ;;  %vm507_vm10 = vcmp.eq.s32.totalorder %v1608_v26, %v505_v34 }
 0x342   : > { %v508_v35 = vsel %vm506_vm9, %v1612_v29, 0.0  ;;  %v509_v36 = vsel %vm507_vm10, %v1617_v33, 0.0  ;;  %vm599_vm10 = vcmp.eq.s32.totalorder %v1608_v26, 13 }
 0x343   : > { %510 = vadd.xlane.f32.xlu0 %v508_v35  ;;  %512 = vadd.xlane.f32.xlu1 %v509_v36 }
 0x354   : > { %521 = vperm.xlu1 %1114, %v1593_v7  }
 0x358   : > { %1115 = vset.pattern.permute.xlu1 %v1344_v37 }
 0x359   : > { %518 = vperm.xlu0 %1113, %v1591_v6  }
 0x35d   : > { %1116 = vset.pattern.permute.xlu0 %v1344_v37 }
 0x3d0   : > { %v511_v38 = vpop.xlane.xlu0 %510  ;;  %v513_v39 = vpop.xlane.xlu1 %512 }
 0x3d1   : > { %v515_v40 = vsel %vm514_vm11, %v511_v38, %v498_v27  ;;  %v516_v41 = vsel %vm514_vm11, %v513_v39, %v499_v31 }
 0x3d4   : > { %v522_v42 = vpop.permute.xlu1 %521 }
 0x3d5   : > { %vm524_vm12 = vcmp.eq.s32.totalorder %v1608_v26, %v522_v42 }
 0x3d6   : > { %v526_v43 = vsel %vm524_vm12, %v1617_v33, 0.0 }
 0x3d7   : > { %529 = vadd.xlane.f32.xlu0 %v526_v43 }
 0x3d8   : > { %v519_v44 = vpop.permute.xlu0 %518 }
 0x3d9   : > { %vm523_vm13 = vcmp.eq.s32.totalorder %v1608_v26, %v519_v44 }
 0x3da   : > { %v525_v45 = vsel %vm523_vm13, %v1612_v29, 0.0  ;;  %vm616_vm13 = vcmp.eq.s32.totalorder %v1608_v26, 14 }
 0x3db   : > { %527 = vadd.xlane.f32.xlu1 %v525_v45 }
 0x3ec   : > { %535 = vperm.xlu1 %1115, %v1591_v6  }
 0x3ed   : > { %538 = vperm.xlu0 %1116, %v1593_v7  }
 0x3f0   : > { %1118 = vset.pattern.permute.xlu1 %v1345_v46 }
 0x3f1   : > { %1117 = vset.pattern.permute.xlu0 %v1345_v46 }
 0x3f2   : > { %552 = vperm.xlu0 %1117, %v1591_v6  }
 0x3f6   : > { %1119 = vset.pattern.permute.xlu0 %v1346_v47 }
 0x464   : > { %v530_v48 = vpop.xlane.xlu0 %529 }
 0x465   : > { %v533_v49 = vsel %vm531_vm14, %v530_v48, %v516_v41  ;;  %v1351_v41 = vmov 17  }
 0x468   : > { %v528_v50 = vpop.xlane.xlu1 %527 }
 0x469   : > { %v532_v51 = vsel %vm531_vm14, %v528_v50, %v515_v40  ;;  %v1352_v50 = vmov 18  }
 0x46c   : > { %v539_v52 = vpop.permute.xlu0 %538  ;;  %v536_v53 = vpop.permute.xlu1 %535 }
 0x46d   : > { %vm540_vm15 = vcmp.eq.s32.totalorder %v1608_v26, %v536_v53  ;;  %vm541_vm0 = vcmp.eq.s32.totalorder %v1608_v26, %v539_v52 }
 0x46e   : > { %v542_v54 = vsel %vm540_vm15, %v1612_v29, 0.0  ;;  %v543_v56 = vsel %vm541_vm0, %v1617_v33, 0.0  ;;  %vm633_vm0 = vcmp.eq.s32.totalorder %v1608_v26, 15 }
 0x46f   : > { %544 = vadd.xlane.f32.xlu1 %v542_v54 }
 0x471   : > { %v553_v55 = vpop.permute.xlu0 %552 }
 0x472   : > { %vm557_vm1 = vcmp.eq.s32.totalorder %v1608_v26, %v553_v55 }
 0x473   : > { %546 = vadd.xlane.f32.xlu1 %v543_v56  ;;  %v559_v57 = vsel %vm557_vm1, %v1612_v29, 0.0 }
 0x474   : > { %561 = vadd.xlane.f32.xlu0 %v559_v57  ;;  %v1353_v57 = vmov 19  }
 0x484   : > { %555 = vperm.xlu1 %1118, %v1593_v7  }
 0x488   : > { %1120 = vset.pattern.permute.xlu1 %v1346_v47 }
 0x48a   : > { %569 = vperm.xlu0 %1119, %v1591_v6  }
 0x48e   : > { %1122 = vset.pattern.permute.xlu0 %v1347_v58 }
 0x4fc   : > { %v545_v59 = vpop.xlane.xlu1 %544 }
 0x4fd   : > { %v549_v60 = vsel %vm548_vm2, %v545_v59, %v532_v51 }
 0x500   : > { %v547_v61 = vpop.xlane.xlu1 %546 }
 0x501   : > { %v550_v62 = vsel %vm548_vm2, %v547_v61, %v533_v49  ;;  %v562_v63 = vpop.xlane.xlu0 %561 }
 0x502   : > { %v566_v0 = vsel %vm565_vm3, %v562_v63, %v549_v60 }
 0x504   : > { %v556_v1 = vpop.permute.xlu1 %555 }
 0x505   : > { %vm558_vm4 = vcmp.eq.s32.totalorder %v1608_v26, %v556_v1 }
 0x506   : > { %v560_v2 = vsel %vm558_vm4, %v1617_v33, 0.0 }
 0x507   : > { %563 = vadd.xlane.f32.xlu1 %v560_v2 }
 0x509   : > { %v570_v3 = vpop.permute.xlu0 %569 }
 0x50a   : > { %vm574_vm5 = vcmp.eq.s32.totalorder %v1608_v26, %v570_v3 }
 0x50b   : > { %v576_v4 = vsel %vm574_vm5, %v1612_v29, 0.0 }
 0x518   : > { %572 = vperm.xlu1 %1120, %v1593_v7  }
 0x51c   : > { %1121 = vset.pattern.permute.xlu1 %v1347_v58 }
 0x53c   : > { %578 = vadd.xlane.f32.xlu1 %v576_v4  ;;  %v1354_v4 = vmov 20  }
 0x54d   : > { %586 = vperm.xlu1 %1121, %v1591_v6  }
 0x551   : > { %1123 = vset.pattern.permute.xlu1 %v1348_v5 }
 0x594   : > { %v564_v8 = vpop.xlane.xlu1 %563 }
 0x595   : > { %v567_v9 = vsel %vm565_vm3, %v564_v8, %v550_v62  ;;  %vm650_vm3 = vcmp.eq.s32.totalorder %v1608_v26, 16 }
 0x598   : > { %v573_v10 = vpop.permute.xlu1 %572 }
 0x599   : > { %vm575_vm6 = vcmp.eq.s32.totalorder %v1608_v26, %v573_v10 }
 0x59a   : > { %v577_v11 = vsel %vm575_vm6, %v1617_v33, 0.0  ;;  %vm667_vm6 = vcmp.eq.s32.totalorder %v1608_v26, 17 }
 0x59b   : > { %580 = vadd.xlane.f32.xlu0 %v577_v11 }
 0x5b1   : > { %589 = vperm.xlu0 %1122, %v1593_v7  }
 0x5b5   : > { %1124 = vset.pattern.permute.xlu0 %v1349_v16 }
 0x5c9   : > { %v579_v12 = vpop.xlane.xlu1 %578 }
 0x5ca   : > { %v583_v13 = vsel %vm582_vm7, %v579_v12, %v566_v0 }
 0x5cd   : > { %v587_v14 = vpop.permute.xlu1 %586 }
 0x5ce   : > { %vm591_vm8 = vcmp.eq.s32.totalorder %v1608_v26, %v587_v14 }
 0x5cf   : > { %v593_v15 = vsel %vm591_vm8, %v1612_v29, 0.0 }
 0x5d0   : > { %595 = vadd.xlane.f32.xlu1 %v593_v15  ;;  %v1355_v15 = vmov 21  }
 0x5e1   : > { %603 = vperm.xlu1 %1123, %v1591_v6  }
 0x5e5   : > { %606 = vperm.xlu1 %1123, %v1593_v7  }
 0x5e9   : > { %1125 = vset.pattern.permute.xlu1 %v1349_v16  ;;  %v1356_v16 = vmov 22  }
 0x628   : > { %v581_v17 = vpop.xlane.xlu0 %580 }
 0x629   : > { %v584_v18 = vsel %vm582_vm7, %v581_v17, %v567_v9 }
 0x630   : > { %v590_v19 = vpop.permute.xlu0 %589 }
 0x631   : > { %vm592_vm9 = vcmp.eq.s32.totalorder %v1608_v26, %v590_v19 }
 0x632   : > { %v594_v20 = vsel %vm592_vm9, %v1617_v33, 0.0  ;;  %vm684_vm9 = vcmp.eq.s32.totalorder %v1608_v26, 18 }
 0x633   : > { %597 = vadd.xlane.f32.xlu0 %v594_v20 }
 0x65d   : > { %v596_v21 = vpop.xlane.xlu1 %595 }
 0x65e   : > { %v600_v22 = vsel %vm599_vm10, %v596_v21, %v583_v13 }
 0x661   : > { %v604_v23 = vpop.permute.xlu1 %603 }
 0x662   : > { %vm608_vm11 = vcmp.eq.s32.totalorder %v1608_v26, %v604_v23 }
 0x663   : > { %v610_v24 = vsel %vm608_vm11, %v1612_v29, 0.0 }
 0x664   : > { %612 = vadd.xlane.f32.xlu1 %v610_v24 }
 0x665   : > { %v607_v25 = vpop.permute.xlu1 %606 }
 0x666   : > { %vm609_vm12 = vcmp.eq.s32.totalorder %v1608_v26, %v607_v25 }
 0x667   : > { %v611_v27 = vsel %vm609_vm12, %v1617_v33, 0.0  ;;  %vm701_vm12 = vcmp.eq.s32.totalorder %v1608_v26, 19 }
 0x668   : > { %614 = vadd.xlane.f32.xlu0 %v611_v27 }
 0x675   : > { %623 = vperm.xlu1 %1125, %v1593_v7  }
 0x679   : > { %1127 = vset.pattern.permute.xlu1 %v1350_v28 }
 0x67e   : > { %620 = vperm.xlu0 %1124, %v1591_v6  }
 0x682   : > { %1126 = vset.pattern.permute.xlu0 %v1350_v28  ;;  %v1357_v28 = vmov 24  }
 0x6c0   : > { %v598_v30 = vpop.xlane.xlu0 %597 }
 0x6c1   : > { %v601_v31 = vsel %vm599_vm10, %v598_v30, %v584_v18  ;;  %v1358_v30 = vmov 25  }
 0x6f1   : > { %v613_v32 = vpop.xlane.xlu1 %612 }
 0x6f2   : > { %v617_v34 = vsel %vm616_vm13, %v613_v32, %v600_v22 }
 0x6f5   : > { %v615_v35 = vpop.xlane.xlu0 %614  ;;  %v624_v36 = vpop.permute.xlu1 %623 }
 0x6f6   : > { %v618_v37 = vsel %vm616_vm13, %v615_v35, %v601_v31  ;;  %vm626_vm14 = vcmp.eq.s32.totalorder %v1608_v26, %v624_v36 }
 0x6f7   : > { %v628_v38 = vsel %vm626_vm14, %v1617_v33, 0.0 }
 0x6f8   : > { %631 = vadd.xlane.f32.xlu0 %v628_v38 }
 0x6fd   : > { %v621_v39 = vpop.permute.xlu0 %620 }
 0x6fe   : > { %vm625_vm15 = vcmp.eq.s32.totalorder %v1608_v26, %v621_v39 }
 0x6ff   : > { %v627_v40 = vsel %vm625_vm15, %v1612_v29, 0.0 }
 0x700   : > { %629 = vadd.xlane.f32.xlu1 %v627_v40 }
 0x70e   : > { %637 = vperm.xlu0 %1126, %v1591_v6  }
 0x711   : > { %640 = vperm.xlu1 %1127, %v1593_v7  }
 0x712   : > { %1129 = vset.pattern.permute.xlu0 %v1352_v50 }
 0x715   : > { %1128 = vset.pattern.permute.xlu1 %v1351_v41 }
 0x785   : > { %v632_v42 = vpop.xlane.xlu0 %631 }
 0x786   : > { %v635_v43 = vsel %vm633_vm0, %v632_v42, %v618_v37  ;;  %v1359_v42 = vmov 23  }
 0x78d   : > { %v638_v44 = vpop.permute.xlu0 %637  ;;  %v630_v45 = vpop.xlane.xlu1 %629 }
 0x78e   : > { %vm642_vm1 = vcmp.eq.s32.totalorder %v1608_v26, %v638_v44  ;;  %v634_v46 = vsel %vm633_vm0, %v630_v45, %v617_v34  ;;  %vm718_vm0 = vcmp.eq.s32.totalorder %v1608_v26, 20 }
 0x78f   : > { %v644_v47 = vsel %vm642_vm1, %v1612_v29, 0.0  ;;  %vm735_vm1 = vcmp.eq.s32.totalorder %v1608_v26, 21 }
 0x790   : > { %646 = vadd.xlane.f32.xlu1 %v644_v47 }
 0x791   : > { %v641_v48 = vpop.permute.xlu1 %640 }
 0x792   : > { %vm643_vm2 = vcmp.eq.s32.totalorder %v1608_v26, %v641_v48 }
 0x793   : > { %v645_v49 = vsel %vm643_vm2, %v1617_v33, 0.0 }
 0x794   : > { %648 = vadd.xlane.f32.xlu0 %v645_v49 }
 0x7a1   : > { %654 = vperm.xlu1 %1128, %v1591_v6  }
 0x7a5   : > { %657 = vperm.xlu1 %1128, %v1593_v7  }
 0x7a9   : > { %1130 = vset.pattern.permute.xlu1 %v1352_v50 }
 0x81d   : > { %v647_v51 = vpop.xlane.xlu1 %646 }
 0x81e   : > { %v651_v52 = vsel %vm650_vm3, %v647_v51, %v634_v46 }
 0x821   : > { %v655_v53 = vpop.permute.xlu1 %654  ;;  %v649_v58 = vpop.xlane.xlu0 %648 }
 0x822   : > { %vm659_vm4 = vcmp.eq.s32.totalorder %v1608_v26, %v655_v53  ;;  %v652_v61 = vsel %vm650_vm3, %v649_v58, %v635_v43 }
 0x823   : > { %v661_v54 = vsel %vm659_vm4, %v1612_v29, 0.0 }
 0x824   : > { %663 = vadd.xlane.f32.xlu0 %v661_v54 }
 0x825   : > { %v658_v55 = vpop.permute.xlu1 %657 }
 0x826   : > { %vm660_vm5 = vcmp.eq.s32.totalorder %v1608_v26, %v658_v55 }
 0x827   : > { %v662_v56 = vsel %vm660_vm5, %v1617_v33, 0.0 }
 0x828   : > { %665 = vadd.xlane.f32.xlu1 %v662_v56 }
 0x839   : > { %674 = vperm.xlu1 %1130, %v1593_v7  }
 0x83a   : > { %671 = vperm.xlu0 %1129, %v1591_v6  }
 0x83d   : > { %1132 = vset.pattern.permute.xlu1 %v1353_v57 }
 0x83e   : > { %1131 = vset.pattern.permute.xlu0 %v1353_v57 }
 0x8b1   : > { %v664_v59 = vpop.xlane.xlu0 %663 }
 0x8b2   : > { %v668_v60 = vsel %vm667_vm6, %v664_v59, %v651_v52 }
 0x8b5   : > { %v666_v62 = vpop.xlane.xlu1 %665 }
 0x8b6   : > { %v669_v63 = vsel %vm667_vm6, %v666_v62, %v652_v61 }
 0x8b9   : > { %v672_v0 = vpop.permute.xlu0 %671  ;;  %v675_v1 = vpop.permute.xlu1 %674 }
 0x8ba   : > { %vm676_vm7 = vcmp.eq.s32.totalorder %v1608_v26, %v672_v0  ;;  %vm677_vm8 = vcmp.eq.s32.totalorder %v1608_v26, %v675_v1 }
 0x8bb   : > { %v678_v2 = vsel %vm676_vm7, %v1612_v29, 0.0  ;;  %v679_v3 = vsel %vm677_vm8, %v1617_v33, 0.0 }
 0x8bc   : > { %680 = vadd.xlane.f32.xlu0 %v678_v2  ;;  %682 = vadd.xlane.f32.xlu1 %v679_v3 }
 0x8cd   : > { %691 = vperm.xlu1 %1132, %v1593_v7  }
 0x8d1   : > { %1133 = vset.pattern.permute.xlu1 %v1354_v4 }
 0x8d2   : > { %688 = vperm.xlu0 %1131, %v1591_v6  }
 0x8d6   : > { %1134 = vset.pattern.permute.xlu0 %v1354_v4 }
 0x949   : > { %v681_v5 = vpop.xlane.xlu0 %680  ;;  %v683_v8 = vpop.xlane.xlu1 %682 }
 0x94a   : > { %v685_v9 = vsel %vm684_vm9, %v681_v5, %v668_v60  ;;  %v686_v10 = vsel %vm684_vm9, %v683_v8, %v669_v63 }
 0x94d   : > { %v692_v11 = vpop.permute.xlu1 %691 }
 0x94e   : > { %vm694_vm10 = vcmp.eq.s32.totalorder %v1608_v26, %v692_v11 }
 0x94f   : > { %v696_v12 = vsel %vm694_vm10, %v1617_v33, 0.0 }
 0x950   : > { %699 = vadd.xlane.f32.xlu0 %v696_v12 }
 0x951   : > { %v689_v13 = vpop.permute.xlu0 %688 }
 0x952   : > { %vm693_vm11 = vcmp.eq.s32.totalorder %v1608_v26, %v689_v13 }
 0x953   : > { %v695_v14 = vsel %vm693_vm11, %v1612_v29, 0.0  ;;  %vm752_vm11 = vcmp.eq.s32.totalorder %v1608_v26, 22 }
 0x954   : > { %697 = vadd.xlane.f32.xlu1 %v695_v14 }
 0x965   : > { %705 = vperm.xlu1 %1133, %v1591_v6  }
 0x966   : > { %708 = vperm.xlu0 %1134, %v1593_v7  }
 0x969   : > { %1136 = vset.pattern.permute.xlu1 %v1355_v15 }
 0x96a   : > { %1135 = vset.pattern.permute.xlu0 %v1355_v15 }
 0x96b   : > { %722 = vperm.xlu0 %1135, %v1591_v6  }
 0x96f   : > { %1137 = vset.pattern.permute.xlu0 %v1356_v16 }
 0x9dd   : > { %v700_v17 = vpop.xlane.xlu0 %699 }
 0x9de   : > { %v703_v18 = vsel %vm701_vm12, %v700_v17, %v686_v10 }
 0x9e1   : > { %v698_v19 = vpop.xlane.xlu1 %697 }
 0x9e2   : > { %v702_v20 = vsel %vm701_vm12, %v698_v19, %v685_v9  ;;  %vm769_vm12 = vcmp.eq.s32.totalorder %v1608_v26, 23 }
 0x9e5   : > { %v709_v21 = vpop.permute.xlu0 %708  ;;  %v706_v22 = vpop.permute.xlu1 %705 }
 0x9e6   : > { %vm710_vm13 = vcmp.eq.s32.totalorder %v1608_v26, %v706_v22  ;;  %vm711_vm14 = vcmp.eq.s32.totalorder %v1608_v26, %v709_v21 }
 0x9e7   : > { %v712_v23 = vsel %vm710_vm13, %v1612_v29, 0.0  ;;  %v713_v25 = vsel %vm711_vm14, %v1617_v33, 0.0  ;;  %vm786_vm13 = vcmp.eq.s32.totalorder %v1608_v26, 24  ;;  %vm803_vm14 = vcmp.eq.s32.totalorder %v1608_v26, 25 }
 0x9e8   : > { %714 = vadd.xlane.f32.xlu1 %v712_v23 }
 0x9ea   : > { %v723_v24 = vpop.permute.xlu0 %722 }
 0x9eb   : > { %vm727_vm15 = vcmp.eq.s32.totalorder %v1608_v26, %v723_v24 }
 0x9ec   : > { %716 = vadd.xlane.f32.xlu1 %v713_v25  ;;  %v729_v27 = vsel %vm727_vm15, %v1612_v29, 0.0 }
 0x9ed   : > { %731 = vadd.xlane.f32.xlu0 %v729_v27 }
 0x9fd   : > { %725 = vperm.xlu1 %1136, %v1593_v7  }
 0xa01   : > { %1138 = vset.pattern.permute.xlu1 %v1356_v16 }
 0xa03   : > { %739 = vperm.xlu0 %1137, %v1591_v6  }
 0xa07   : > { %1141 = vset.pattern.permute.xlu0 %v1357_v28 }
 0xa08   : > { %776 = vperm.xlu0 %1141, %v1593_v7  }
 0xa0c   : > { %1143 = vset.pattern.permute.xlu0 %v1358_v30 }
 0xa75   : > { %v715_v31 = vpop.xlane.xlu1 %714 }
 0xa76   : > { %v719_v32 = vsel %vm718_vm0, %v715_v31, %v702_v20 }
 0xa79   : > { %v717_v34 = vpop.xlane.xlu1 %716 }
 0xa7a   : > { %v720_v35 = vsel %vm718_vm0, %v717_v34, %v703_v18  ;;  %v732_v36 = vpop.xlane.xlu0 %731 }
 0xa7b   : > { %v736_v37 = vsel %vm735_vm1, %v732_v36, %v719_v32 }
 0xa7d   : > { %v726_v38 = vpop.permute.xlu1 %725 }
 0xa7e   : > { %vm728_vm2 = vcmp.eq.s32.totalorder %v1608_v26, %v726_v38 }
 0xa7f   : > { %v730_v39 = vsel %vm728_vm2, %v1617_v33, 0.0 }
 0xa80   : > { %733 = vadd.xlane.f32.xlu1 %v730_v39 }
 0xa82   : > { %v740_v40 = vpop.permute.xlu0 %739 }
 0xa83   : > { %vm744_vm3 = vcmp.eq.s32.totalorder %v1608_v26, %v740_v40 }
 0xa84   : > { %v746_v41 = vsel %vm744_vm3, %v1612_v29, 0.0 }
 0xa85   : > { %748 = vadd.xlane.f32.xlu0 %v746_v41 }
 0xa87   : > { %v777_v49 = vpop.permute.xlu0 %776 }
 0xa88   : > { %vm779_vm7 = vcmp.eq.s32.totalorder %v1608_v26, %v777_v49 }
 0xa89   : > { %v781_v51 = vsel %vm779_vm7, %v1617_v33, 0.0 }
 0xa91   : > { %742 = vperm.xlu1 %1138, %v1593_v7  }
 0xa95   : > { %1139 = vset.pattern.permute.xlu1 %v1359_v42 }
 0xa96   : > { %756 = vperm.xlu1 %1139, %v1591_v6  }
 0xa9a   : > { %759 = vperm.xlu1 %1139, %v1593_v7  }
 0xa9e   : > { %1140 = vset.pattern.permute.xlu1 %v1357_v28 }
 0xa9f   : > { %773 = vperm.xlu1 %1140, %v1591_v6  }
 0xaa3   : > { %1142 = vset.pattern.permute.xlu1 %v1358_v30 }
 0xaa4   : > { %790 = vperm.xlu1 %1142, %v1591_v6  }
 0xaa8   : > { %793 = vperm.xlu1 %1142, %v1593_v7  }
 0xb0d   : > { %v734_v43 = vpop.xlane.xlu1 %733 }
 0xb0e   : > { %v737_v44 = vsel %vm735_vm1, %v734_v43, %v720_v35 }
 0xb11   : > { %v743_v45 = vpop.permute.xlu1 %742 }
 0xb12   : > { %vm745_vm4 = vcmp.eq.s32.totalorder %v1608_v26, %v743_v45  ;;  %v749_v57 = vpop.xlane.xlu0 %748 }
 0xb13   : > { %v747_v46 = vsel %vm745_vm4, %v1617_v33, 0.0  ;;  %v753_v62 = vsel %vm752_vm11, %v749_v57, %v736_v37 }
 0xb14   : > { %750 = vadd.xlane.f32.xlu1 %v747_v46 }
 0xb15   : > { %v757_v47 = vpop.permute.xlu1 %756 }
 0xb16   : > { %vm761_vm5 = vcmp.eq.s32.totalorder %v1608_v26, %v757_v47 }
 0xb17   : > { %v763_v48 = vsel %vm761_vm5, %v1612_v29, 0.0 }
 0xb18   : > { %765 = vadd.xlane.f32.xlu0 %v763_v48 }
 0xb19   : > { %v760_v6 = vpop.permute.xlu1 %759 }
 0xb1a   : > { %vm762_vm6 = vcmp.eq.s32.totalorder %v1608_v26, %v760_v6 }
 0xb1b   : > { %v764_v7 = vsel %vm762_vm6, %v1617_v33, 0.0 }
 0xb1c   : > { %767 = vadd.xlane.f32.xlu0 %v764_v7 }
 0xb1e   : > { %v774_v50 = vpop.permute.xlu1 %773 }
 0xb1f   : > { %vm778_vm8 = vcmp.eq.s32.totalorder %v1608_v26, %v774_v50 }
 0xb20   : > { %v780_v52 = vsel %vm778_vm8, %v1612_v29, 0.0  ;;  %784 = vadd.xlane.f32.xlu0 %v781_v51 }
 0xb21   : > { %782 = vadd.xlane.f32.xlu1 %v780_v52 }
 0xb23   : > { %v791_v53 = vpop.permute.xlu1 %790 }
 0xb24   : > { %vm795_vm9 = vcmp.eq.s32.totalorder %v1608_v26, %v791_v53 }
 0xb25   : > { %v797_v54 = vsel %vm795_vm9, %v1612_v29, 0.0 }
 0xb26   : > { %799 = vadd.xlane.f32.xlu1 %v797_v54 }
 0xb27   : > { %v794_v55 = vpop.permute.xlu1 %793 }
 0xb28   : > { %vm796_vm10 = vcmp.eq.s32.totalorder %v1608_v26, %v794_v55 }
 0xb29   : > { %v798_v56 = vsel %vm796_vm10, %v1617_v33, 0.0 }
 0xb2a   : > { %801 = vadd.xlane.f32.xlu0 %v798_v56 }
 0xba1   : > { %v751_v59 = vpop.xlane.xlu1 %750 }
 0xba2   : > { %v754_v2 = vsel %vm752_vm11, %v751_v59, %v737_v44 }
 0xba5   : > { %v766_v58 = vpop.xlane.xlu0 %765 }
 0xba6   : > { %v770_v29 = vsel %vm769_vm12, %v766_v58, %v753_v62 }
 0xba9   : > { %v768_v60 = vpop.xlane.xlu0 %767 }
 0xbaa   : > { %v771_v4 = vsel %vm769_vm12, %v768_v60, %v754_v2 }
 0xbad   : > { %v785_v63 = vpop.xlane.xlu0 %784 }
 0xbae   : > { %v783_v61 = vpop.xlane.xlu1 %782  ;;  %v788_v5 = vsel %vm786_vm13, %v785_v63, %v771_v4 }
 0xbaf   : > { %v787_v0 = vsel %vm786_vm13, %v783_v61, %v770_v29 }
 0xbb3   : > { %v800_v1 = vpop.xlane.xlu1 %799 }
 0xbb4   : > { %v804_v33 = vsel %vm803_vm14, %v800_v1, %v787_v0 }
 0xbb5   : > { %v963_v3 = vmul.f32 -1.442695, %v804_v33 }
 0xbb7   : > { %1153 = vpow2.f32 %v963_v3  ;;  %v802_v8 = vpop.xlane.xlu0 %801 }
 0xbb8   : > { %v805_v9 = vsel %vm803_vm14, %v802_v8, %v788_v5 }
 0xbb9   : > { %v964_v10 = vmul.f32 -1.442695, %v805_v9 }
 0xbbb   : > { %1155 = vpow2.f32 %v964_v10 }
 0xbc1   : > { %v1154_v11 = vpop.eup %1153 }
 0xbc2   : > { %v812_v12 = vadd.f32 1.0, %v1154_v11 }
 0xbc4   : > { %1157 = vrcp.f32 %v812_v12 }
 0xbc5   : > { %v1156_v26 = vpop.eup %1155 }
 0xbc6   : > { %v813_v13 = vadd.f32 1.0, %v1156_v26 }
 0xbc8   : > { %1159 = vrcp.f32 %v813_v13 }
 0xbce   : > { %v1158_v14 = vpop.eup %1157 }
 0xbcf   : > { %818 = vst [vmem:[%s242_s11] sm:$0xff] %v1158_v14 }
 0xbd2   : > { %v1160_v15 = vpop.eup %1159 }
 0xbd3   : > { %819 = vst [vmem:[%s242_s11 + $0x8] sm:$0xff] %v1160_v15 }
 0xbd4   : > { %1262 = shalt.err (!%p1259_p6)
}
 0xbd5   : > { %s1263_s28 = scalar_lea.hbm %s1810_s5, 256  ;;  %s1267_s9 = scalar_lea.hbm %s1859_s3, 512 }
 0xbd6   : > { %p1264_p8 = scmp.ne.s32.totalorder %s1810_s5, %s1263_s28  ;;  %p1268_p4 = scmp.lt.u32.totalorder %s1810_s5, %s1859_s3 }
 0xbd7   : > { %p1269_p11 = scmp.lt.u32.totalorder %s1267_s9, %s1263_s28  ;;  %p1271_p3 = scmp.lt.u32.totalorder %s1263_s28, %s1810_s5 }
 0xbd8   : > { %p1265_p10 = pnand %p1264_p8, %p1477_p12 }
 0xbd9   : > { %p1270_p13 = por %p1269_p11, %p1268_p4 }
 0xbda   : > { %p1266_p0 = pneg %p1265_p10 }
 0xbdb   : > { %p1272_p7 = por %p1271_p3, %p1270_p13 }
 0xbdd   : > { %p1273_p9 = pnand %p1272_p7, %p1266_p0 }
 0xbdf   : > { %1276 = shalt.err (!%p1273_p9)
}
 0xbe0   : > { %s1361_s29 = smov 128   ;;  %s1362_s10 = smov 8  }
 0xbe1   : > { %1010 = dma.vmem_to_hbm [thread:$0]  (%p1477_p12), %s1812_s23, 256, %s1810_s5, %s821_s6, %s1361_s29, %s1361_s29, %s1362_s10  }
 0xbe2 PF: > { %s849_s18 = sand.u32 1, %s1311_s12   ;;  %p1876_p1 = scmp.ne.s32.totalorder %s1865_s19, 0 }
 0xbe3   : > { %p1877_p5 = scmp.ge.s32.totalorder %s1323_s15, 2  ;;  %s850_s11 = scalar_lea.sflag [#allocation4], %s849_s18 }
 0xbe5   : > { %p1024_p2 = pnand %p1877_p5, %p1876_p1 }
 0xbe7   : > { %1306 = dma.done.wait (!%p1024_p2), %s850_s11, 256  }
 0xbe8   : > { %1308 = vsyncadd (!%p1024_p2), %s850_s11, 4294967040  ;;  %p19_p6 = scmp.ge.s32.totalorder %s1439_s24, 4   ;;  %s1878_s12 = smov %s1315_s13 }
 0xbe9   : > { %s1879_s13 = smov %s1319_s14  ;;  %s1880_s14 = smov %s1473_s17 }
 0xbea   : > { %s1881_s15 = smov %s1439_s24  ;;  %21 = sbr.rel (!%p19_p6) target bundleno = 9 (0x9), region = 94 }
 0xbf1   :  { %855 = vsyncpa [#allocation3], 1 }
 0xbf2   :  { %857 = vsyncpa [#allocation3 + $0x1], 1 }
 0xbf3   :  { %858 = vsyncpa [#allocation6], 1 }
 0xbf4   :  { %860 = vsyncpa [#allocation6 + $0x1], 1 }
 0xbf5   :  { %861 = vsyncpa [#allocation4], 1 }
 0xbf6   :  { %863 = vsyncpa [#allocation4 + $0x1], 1 }

</bundles_post_ra>
